<compile_context>
chip_gen: v6e
topology: v6e:2x2x1
jax: 0.10.0
libtpu: 0.0.40
codegen_flags: <defaults>
</compile_context>

<pallas_src>
import jax
import jax.numpy as jnp
from jax import lax
from jax.experimental import pallas as pl
from jax.experimental.pallas import tpu as pltpu

CHANNEL_PAD = 64          # physical complex channels per layer -> 2*64 = 128 lanes
EPS = 1e-12


# -----------------------------------------------------------------------------
# Fused kernel builder (whole network in one pallas_call, one sample per step)
# -----------------------------------------------------------------------------
def _build_fused_kernel(layer_cfgs, c2):
    """layer_cfgs: static tuple of (stride, h_in, w_in, h_out, w_out), 3x3/pad-1."""
    nl = len(layer_cfgs)
    half = c2 // 2

    def kernel(*refs):
        x_ref = refs[0]                          # (1, H0+2, W0+2, c2) padded input
        conv_refs = refs[1:1 + 2 * nl]           # per layer: W (9,c2,c2), bab (2,c2)
        wh_ref = refs[1 + 2 * nl]                # (2, c2) fused complex linear
        bh_ref = refs[2 + 2 * nl]                # (2, 1)  [br, bi]
        o_ref = refs[3 + 2 * nl]                 # (1, 1, c2)
        bufs = refs[4 + 2 * nl:]                 # padded inter-layer VMEM scratch

        last = None
        for l, (stride, h_in, w_in, h_out, w_out) in enumerate(layer_cfgs):
            w_ref = conv_refs[2 * l]
            bab_ref = conv_refs[2 * l + 1]
            m = h_out * w_out

            def tap(t):
                di, dj = t // 3, t % 3
                if l == 0:
                    if stride == 1:
                        xt = x_ref[0, di:di + h_out, dj:dj + w_out, :]
                    else:
                        xt = x_ref[0, pl.ds(di, h_out, stride=stride),
                                   pl.ds(dj, w_out, stride=stride), :]
                else:
                    src = bufs[(l - 1) % len(bufs)]
                    if stride == 1:
                        xt = src[di:di + h_out, dj:dj + w_out, :]
                    else:
                        xt = src[pl.ds(di, h_out, stride=stride),
                                 pl.ds(dj, w_out, stride=stride), :]
                return jnp.dot(xt.reshape(m, c2), w_ref[t],
                               preferred_element_type=jnp.float32)

            # Complex conv = 9 shifted fused-complex matmuls, f32 accumulation.
            acc = tap(0)
            for t in range(1, 9):
                acc = acc + tap(t)

            # Epilogue: complex bias + modReLU.
            bab = bab_ref[...]                                   # (2, c2)
            y = acc + bab[0:1, :]
            yy = y * y
            s2 = yy + pltpu.roll(yy, shift=half, axis=1)         # |z|^2 on both halves
            scale = jnp.maximum(1.0 + bab[1:2, :] * lax.rsqrt(s2 + EPS), 0.0)
            a = y * scale

            if l + 1 < nl:
                # Stage next layer's (zero-)padded input in VMEM scratch.
                dst = bufs[l % len(bufs)]
                dst[...] = jnp.zeros_like(dst)                   # pad border = 0
                dst[1:1 + h_out, 1:1 + w_out, :] = a.reshape(h_out, w_out, c2)
            else:
                last = a                                         # (m, c2)

        # Fused head: global complex avg-pool + complex Linear(C->1) + Mod.
        fm = jnp.mean(last, axis=0, keepdims=True)               # (1, c2)
        yh = jnp.sum(fm * wh_ref[...], axis=1, keepdims=True) + bh_ref[...]   # (2, 1)
        mod = jnp.sqrt(yh[0:1, :] * yh[0:1, :] + yh[1:2, :] * yh[1:2, :])     # (1, 1)
        o_ref[...] = jnp.broadcast_to(mod.reshape(1, 1, 1), (1, 1, c2))

    return kernel


# -----------------------------------------------------------------------------
# Parameter construction (fused + lane-padded at build time)
# -----------------------------------------------------------------------------
def _fuse_conv_layer(wr, wi, br, bi, ab, cpad):
    """Complex conv params -> per-tap fused real weight + packed bias/modReLU bias.

    wr/wi: (taps, cin, cout); br/bi/ab: (cout,)
    Returns W (taps, 2*cpad, 2*cpad) f32 and bab (2, 2*cpad) f32.
    """
    taps, cin, cout = wr.shape
    base = jnp.zeros((taps, cpad, cpad), jnp.float32)
    Wr = base.at[:, :cin, :cout].set(wr)
    Wi = base.at[:, :cin, :cout].set(wi)
    top = jnp.concatenate([Wr, Wi], axis=2)        # rows fed by real input chans
    bot = jnp.concatenate([-Wi, Wr], axis=2)       # rows fed by imag input chans
    W = jnp.concatenate([top, bot], axis=1)        # (taps, 2*cpad, 2*cpad)
    bias = jnp.zeros((2 * cpad,), jnp.float32).at[:cout].set(br) \
                                              .at[cpad:cpad + cout].set(bi)
    actb = jnp.zeros((2 * cpad,), jnp.float32).at[:cout].set(ab) \
                                              .at[cpad:cpad + cout].set(ab)
    return W, jnp.stack([bias, actb], axis=0)


def _fuse_fc(wr, wi, br, bi, cpad):
    """Complex Linear(c->1) -> fused (2, 2*cpad) weight rows + (2,1) bias."""
    c = wr.shape[0]
    row_r = jnp.zeros((2 * cpad,), jnp.float32).at[:c].set(wr).at[cpad:cpad + c].set(-wi)
    row_i = jnp.zeros((2 * cpad,), jnp.float32).at[:c].set(wi).at[cpad:cpad + c].set(wr)
    Wh = jnp.stack([row_r, row_i], axis=0)
    bh = jnp.stack([br, bi]).reshape(2, 1).astype(jnp.float32)
    return Wh, bh


def build_params(key,
                 input_channels=4,
                 num_conv_layers=2,
                 channels_multiplicator=1,
                 step_pooling=1,
                 max_channels=32,
                 num_filter=32,
                 kernel_size_conv=3,
                 stride_conv=1,
                 padding_conv=1,
                 image_size=16,
                 min_spatial_size=8,
                 channel_pad=CHANNEL_PAD):
    # TODO(synk): kernel currently specializes the module defaults (3x3, pad 1).
    assert kernel_size_conv == 3 and padding_conv == 1
    conv, cfgs = [], []
    in_ch, out_ch = input_channels, num_filter
    conv_size, h = image_size, image_size
    stride_l = stride_conv
    taps = kernel_size_conv * kernel_size_conv
    for l in range(num_conv_layers):
        if l != 0:
            in_ch = min(out_ch, max_channels)
            stride_l = stride_conv
            if l % step_pooling == 0 and conv_size > min_spatial_size:
                out_ch = min(in_ch * channels_multiplicator, max_channels)
                stride_l = 2
                conv_size = conv_size // stride_l
        assert in_ch <= channel_pad and out_ch <= channel_pad
        h_in = h
        h_out = (h_in + 2 * padding_conv - kernel_size_conv) // stride_l + 1
        h = h_out
        key, k1, k2, k3, k4 = jax.random.split(key, 5)
        scale = (in_ch * taps) ** -0.5
        wr = jax.random.normal(k1, (taps, in_ch, out_ch), jnp.float32) * scale
        wi = jax.random.normal(k2, (taps, in_ch, out_ch), jnp.float32) * scale
        br = jax.random.normal(k3, (out_ch,), jnp.float32) * 0.05
        bi = jax.random.normal(k4, (out_ch,), jnp.float32) * 0.05
        ab = jnp.full((out_ch,), -0.1, jnp.float32)          # modReLU bias
        conv.append(_fuse_conv_layer(wr, wi, br, bi, ab, channel_pad))
        cfgs.append((stride_l, h_in, h_in, h_out, h_out))

    num_features = out_ch
    key, k1, k2, k3, k4 = jax.random.split(key, 5)
    fscale = num_features ** -0.5
    fwr = jax.random.normal(k1, (num_features,), jnp.float32) * fscale
    fwi = jax.random.normal(k2, (num_features,), jnp.float32) * fscale
    fbr = jax.random.normal(k3, (), jnp.float32) * 0.05
    fbi = jax.random.normal(k4, (), jnp.float32) * 0.05
    fc = _fuse_fc(fwr, fwi, fbr, fbi, channel_pad)
    return dict(conv=tuple(conv), fc=fc), tuple(cfgs)


# -----------------------------------------------------------------------------
# Forward factory (static layer config closed over; mirrors module.forward)
# -----------------------------------------------------------------------------
def make_forward(layer_cfgs, input_channels, channel_pad=CHANNEL_PAD):
    c2 = 2 * channel_pad
    nl = len(layer_cfgs)
    kernel = _build_fused_kernel(layer_cfgs, c2)

    if nl > 1:
        max_hp = max(cfg[3] + 2 for cfg in layer_cfgs[:-1])
        max_wp = max(cfg[4] + 2 for cfg in layer_cfgs[:-1])
        n_bufs = 1 if nl == 2 else 2
        scratch = [pltpu.VMEM((max_hp, max_wp, c2), jnp.float32)
                   for _ in range(n_bufs)]
    else:
        scratch = []

    @jax.jit
    def forward(z, conv_params, fc_params):
        z = z.astype(jnp.complex64)
        # TODO(synk): mirrors the reference's fragile layout heuristic verbatim.
        if z.ndim == 4 and z.shape[1] != input_channels:
            z = jnp.transpose(z, (2, 3, 0, 1))
        n, c, hh, ww = z.shape
        assert hh == layer_cfgs[0][1] and ww == layer_cfgs[0][2]

        # NCHW complex -> NHWC real, lanes = [real C | pad | imag C | pad], +spatial pad.
        zt = jnp.transpose(z, (0, 2, 3, 1))
        x = jnp.zeros((n, hh, ww, c2), jnp.float32)
        x = x.at[..., :c].set(jnp.real(zt)).at[..., channel_pad:channel_pad + c].set(jnp.imag(zt))
        x0p = jnp.pad(x, ((0, 0), (1, 1), (1, 1), (0, 0)))

        inputs = [x0p]
        in_specs = [pl.BlockSpec((1, hh + 2, ww + 2, c2), lambda i: (i, 0, 0, 0))]
        for (W, bab) in conv_params:
            inputs += [W, bab]
            in_specs += [pl.BlockSpec(W.shape, lambda i: (0, 0, 0)),
                         pl.BlockSpec(bab.shape, lambda i: (0, 0))]
        wh, bh = fc_params
        inputs += [wh, bh]
        in_specs += [pl.BlockSpec(wh.shape, lambda i: (0, 0)),
                     pl.BlockSpec(bh.shape, lambda i: (0, 0))]

        out = pl.pallas_call(
            kernel,
            out_shape=jax.ShapeDtypeStruct((n, 1, c2), jnp.float32),
            grid=(n,),
            in_specs=in_specs,
            out_specs=pl.BlockSpec((1, 1, c2), lambda i: (i, 0, 0)),
            scratch_shapes=scratch,
            compiler_params=pltpu.CompilerParams(
                dimension_semantics=("parallel",)),
        )(*inputs)

        # model(z).real.to(complex64): modulus is real; cast back to complex64.
        return out[:, 0, :1].astype(jnp.complex64)

    return forward


# -----------------------------------------------------------------------------
if __name__ == "__main__":
    key = jax.random.PRNGKey(0)
    kz1, kz2, kp = jax.random.split(key, 3)

    N, C_IN, IMG = 2, 4, 16
    zr = jax.random.normal(kz1, (N, C_IN, IMG, IMG), jnp.float32)
    zi = jax.random.normal(kz2, (N, C_IN, IMG, IMG), jnp.float32)
    z = (zr + 1j * zi).astype(jnp.complex64)

    params, layer_cfgs = build_params(kp, input_channels=C_IN, num_conv_layers=2,
                                      channels_multiplicator=1, step_pooling=1,
                                      max_channels=32, num_filter=32,
                                      image_size=IMG, min_spatial_size=8)

    forward = make_forward(layer_cfgs, input_channels=C_IN)
    out = forward(z, params["conv"], params["fc"])
    out = jax.block_until_ready(out)

    assert out.shape == (N, 1), out.shape
    assert out.dtype == jnp.complex64, out.dtype
    assert bool(jnp.all(jnp.isfinite(jnp.real(out))))
    print("KERNEL_OK")
</pallas_src>

<mosaic_0001>
module attributes {stable_mosaic.version = 11 : i64} {
  func.func @kernel(%arg0: i32, %arg1: memref<1x18x18x128xf32, #tpu.memory_space<vmem>>, %arg2: memref<9x128x128xf32, #tpu.memory_space<vmem>>, %arg3: memref<2x128xf32, #tpu.memory_space<vmem>>, %arg4: memref<9x128x128xf32, #tpu.memory_space<vmem>>, %arg5: memref<2x128xf32, #tpu.memory_space<vmem>>, %arg6: memref<2x128xf32, #tpu.memory_space<vmem>>, %arg7: memref<2x1xf32, #tpu.memory_space<vmem>>, %arg8: memref<1x1x128xf32, #tpu.memory_space<vmem>>, %arg9: memref<18x18x128xf32, #tpu.memory_space<vmem>>) attributes {dimension_semantics = [#tpu.dimension_semantics<parallel>], iteration_bounds = array<i64: 2>, scalar_prefetch = 0 : i64, scratch_operands = 1 : i64, tpu.core_type = #tpu.core_type<tc>, window_params = [{transform_indices = @transform_0, window_bounds = array<i64: 1, 18, 18, 128>}, {pipeline_mode = #tpu.pipeline_mode<synchronous>, transform_indices = @transform_1, window_bounds = array<i64: 9, 128, 128>}, {pipeline_mode = #tpu.pipeline_mode<synchronous>, transform_indices = @transform_2, window_bounds = array<i64: 2, 128>}, {pipeline_mode = #tpu.pipeline_mode<synchronous>, transform_indices = @transform_3, window_bounds = array<i64: 9, 128, 128>}, {pipeline_mode = #tpu.pipeline_mode<synchronous>, transform_indices = @transform_4, window_bounds = array<i64: 2, 128>}, {pipeline_mode = #tpu.pipeline_mode<synchronous>, transform_indices = @transform_5, window_bounds = array<i64: 2, 128>}, {pipeline_mode = #tpu.pipeline_mode<synchronous>, transform_indices = @transform_6, window_bounds = array<i64: 2, 1>}, {transform_indices = @transform_7, window_bounds = array<i64: 1, 1, 128>}]} {
    %c0 = arith.constant 0 : index
    %c0_0 = arith.constant 0 : index
    %c0_1 = arith.constant 0 : index
    %c0_2 = arith.constant 0 : index
    %0 = vector.load %arg1[%c0, %c0_0, %c0_1, %c0_2] : memref<1x18x18x128xf32, #tpu.memory_space<vmem>>, vector<1x16x16x128xf32>
    %1 = vector.shape_cast %0 : vector<1x16x16x128xf32> to vector<16x16x128xf32>
    %2 = vector.shape_cast %1 : vector<16x16x128xf32> to vector<256x128xf32>
    %c0_3 = arith.constant 0 : index
    %c0_4 = arith.constant 0 : index
    %c0_5 = arith.constant 0 : index
    %3 = vector.load %arg2[%c0_3, %c0_4, %c0_5] : memref<9x128x128xf32, #tpu.memory_space<vmem>>, vector<1x128x128xf32>
    %4 = vector.shape_cast %3 : vector<1x128x128xf32> to vector<128x128xf32>
    %cst = arith.constant dense<0.000000e+00> : vector<256x128xf32>
    %5 = tpu.matmul %2, %4, %cst {dimension_numbers = #tpu.dot_dimension_numbers<[1], [0], [0], [1], [0, 0, 1, 1], [], []>} : vector<256x128xf32>, vector<128x128xf32>, vector<256x128xf32> -> vector<256x128xf32>
    %c0_6 = arith.constant 0 : index
    %c0_7 = arith.constant 0 : index
    %c1 = arith.constant 1 : index
    %c0_8 = arith.constant 0 : index
    %6 = vector.load %arg1[%c0_6, %c0_7, %c1, %c0_8] : memref<1x18x18x128xf32, #tpu.memory_space<vmem>>, vector<1x16x16x128xf32>
    %7 = vector.shape_cast %6 : vector<1x16x16x128xf32> to vector<16x16x128xf32>
    %8 = vector.shape_cast %7 : vector<16x16x128xf32> to vector<256x128xf32>
    %c1_9 = arith.constant 1 : index
    %c0_10 = arith.constant 0 : index
    %c0_11 = arith.constant 0 : index
    %9 = vector.load %arg2[%c1_9, %c0_10, %c0_11] : memref<9x128x128xf32, #tpu.memory_space<vmem>>, vector<1x128x128xf32>
    %10 = vector.shape_cast %9 : vector<1x128x128xf32> to vector<128x128xf32>
    %cst_12 = arith.constant dense<0.000000e+00> : vector<256x128xf32>
    %11 = tpu.matmul %8, %10, %cst_12 {dimension_numbers = #tpu.dot_dimension_numbers<[1], [0], [0], [1], [0, 0, 1, 1], [], []>} : vector<256x128xf32>, vector<128x128xf32>, vector<256x128xf32> -> vector<256x128xf32>
    %12 = arith.addf %5, %11 : vector<256x128xf32>
    %c0_13 = arith.constant 0 : index
    %c0_14 = arith.constant 0 : index
    %c2 = arith.constant 2 : index
    %c0_15 = arith.constant 0 : index
    %13 = vector.load %arg1[%c0_13, %c0_14, %c2, %c0_15] : memref<1x18x18x128xf32, #tpu.memory_space<vmem>>, vector<1x16x16x128xf32>
    %14 = vector.shape_cast %13 : vector<1x16x16x128xf32> to vector<16x16x128xf32>
    %15 = vector.shape_cast %14 : vector<16x16x128xf32> to vector<256x128xf32>
    %c2_16 = arith.constant 2 : index
    %c0_17 = arith.constant 0 : index
    %c0_18 = arith.constant 0 : index
    %16 = vector.load %arg2[%c2_16, %c0_17, %c0_18] : memref<9x128x128xf32, #tpu.memory_space<vmem>>, vector<1x128x128xf32>
    %17 = vector.shape_cast %16 : vector<1x128x128xf32> to vector<128x128xf32>
    %cst_19 = arith.constant dense<0.000000e+00> : vector<256x128xf32>
    %18 = tpu.matmul %15, %17, %cst_19 {dimension_numbers = #tpu.dot_dimension_numbers<[1], [0], [0], [1], [0, 0, 1, 1], [], []>} : vector<256x128xf32>, vector<128x128xf32>, vector<256x128xf32> -> vector<256x128xf32>
    %19 = arith.addf %12, %18 : vector<256x128xf32>
    %c0_20 = arith.constant 0 : index
    %c1_21 = arith.constant 1 : index
    %c0_22 = arith.constant 0 : index
    %c0_23 = arith.constant 0 : index
    %20 = vector.load %arg1[%c0_20, %c1_21, %c0_22, %c0_23] : memref<1x18x18x128xf32, #tpu.memory_space<vmem>>, vector<1x16x16x128xf32>
    %21 = vector.shape_cast %20 : vector<1x16x16x128xf32> to vector<16x16x128xf32>
    %22 = vector.shape_cast %21 : vector<16x16x128xf32> to vector<256x128xf32>
    %c3 = arith.constant 3 : index
    %c0_24 = arith.constant 0 : index
    %c0_25 = arith.constant 0 : index
    %23 = vector.load %arg2[%c3, %c0_24, %c0_25] : memref<9x128x128xf32, #tpu.memory_space<vmem>>, vector<1x128x128xf32>
    %24 = vector.shape_cast %23 : vector<1x128x128xf32> to vector<128x128xf32>
    %cst_26 = arith.constant dense<0.000000e+00> : vector<256x128xf32>
    %25 = tpu.matmul %22, %24, %cst_26 {dimension_numbers = #tpu.dot_dimension_numbers<[1], [0], [0], [1], [0, 0, 1, 1], [], []>} : vector<256x128xf32>, vector<128x128xf32>, vector<256x128xf32> -> vector<256x128xf32>
    %26 = arith.addf %19, %25 : vector<256x128xf32>
    %c0_27 = arith.constant 0 : index
    %c1_28 = arith.constant 1 : index
    %c1_29 = arith.constant 1 : index
    %c0_30 = arith.constant 0 : index
    %27 = vector.load %arg1[%c0_27, %c1_28, %c1_29, %c0_30] : memref<1x18x18x128xf32, #tpu.memory_space<vmem>>, vector<1x16x16x128xf32>
    %28 = vector.shape_cast %27 : vector<1x16x16x128xf32> to vector<16x16x128xf32>
    %29 = vector.shape_cast %28 : vector<16x16x128xf32> to vector<256x128xf32>
    %c4 = arith.constant 4 : index
    %c0_31 = arith.constant 0 : index
    %c0_32 = arith.constant 0 : index
    %30 = vector.load %arg2[%c4, %c0_31, %c0_32] : memref<9x128x128xf32, #tpu.memory_space<vmem>>, vector<1x128x128xf32>
    %31 = vector.shape_cast %30 : vector<1x128x128xf32> to vector<128x128xf32>
    %cst_33 = arith.constant dense<0.000000e+00> : vector<256x128xf32>
    %32 = tpu.matmul %29, %31, %cst_33 {dimension_numbers = #tpu.dot_dimension_numbers<[1], [0], [0], [1], [0, 0, 1, 1], [], []>} : vector<256x128xf32>, vector<128x128xf32>, vector<256x128xf32> -> vector<256x128xf32>
    %33 = arith.addf %26, %32 : vector<256x128xf32>
    %c0_34 = arith.constant 0 : index
    %c1_35 = arith.constant 1 : index
    %c2_36 = arith.constant 2 : index
    %c0_37 = arith.constant 0 : index
    %34 = vector.load %arg1[%c0_34, %c1_35, %c2_36, %c0_37] : memref<1x18x18x128xf32, #tpu.memory_space<vmem>>, vector<1x16x16x128xf32>
    %35 = vector.shape_cast %34 : vector<1x16x16x128xf32> to vector<16x16x128xf32>
    %36 = vector.shape_cast %35 : vector<16x16x128xf32> to vector<256x128xf32>
    %c5 = arith.constant 5 : index
    %c0_38 = arith.constant 0 : index
    %c0_39 = arith.constant 0 : index
    %37 = vector.load %arg2[%c5, %c0_38, %c0_39] : memref<9x128x128xf32, #tpu.memory_space<vmem>>, vector<1x128x128xf32>
    %38 = vector.shape_cast %37 : vector<1x128x128xf32> to vector<128x128xf32>
    %cst_40 = arith.constant dense<0.000000e+00> : vector<256x128xf32>
    %39 = tpu.matmul %36, %38, %cst_40 {dimension_numbers = #tpu.dot_dimension_numbers<[1], [0], [0], [1], [0, 0, 1, 1], [], []>} : vector<256x128xf32>, vector<128x128xf32>, vector<256x128xf32> -> vector<256x128xf32>
    %40 = arith.addf %33, %39 : vector<256x128xf32>
    %c0_41 = arith.constant 0 : index
    %c2_42 = arith.constant 2 : index
    %c0_43 = arith.constant 0 : index
    %c0_44 = arith.constant 0 : index
    %41 = vector.load %arg1[%c0_41, %c2_42, %c0_43, %c0_44] : memref<1x18x18x128xf32, #tpu.memory_space<vmem>>, vector<1x16x16x128xf32>
    %42 = vector.shape_cast %41 : vector<1x16x16x128xf32> to vector<16x16x128xf32>
    %43 = vector.shape_cast %42 : vector<16x16x128xf32> to vector<256x128xf32>
    %c6 = arith.constant 6 : index
    %c0_45 = arith.constant 0 : index
    %c0_46 = arith.constant 0 : index
    %44 = vector.load %arg2[%c6, %c0_45, %c0_46] : memref<9x128x128xf32, #tpu.memory_space<vmem>>, vector<1x128x128xf32>
    %45 = vector.shape_cast %44 : vector<1x128x128xf32> to vector<128x128xf32>
    %cst_47 = arith.constant dense<0.000000e+00> : vector<256x128xf32>
    %46 = tpu.matmul %43, %45, %cst_47 {dimension_numbers = #tpu.dot_dimension_numbers<[1], [0], [0], [1], [0, 0, 1, 1], [], []>} : vector<256x128xf32>, vector<128x128xf32>, vector<256x128xf32> -> vector<256x128xf32>
    %47 = arith.addf %40, %46 : vector<256x128xf32>
    %c0_48 = arith.constant 0 : index
    %c2_49 = arith.constant 2 : index
    %c1_50 = arith.constant 1 : index
    %c0_51 = arith.constant 0 : index
    %48 = vector.load %arg1[%c0_48, %c2_49, %c1_50, %c0_51] : memref<1x18x18x128xf32, #tpu.memory_space<vmem>>, vector<1x16x16x128xf32>
    %49 = vector.shape_cast %48 : vector<1x16x16x128xf32> to vector<16x16x128xf32>
    %50 = vector.shape_cast %49 : vector<16x16x128xf32> to vector<256x128xf32>
    %c7 = arith.constant 7 : index
    %c0_52 = arith.constant 0 : index
    %c0_53 = arith.constant 0 : index
    %51 = vector.load %arg2[%c7, %c0_52, %c0_53] : memref<9x128x128xf32, #tpu.memory_space<vmem>>, vector<1x128x128xf32>
    %52 = vector.shape_cast %51 : vector<1x128x128xf32> to vector<128x128xf32>
    %cst_54 = arith.constant dense<0.000000e+00> : vector<256x128xf32>
    %53 = tpu.matmul %50, %52, %cst_54 {dimension_numbers = #tpu.dot_dimension_numbers<[1], [0], [0], [1], [0, 0, 1, 1], [], []>} : vector<256x128xf32>, vector<128x128xf32>, vector<256x128xf32> -> vector<256x128xf32>
    %54 = arith.addf %47, %53 : vector<256x128xf32>
    %c0_55 = arith.constant 0 : index
    %c2_56 = arith.constant 2 : index
    %c2_57 = arith.constant 2 : index
    %c0_58 = arith.constant 0 : index
    %55 = vector.load %arg1[%c0_55, %c2_56, %c2_57, %c0_58] : memref<1x18x18x128xf32, #tpu.memory_space<vmem>>, vector<1x16x16x128xf32>
    %56 = vector.shape_cast %55 : vector<1x16x16x128xf32> to vector<16x16x128xf32>
    %57 = vector.shape_cast %56 : vector<16x16x128xf32> to vector<256x128xf32>
    %c8 = arith.constant 8 : index
    %c0_59 = arith.constant 0 : index
    %c0_60 = arith.constant 0 : index
    %58 = vector.load %arg2[%c8, %c0_59, %c0_60] : memref<9x128x128xf32, #tpu.memory_space<vmem>>, vector<1x128x128xf32>
    %59 = vector.shape_cast %58 : vector<1x128x128xf32> to vector<128x128xf32>
    %cst_61 = arith.constant dense<0.000000e+00> : vector<256x128xf32>
    %60 = tpu.matmul %57, %59, %cst_61 {dimension_numbers = #tpu.dot_dimension_numbers<[1], [0], [0], [1], [0, 0, 1, 1], [], []>} : vector<256x128xf32>, vector<128x128xf32>, vector<256x128xf32> -> vector<256x128xf32>
    %61 = arith.addf %54, %60 : vector<256x128xf32>
    %c0_62 = arith.constant 0 : index
    %c0_63 = arith.constant 0 : index
    %62 = vector.load %arg3[%c0_62, %c0_63] : memref<2x128xf32, #tpu.memory_space<vmem>>, vector<2x128xf32>
    %63 = vector.extract_strided_slice %62 {offsets = [0, 0], sizes = [1, 128], strides = [1, 1]} : vector<2x128xf32> to vector<1x128xf32>
    %64 = vector.broadcast %63 : vector<1x128xf32> to vector<256x128xf32>
    %65 = arith.addf %61, %64 : vector<256x128xf32>
    %66 = arith.mulf %65, %65 : vector<256x128xf32>
    %c64_i32 = arith.constant 64 : i32
    %67 = tpu.dynamic_rotate %66 by %c64_i32 dim 1 : vector<256x128xf32>, i32 -> vector<256x128xf32>
    %68 = arith.addf %66, %67 : vector<256x128xf32>
    %69 = vector.extract_strided_slice %62 {offsets = [1, 0], sizes = [1, 128], strides = [1, 1]} : vector<2x128xf32> to vector<1x128xf32>
    %cst_64 = arith.constant 9.99999996E-13 : f32
    %70 = vector.broadcast %cst_64 : f32 to vector<256x128xf32>
    %71 = arith.addf %68, %70 : vector<256x128xf32>
    %72 = math.rsqrt %71 : vector<256x128xf32>
    %73 = vector.broadcast %69 : vector<1x128xf32> to vector<256x128xf32>
    %74 = arith.mulf %73, %72 : vector<256x128xf32>
    %cst_65 = arith.constant 1.000000e+00 : f32
    %75 = vector.broadcast %cst_65 : f32 to vector<256x128xf32>
    %76 = arith.addf %75, %74 : vector<256x128xf32>
    %cst_66 = arith.constant 0.000000e+00 : f32
    %77 = vector.broadcast %cst_66 : f32 to vector<256x128xf32>
    %78 = arith.maximumf %76, %77 : vector<256x128xf32>
    %79 = arith.mulf %65, %78 : vector<256x128xf32>
    %cst_67 = arith.constant 0.000000e+00 : f32
    %80 = vector.broadcast %cst_67 : f32 to vector<18x18x128xf32>
    %c0_68 = arith.constant 0 : index
    %c0_69 = arith.constant 0 : index
    %c0_70 = arith.constant 0 : index
    %81 = vector.load %arg9[%c0_68, %c0_69, %c0_70] : memref<18x18x128xf32, #tpu.memory_space<vmem>>, vector<18x18x128xf32>
    tpu.vector_store %arg9[%c0_68, %c0_69, %c0_70], %80 {strides = array<i32>} : memref<18x18x128xf32, #tpu.memory_space<vmem>>, vector<18x18x128xf32>,
    %82 = vector.shape_cast %79 : vector<256x128xf32> to vector<16x16x128xf32>
    %c1_71 = arith.constant 1 : index
    %c1_72 = arith.constant 1 : index
    %c0_73 = arith.constant 0 : index
    %83 = vector.load %arg9[%c1_71, %c1_72, %c0_73] : memref<18x18x128xf32, #tpu.memory_space<vmem>>, vector<16x16x128xf32>
    tpu.vector_store %arg9[%c1_71, %c1_72, %c0_73], %82 {strides = array<i32>} : memref<18x18x128xf32, #tpu.memory_space<vmem>>, vector<16x16x128xf32>,
    %c0_74 = arith.constant 0 : index
    %c0_75 = arith.constant 0 : index
    %c0_76 = arith.constant 0 : index
    %84 = tpu.strided_load %arg9[%c0_74, %c0_75, %c0_76] {strides = array<i32: 2, 2, 1>} : memref<18x18x128xf32, #tpu.memory_space<vmem>>, vector<8x8x128xf32>
    %85 = vector.shape_cast %84 : vector<8x8x128xf32> to vector<64x128xf32>
    %c0_77 = arith.constant 0 : index
    %c0_78 = arith.constant 0 : index
    %c0_79 = arith.constant 0 : index
    %86 = vector.load %arg4[%c0_77, %c0_78, %c0_79] : memref<9x128x128xf32, #tpu.memory_space<vmem>>, vector<1x128x128xf32>
    %87 = vector.shape_cast %86 : vector<1x128x128xf32> to vector<128x128xf32>
    %cst_80 = arith.constant dense<0.000000e+00> : vector<64x128xf32>
    %88 = tpu.matmul %85, %87, %cst_80 {dimension_numbers = #tpu.dot_dimension_numbers<[1], [0], [0], [1], [0, 0, 1, 1], [], []>} : vector<64x128xf32>, vector<128x128xf32>, vector<64x128xf32> -> vector<64x128xf32>
    %c0_81 = arith.constant 0 : index
    %c1_82 = arith.constant 1 : index
    %c0_83 = arith.constant 0 : index
    %89 = tpu.strided_load %arg9[%c0_81, %c1_82, %c0_83] {strides = array<i32: 2, 2, 1>} : memref<18x18x128xf32, #tpu.memory_space<vmem>>, vector<8x8x128xf32>
    %90 = vector.shape_cast %89 : vector<8x8x128xf32> to vector<64x128xf32>
    %c1_84 = arith.constant 1 : index
    %c0_85 = arith.constant 0 : index
    %c0_86 = arith.constant 0 : index
    %91 = vector.load %arg4[%c1_84, %c0_85, %c0_86] : memref<9x128x128xf32, #tpu.memory_space<vmem>>, vector<1x128x128xf32>
    %92 = vector.shape_cast %91 : vector<1x128x128xf32> to vector<128x128xf32>
    %cst_87 = arith.constant dense<0.000000e+00> : vector<64x128xf32>
    %93 = tpu.matmul %90, %92, %cst_87 {dimension_numbers = #tpu.dot_dimension_numbers<[1], [0], [0], [1], [0, 0, 1, 1], [], []>} : vector<64x128xf32>, vector<128x128xf32>, vector<64x128xf32> -> vector<64x128xf32>
    %94 = arith.addf %88, %93 : vector<64x128xf32>
    %c0_88 = arith.constant 0 : index
    %c2_89 = arith.constant 2 : index
    %c0_90 = arith.constant 0 : index
    %95 = tpu.strided_load %arg9[%c0_88, %c2_89, %c0_90] {strides = array<i32: 2, 2, 1>} : memref<18x18x128xf32, #tpu.memory_space<vmem>>, vector<8x8x128xf32>
    %96 = vector.shape_cast %95 : vector<8x8x128xf32> to vector<64x128xf32>
    %c2_91 = arith.constant 2 : index
    %c0_92 = arith.constant 0 : index
    %c0_93 = arith.constant 0 : index
    %97 = vector.load %arg4[%c2_91, %c0_92, %c0_93] : memref<9x128x128xf32, #tpu.memory_space<vmem>>, vector<1x128x128xf32>
    %98 = vector.shape_cast %97 : vector<1x128x128xf32> to vector<128x128xf32>
    %cst_94 = arith.constant dense<0.000000e+00> : vector<64x128xf32>
    %99 = tpu.matmul %96, %98, %cst_94 {dimension_numbers = #tpu.dot_dimension_numbers<[1], [0], [0], [1], [0, 0, 1, 1], [], []>} : vector<64x128xf32>, vector<128x128xf32>, vector<64x128xf32> -> vector<64x128xf32>
    %100 = arith.addf %94, %99 : vector<64x128xf32>
    %c1_95 = arith.constant 1 : index
    %c0_96 = arith.constant 0 : index
    %c0_97 = arith.constant 0 : index
    %101 = tpu.strided_load %arg9[%c1_95, %c0_96, %c0_97] {strides = array<i32: 2, 2, 1>} : memref<18x18x128xf32, #tpu.memory_space<vmem>>, vector<8x8x128xf32>
    %102 = vector.shape_cast %101 : vector<8x8x128xf32> to vector<64x128xf32>
    %c3_98 = arith.constant 3 : index
    %c0_99 = arith.constant 0 : index
    %c0_100 = arith.constant 0 : index
    %103 = vector.load %arg4[%c3_98, %c0_99, %c0_100] : memref<9x128x128xf32, #tpu.memory_space<vmem>>, vector<1x128x128xf32>
    %104 = vector.shape_cast %103 : vector<1x128x128xf32> to vector<128x128xf32>
    %cst_101 = arith.constant dense<0.000000e+00> : vector<64x128xf32>
    %105 = tpu.matmul %102, %104, %cst_101 {dimension_numbers = #tpu.dot_dimension_numbers<[1], [0], [0], [1], [0, 0, 1, 1], [], []>} : vector<64x128xf32>, vector<128x128xf32>, vector<64x128xf32> -> vector<64x128xf32>
    %106 = arith.addf %100, %105 : vector<64x128xf32>
    %c1_102 = arith.constant 1 : index
    %c1_103 = arith.constant 1 : index
    %c0_104 = arith.constant 0 : index
    %107 = tpu.strided_load %arg9[%c1_102, %c1_103, %c0_104] {strides = array<i32: 2, 2, 1>} : memref<18x18x128xf32, #tpu.memory_space<vmem>>, vector<8x8x128xf32>
    %108 = vector.shape_cast %107 : vector<8x8x128xf32> to vector<64x128xf32>
    %c4_105 = arith.constant 4 : index
    %c0_106 = arith.constant 0 : index
    %c0_107 = arith.constant 0 : index
    %109 = vector.load %arg4[%c4_105, %c0_106, %c0_107] : memref<9x128x128xf32, #tpu.memory_space<vmem>>, vector<1x128x128xf32>
    %110 = vector.shape_cast %109 : vector<1x128x128xf32> to vector<128x128xf32>
    %cst_108 = arith.constant dense<0.000000e+00> : vector<64x128xf32>
    %111 = tpu.matmul %108, %110, %cst_108 {dimension_numbers = #tpu.dot_dimension_numbers<[1], [0], [0], [1], [0, 0, 1, 1], [], []>} : vector<64x128xf32>, vector<128x128xf32>, vector<64x128xf32> -> vector<64x128xf32>
    %112 = arith.addf %106, %111 : vector<64x128xf32>
    %c1_109 = arith.constant 1 : index
    %c2_110 = arith.constant 2 : index
    %c0_111 = arith.constant 0 : index
    %113 = tpu.strided_load %arg9[%c1_109, %c2_110, %c0_111] {strides = array<i32: 2, 2, 1>} : memref<18x18x128xf32, #tpu.memory_space<vmem>>, vector<8x8x128xf32>
    %114 = vector.shape_cast %113 : vector<8x8x128xf32> to vector<64x128xf32>
    %c5_112 = arith.constant 5 : index
    %c0_113 = arith.constant 0 : index
    %c0_114 = arith.constant 0 : index
    %115 = vector.load %arg4[%c5_112, %c0_113, %c0_114] : memref<9x128x128xf32, #tpu.memory_space<vmem>>, vector<1x128x128xf32>
    %116 = vector.shape_cast %115 : vector<1x128x128xf32> to vector<128x128xf32>
    %cst_115 = arith.constant dense<0.000000e+00> : vector<64x128xf32>
    %117 = tpu.matmul %114, %116, %cst_115 {dimension_numbers = #tpu.dot_dimension_numbers<[1], [0], [0], [1], [0, 0, 1, 1], [], []>} : vector<64x128xf32>, vector<128x128xf32>, vector<64x128xf32> -> vector<64x128xf32>
    %118 = arith.addf %112, %117 : vector<64x128xf32>
    %c2_116 = arith.constant 2 : index
    %c0_117 = arith.constant 0 : index
    %c0_118 = arith.constant 0 : index
    %119 = tpu.strided_load %arg9[%c2_116, %c0_117, %c0_118] {strides = array<i32: 2, 2, 1>} : memref<18x18x128xf32, #tpu.memory_space<vmem>>, vector<8x8x128xf32>
    %120 = vector.shape_cast %119 : vector<8x8x128xf32> to vector<64x128xf32>
    %c6_119 = arith.constant 6 : index
    %c0_120 = arith.constant 0 : index
    %c0_121 = arith.constant 0 : index
    %121 = vector.load %arg4[%c6_119, %c0_120, %c0_121] : memref<9x128x128xf32, #tpu.memory_space<vmem>>, vector<1x128x128xf32>
    %122 = vector.shape_cast %121 : vector<1x128x128xf32> to vector<128x128xf32>
    %cst_122 = arith.constant dense<0.000000e+00> : vector<64x128xf32>
    %123 = tpu.matmul %120, %122, %cst_122 {dimension_numbers = #tpu.dot_dimension_numbers<[1], [0], [0], [1], [0, 0, 1, 1], [], []>} : vector<64x128xf32>, vector<128x128xf32>, vector<64x128xf32> -> vector<64x128xf32>
    %124 = arith.addf %118, %123 : vector<64x128xf32>
    %c2_123 = arith.constant 2 : index
    %c1_124 = arith.constant 1 : index
    %c0_125 = arith.constant 0 : index
    %125 = tpu.strided_load %arg9[%c2_123, %c1_124, %c0_125] {strides = array<i32: 2, 2, 1>} : memref<18x18x128xf32, #tpu.memory_space<vmem>>, vector<8x8x128xf32>
    %126 = vector.shape_cast %125 : vector<8x8x128xf32> to vector<64x128xf32>
    %c7_126 = arith.constant 7 : index
    %c0_127 = arith.constant 0 : index
    %c0_128 = arith.constant 0 : index
    %127 = vector.load %arg4[%c7_126, %c0_127, %c0_128] : memref<9x128x128xf32, #tpu.memory_space<vmem>>, vector<1x128x128xf32>
    %128 = vector.shape_cast %127 : vector<1x128x128xf32> to vector<128x128xf32>
    %cst_129 = arith.constant dense<0.000000e+00> : vector<64x128xf32>
    %129 = tpu.matmul %126, %128, %cst_129 {dimension_numbers = #tpu.dot_dimension_numbers<[1], [0], [0], [1], [0, 0, 1, 1], [], []>} : vector<64x128xf32>, vector<128x128xf32>, vector<64x128xf32> -> vector<64x128xf32>
    %130 = arith.addf %124, %129 : vector<64x128xf32>
    %c2_130 = arith.constant 2 : index
    %c2_131 = arith.constant 2 : index
    %c0_132 = arith.constant 0 : index
    %131 = tpu.strided_load %arg9[%c2_130, %c2_131, %c0_132] {strides = array<i32: 2, 2, 1>} : memref<18x18x128xf32, #tpu.memory_space<vmem>>, vector<8x8x128xf32>
    %132 = vector.shape_cast %131 : vector<8x8x128xf32> to vector<64x128xf32>
    %c8_133 = arith.constant 8 : index
    %c0_134 = arith.constant 0 : index
    %c0_135 = arith.constant 0 : index
    %133 = vector.load %arg4[%c8_133, %c0_134, %c0_135] : memref<9x128x128xf32, #tpu.memory_space<vmem>>, vector<1x128x128xf32>
    %134 = vector.shape_cast %133 : vector<1x128x128xf32> to vector<128x128xf32>
    %cst_136 = arith.constant dense<0.000000e+00> : vector<64x128xf32>
    %135 = tpu.matmul %132, %134, %cst_136 {dimension_numbers = #tpu.dot_dimension_numbers<[1], [0], [0], [1], [0, 0, 1, 1], [], []>} : vector<64x128xf32>, vector<128x128xf32>, vector<64x128xf32> -> vector<64x128xf32>
    %136 = arith.addf %130, %135 : vector<64x128xf32>
    %c0_137 = arith.constant 0 : index
    %c0_138 = arith.constant 0 : index
    %137 = vector.load %arg5[%c0_137, %c0_138] : memref<2x128xf32, #tpu.memory_space<vmem>>, vector<2x128xf32>
    %138 = vector.extract_strided_slice %137 {offsets = [0, 0], sizes = [1, 128], strides = [1, 1]} : vector<2x128xf32> to vector<1x128xf32>
    %139 = vector.broadcast %138 : vector<1x128xf32> to vector<64x128xf32>
    %140 = arith.addf %136, %139 : vector<64x128xf32>
    %141 = arith.mulf %140, %140 : vector<64x128xf32>
    %c64_i32_139 = arith.constant 64 : i32
    %142 = tpu.dynamic_rotate %141 by %c64_i32_139 dim 1 : vector<64x128xf32>, i32 -> vector<64x128xf32>
    %143 = arith.addf %141, %142 : vector<64x128xf32>
    %144 = vector.extract_strided_slice %137 {offsets = [1, 0], sizes = [1, 128], strides = [1, 1]} : vector<2x128xf32> to vector<1x128xf32>
    %cst_140 = arith.constant 9.99999996E-13 : f32
    %145 = vector.broadcast %cst_140 : f32 to vector<64x128xf32>
    %146 = arith.addf %143, %145 : vector<64x128xf32>
    %147 = math.rsqrt %146 : vector<64x128xf32>
    %148 = vector.broadcast %144 : vector<1x128xf32> to vector<64x128xf32>
    %149 = arith.mulf %148, %147 : vector<64x128xf32>
    %cst_141 = arith.constant 1.000000e+00 : f32
    %150 = vector.broadcast %cst_141 : f32 to vector<64x128xf32>
    %151 = arith.addf %150, %149 : vector<64x128xf32>
    %cst_142 = arith.constant 0.000000e+00 : f32
    %152 = vector.broadcast %cst_142 : f32 to vector<64x128xf32>
    %153 = arith.maximumf %151, %152 : vector<64x128xf32>
    %154 = arith.mulf %140, %153 : vector<64x128xf32>
    %cst_143 = arith.constant dense<0.000000e+00> : vector<128xf32>
    %155 = vector.multi_reduction <add>, %154, %cst_143 [0] : vector<64x128xf32> to vector<128xf32>
    %156 = vector.shape_cast %155 : vector<128xf32> to vector<1x128xf32>
    %cst_144 = arith.constant 6.400000e+01 : f32
    %157 = vector.broadcast %cst_144 : f32 to vector<1x128xf32>
    %158 = arith.divf %156, %157 : vector<1x128xf32>
    %c0_145 = arith.constant 0 : index
    %c0_146 = arith.constant 0 : index
    %159 = vector.load %arg6[%c0_145, %c0_146] : memref<2x128xf32, #tpu.memory_space<vmem>>, vector<2x128xf32>
    %160 = vector.broadcast %158 : vector<1x128xf32> to vector<2x128xf32>
    %161 = arith.mulf %160, %159 : vector<2x128xf32>
    %cst_147 = arith.constant dense<0.000000e+00> : vector<2xf32>
    %162 = vector.multi_reduction <add>, %161, %cst_147 [1] : vector<2x128xf32> to vector<2xf32>
    %163 = vector.shape_cast %162 : vector<2xf32> to vector<2x1xf32>
    %c0_148 = arith.constant 0 : index
    %c0_149 = arith.constant 0 : index
    %164 = vector.load %arg7[%c0_148, %c0_149] : memref<2x1xf32, #tpu.memory_space<vmem>>, vector<2x1xf32>
    %165 = arith.addf %163, %164 : vector<2x1xf32>
    %166 = vector.extract_strided_slice %165 {offsets = [0, 0], sizes = [1, 1], strides = [1, 1]} : vector<2x1xf32> to vector<1x1xf32>
    %167 = vector.extract_strided_slice %165 {offsets = [0, 0], sizes = [1, 1], strides = [1, 1]} : vector<2x1xf32> to vector<1x1xf32>
    %168 = arith.mulf %166, %167 : vector<1x1xf32>
    %169 = vector.extract_strided_slice %165 {offsets = [1, 0], sizes = [1, 1], strides = [1, 1]} : vector<2x1xf32> to vector<1x1xf32>
    %170 = vector.extract_strided_slice %165 {offsets = [1, 0], sizes = [1, 1], strides = [1, 1]} : vector<2x1xf32> to vector<1x1xf32>
    %171 = arith.mulf %169, %170 : vector<1x1xf32>
    %172 = arith.addf %168, %171 : vector<1x1xf32>
    %173 = math.sqrt %172 : vector<1x1xf32>
    %174 = vector.shape_cast %173 : vector<1x1xf32> to vector<1x1x1xf32>
    %175 = vector.shape_cast %174 : vector<1x1x1xf32> to vector<1x1x1xf32>
    %176 = vector.broadcast %175 : vector<1x1x1xf32> to vector<1x1x128xf32>
    %c0_150 = arith.constant 0 : index
    %c0_151 = arith.constant 0 : index
    %c0_152 = arith.constant 0 : index
    %177 = vector.load %arg8[%c0_150, %c0_151, %c0_152] : memref<1x1x128xf32, #tpu.memory_space<vmem>>, vector<1x1x128xf32>
    tpu.vector_store %arg8[%c0_150, %c0_151, %c0_152], %176 {strides = array<i32>} : memref<1x1x128xf32, #tpu.memory_space<vmem>>, vector<1x1x128xf32>,
    return
  }
  func.func @transform_0(%arg0: i32) -> (i32, i32, i32, i32) {
    %c0_i32 = arith.constant 0 : i32
    %c0_i32_0 = arith.constant 0 : i32
    %c0_i32_1 = arith.constant 0 : i32
    %c0_i32_2 = arith.constant 0 : i32
    return %arg0, %c0_i32, %c0_i32_0, %c0_i32_1 : i32, i32, i32, i32
  }
  func.func @transform_1(%arg0: i32) -> (i32, i32, i32) {
    %c0_i32 = arith.constant 0 : i32
    %c0_i32_0 = arith.constant 0 : i32
    %c0_i32_1 = arith.constant 0 : i32
    %c0_i32_2 = arith.constant 0 : i32
    return %c0_i32, %c0_i32_0, %c0_i32_1 : i32, i32, i32
  }
  func.func @transform_2(%arg0: i32) -> (i32, i32) {
    %c0_i32 = arith.constant 0 : i32
    %c0_i32_0 = arith.constant 0 : i32
    %c0_i32_1 = arith.constant 0 : i32
    return %c0_i32, %c0_i32_0 : i32, i32
  }
  func.func @transform_3(%arg0: i32) -> (i32, i32, i32) {
    %c0_i32 = arith.constant 0 : i32
    %c0_i32_0 = arith.constant 0 : i32
    %c0_i32_1 = arith.constant 0 : i32
    %c0_i32_2 = arith.constant 0 : i32
    return %c0_i32, %c0_i32_0, %c0_i32_1 : i32, i32, i32
  }
  func.func @transform_4(%arg0: i32) -> (i32, i32) {
    %c0_i32 = arith.constant 0 : i32
    %c0_i32_0 = arith.constant 0 : i32
    %c0_i32_1 = arith.constant 0 : i32
    return %c0_i32, %c0_i32_0 : i32, i32
  }
  func.func @transform_5(%arg0: i32) -> (i32, i32) {
    %c0_i32 = arith.constant 0 : i32
    %c0_i32_0 = arith.constant 0 : i32
    %c0_i32_1 = arith.constant 0 : i32
    return %c0_i32, %c0_i32_0 : i32, i32
  }
  func.func @transform_6(%arg0: i32) -> (i32, i32) {
    %c0_i32 = arith.constant 0 : i32
    %c0_i32_0 = arith.constant 0 : i32
    %c0_i32_1 = arith.constant 0 : i32
    return %c0_i32, %c0_i32_0 : i32, i32
  }
  func.func @transform_7(%arg0: i32) -> (i32, i32, i32) {
    %c0_i32 = arith.constant 0 : i32
    %c0_i32_0 = arith.constant 0 : i32
    %c0_i32_1 = arith.constant 0 : i32
    return %arg0, %c0_i32, %c0_i32_0 : i32, i32, i32
  }
}

</mosaic_0001>

<bundles_post_ra>
// kernel: custom-call.1
= control target key start
LH: loop header
LB: loop body
LE: loop exit
PB: predicated region body
PF: predicated region fallthrough
CT: control target
= control target key end

     0   :  { %s841_s0 = inlined_call_operand.vmem [shape: c64[2,4,16,16], index: 0, kind: input, shape index: {}]   ;;  %s842_s1 = inlined_call_operand.vmem [shape: f32[2,4,16,16], index: 1, kind: output, shape index: {}]  }
   0x1   :  { %v320_v0 = vld [vmem:[%s841_s0 + $0x200] sm:$0xff]  ;;  %v321_v1 = vld [vmem:[%s841_s0 + $0x208] sm:$0xff]  ;;  %v323_v2 = vld [vmem:[%s841_s0 + $0x210] sm:$0xff] }
   0x2   :  { %4 = vst [vmem:[%s842_s1] sm:$0xff] %v320_v0  ;;  %322 = vst [vmem:[%s842_s1 + $0x8] sm:$0xff] %v321_v1  ;;  %v325_v3 = vld [vmem:[%s841_s0 + $0x218] sm:$0xff]  ;;  %v327_v4 = vld [vmem:[%s841_s0 + $0x220] sm:$0xff] }
   0x3   :  { %324 = vst [vmem:[%s842_s1 + $0x10] sm:$0xff] %v323_v2  ;;  %v329_v5 = vld [vmem:[%s841_s0 + $0x228] sm:$0xff]  ;;  %326 = vst [vmem:[%s842_s1 + $0x18] sm:$0xff] %v325_v3  ;;  %v331_v6 = vld [vmem:[%s841_s0 + $0x230] sm:$0xff] }
   0x4   :  { %328 = vst [vmem:[%s842_s1 + $0x20] sm:$0xff] %v327_v4  ;;  %330 = vst [vmem:[%s842_s1 + $0x28] sm:$0xff] %v329_v5  ;;  %v333_v7 = vld [vmem:[%s841_s0 + $0x238] sm:$0xff]  ;;  %v335_v8 = vld [vmem:[%s841_s0 + $0x240] sm:$0xff] }
   0x5   :  { %332 = vst [vmem:[%s842_s1 + $0x30] sm:$0xff] %v331_v6  ;;  %334 = vst [vmem:[%s842_s1 + $0x38] sm:$0xff] %v333_v7  ;;  %v337_v9 = vld [vmem:[%s841_s0 + $0x248] sm:$0xff]  ;;  %v339_v10 = vld [vmem:[%s841_s0 + $0x250] sm:$0xff] }
   0x6   :  { %336 = vst [vmem:[%s842_s1 + $0x40] sm:$0xff] %v335_v8  ;;  %v341_v11 = vld [vmem:[%s841_s0 + $0x258] sm:$0xff]  ;;  %338 = vst [vmem:[%s842_s1 + $0x48] sm:$0xff] %v337_v9  ;;  %v343_v12 = vld [vmem:[%s841_s0 + $0x260] sm:$0xff] }
   0x7   :  { %340 = vst [vmem:[%s842_s1 + $0x50] sm:$0xff] %v339_v10  ;;  %342 = vst [vmem:[%s842_s1 + $0x58] sm:$0xff] %v341_v11  ;;  %v345_v13 = vld [vmem:[%s841_s0 + $0x268] sm:$0xff]  ;;  %v347_v14 = vld [vmem:[%s841_s0 + $0x270] sm:$0xff] }
   0x8   :  { %344 = vst [vmem:[%s842_s1 + $0x60] sm:$0xff] %v343_v12  ;;  %346 = vst [vmem:[%s842_s1 + $0x68] sm:$0xff] %v345_v13  ;;  %v349_v15 = vld [vmem:[%s841_s0 + $0x278] sm:$0xff]  ;;  %v351_v16 = vld [vmem:[%s841_s0 + $0x280] sm:$0xff] }
   0x9   :  { %348 = vst [vmem:[%s842_s1 + $0x70] sm:$0xff] %v347_v14  ;;  %v353_v17 = vld [vmem:[%s841_s0 + $0x288] sm:$0xff]  ;;  %350 = vst [vmem:[%s842_s1 + $0x78] sm:$0xff] %v349_v15  ;;  %v355_v18 = vld [vmem:[%s841_s0 + $0x290] sm:$0xff] }
   0xa   :  { %352 = vst [vmem:[%s842_s1 + $0x80] sm:$0xff] %v351_v16  ;;  %354 = vst [vmem:[%s842_s1 + $0x88] sm:$0xff] %v353_v17  ;;  %v357_v19 = vld [vmem:[%s841_s0 + $0x298] sm:$0xff]  ;;  %v359_v20 = vld [vmem:[%s841_s0 + $0x2a0] sm:$0xff] }
   0xb   :  { %356 = vst [vmem:[%s842_s1 + $0x90] sm:$0xff] %v355_v18  ;;  %358 = vst [vmem:[%s842_s1 + $0x98] sm:$0xff] %v357_v19  ;;  %v361_v21 = vld [vmem:[%s841_s0 + $0x2a8] sm:$0xff]  ;;  %v363_v22 = vld [vmem:[%s841_s0 + $0x2b0] sm:$0xff] }
   0xc   :  { %360 = vst [vmem:[%s842_s1 + $0xa0] sm:$0xff] %v359_v20  ;;  %v365_v23 = vld [vmem:[%s841_s0 + $0x2b8] sm:$0xff]  ;;  %362 = vst [vmem:[%s842_s1 + $0xa8] sm:$0xff] %v361_v21  ;;  %v367_v24 = vld [vmem:[%s841_s0 + $0x2c0] sm:$0xff] }
   0xd   :  { %364 = vst [vmem:[%s842_s1 + $0xb0] sm:$0xff] %v363_v22  ;;  %366 = vst [vmem:[%s842_s1 + $0xb8] sm:$0xff] %v365_v23  ;;  %v369_v25 = vld [vmem:[%s841_s0 + $0x2c8] sm:$0xff]  ;;  %v371_v26 = vld [vmem:[%s841_s0 + $0x2d0] sm:$0xff] }
   0xe   :  { %368 = vst [vmem:[%s842_s1 + $0xc0] sm:$0xff] %v367_v24  ;;  %370 = vst [vmem:[%s842_s1 + $0xc8] sm:$0xff] %v369_v25  ;;  %v373_v27 = vld [vmem:[%s841_s0 + $0x2d8] sm:$0xff]  ;;  %v375_v28 = vld [vmem:[%s841_s0 + $0x2e0] sm:$0xff] }
   0xf   :  { %372 = vst [vmem:[%s842_s1 + $0xd0] sm:$0xff] %v371_v26  ;;  %v377_v29 = vld [vmem:[%s841_s0 + $0x2e8] sm:$0xff]  ;;  %374 = vst [vmem:[%s842_s1 + $0xd8] sm:$0xff] %v373_v27  ;;  %v379_v30 = vld [vmem:[%s841_s0 + $0x2f0] sm:$0xff] }
  0x10   :  { %376 = vst [vmem:[%s842_s1 + $0xe0] sm:$0xff] %v375_v28  ;;  %378 = vst [vmem:[%s842_s1 + $0xe8] sm:$0xff] %v377_v29  ;;  %v381_v31 = vld [vmem:[%s841_s0 + $0x2f8] sm:$0xff]  ;;  %v383_v32 = vld [vmem:[%s841_s0 + $0x300] sm:$0xff] }
  0x11   :  { %380 = vst [vmem:[%s842_s1 + $0xf0] sm:$0xff] %v379_v30  ;;  %382 = vst [vmem:[%s842_s1 + $0xf8] sm:$0xff] %v381_v31  ;;  %v385_v33 = vld [vmem:[%s841_s0 + $0x308] sm:$0xff]  ;;  %v387_v34 = vld [vmem:[%s841_s0 + $0x310] sm:$0xff] }
  0x12   :  { %384 = vst [vmem:[%s842_s1 + $0x100] sm:$0xff] %v383_v32  ;;  %v389_v35 = vld [vmem:[%s841_s0 + $0x318] sm:$0xff]  ;;  %386 = vst [vmem:[%s842_s1 + $0x108] sm:$0xff] %v385_v33  ;;  %v391_v36 = vld [vmem:[%s841_s0 + $0x320] sm:$0xff] }
  0x13   :  { %388 = vst [vmem:[%s842_s1 + $0x110] sm:$0xff] %v387_v34  ;;  %390 = vst [vmem:[%s842_s1 + $0x118] sm:$0xff] %v389_v35  ;;  %v393_v37 = vld [vmem:[%s841_s0 + $0x328] sm:$0xff]  ;;  %v395_v38 = vld [vmem:[%s841_s0 + $0x330] sm:$0xff] }
  0x14   :  { %392 = vst [vmem:[%s842_s1 + $0x120] sm:$0xff] %v391_v36  ;;  %394 = vst [vmem:[%s842_s1 + $0x128] sm:$0xff] %v393_v37  ;;  %v397_v39 = vld [vmem:[%s841_s0 + $0x338] sm:$0xff]  ;;  %v399_v40 = vld [vmem:[%s841_s0 + $0x340] sm:$0xff] }
  0x15   :  { %396 = vst [vmem:[%s842_s1 + $0x130] sm:$0xff] %v395_v38  ;;  %v401_v41 = vld [vmem:[%s841_s0 + $0x348] sm:$0xff]  ;;  %398 = vst [vmem:[%s842_s1 + $0x138] sm:$0xff] %v397_v39  ;;  %v403_v42 = vld [vmem:[%s841_s0 + $0x350] sm:$0xff] }
  0x16   :  { %400 = vst [vmem:[%s842_s1 + $0x140] sm:$0xff] %v399_v40  ;;  %402 = vst [vmem:[%s842_s1 + $0x148] sm:$0xff] %v401_v41  ;;  %v405_v43 = vld [vmem:[%s841_s0 + $0x358] sm:$0xff]  ;;  %v407_v44 = vld [vmem:[%s841_s0 + $0x360] sm:$0xff] }
  0x17   :  { %404 = vst [vmem:[%s842_s1 + $0x150] sm:$0xff] %v403_v42  ;;  %406 = vst [vmem:[%s842_s1 + $0x158] sm:$0xff] %v405_v43  ;;  %v409_v45 = vld [vmem:[%s841_s0 + $0x368] sm:$0xff]  ;;  %v411_v46 = vld [vmem:[%s841_s0 + $0x370] sm:$0xff] }
  0x18   :  { %408 = vst [vmem:[%s842_s1 + $0x160] sm:$0xff] %v407_v44  ;;  %v413_v47 = vld [vmem:[%s841_s0 + $0x378] sm:$0xff]  ;;  %410 = vst [vmem:[%s842_s1 + $0x168] sm:$0xff] %v409_v45  ;;  %v415_v48 = vld [vmem:[%s841_s0 + $0x380] sm:$0xff] }
  0x19   :  { %412 = vst [vmem:[%s842_s1 + $0x170] sm:$0xff] %v411_v46  ;;  %414 = vst [vmem:[%s842_s1 + $0x178] sm:$0xff] %v413_v47  ;;  %v417_v49 = vld [vmem:[%s841_s0 + $0x388] sm:$0xff]  ;;  %v419_v50 = vld [vmem:[%s841_s0 + $0x390] sm:$0xff] }
  0x1a   :  { %416 = vst [vmem:[%s842_s1 + $0x180] sm:$0xff] %v415_v48  ;;  %418 = vst [vmem:[%s842_s1 + $0x188] sm:$0xff] %v417_v49  ;;  %v421_v51 = vld [vmem:[%s841_s0 + $0x398] sm:$0xff]  ;;  %v423_v52 = vld [vmem:[%s841_s0 + $0x3a0] sm:$0xff] }
  0x1b   :  { %420 = vst [vmem:[%s842_s1 + $0x190] sm:$0xff] %v419_v50  ;;  %v425_v53 = vld [vmem:[%s841_s0 + $0x3a8] sm:$0xff]  ;;  %422 = vst [vmem:[%s842_s1 + $0x198] sm:$0xff] %v421_v51  ;;  %v427_v54 = vld [vmem:[%s841_s0 + $0x3b0] sm:$0xff] }
  0x1c   :  { %424 = vst [vmem:[%s842_s1 + $0x1a0] sm:$0xff] %v423_v52  ;;  %426 = vst [vmem:[%s842_s1 + $0x1a8] sm:$0xff] %v425_v53  ;;  %v429_v55 = vld [vmem:[%s841_s0 + $0x3b8] sm:$0xff]  ;;  %v431_v56 = vld [vmem:[%s841_s0 + $0x3c0] sm:$0xff] }
  0x1d   :  { %428 = vst [vmem:[%s842_s1 + $0x1b0] sm:$0xff] %v427_v54  ;;  %430 = vst [vmem:[%s842_s1 + $0x1b8] sm:$0xff] %v429_v55  ;;  %v433_v57 = vld [vmem:[%s841_s0 + $0x3c8] sm:$0xff]  ;;  %v435_v58 = vld [vmem:[%s841_s0 + $0x3d0] sm:$0xff] }
  0x1e   :  { %432 = vst [vmem:[%s842_s1 + $0x1c0] sm:$0xff] %v431_v56  ;;  %v437_v59 = vld [vmem:[%s841_s0 + $0x3d8] sm:$0xff]  ;;  %434 = vst [vmem:[%s842_s1 + $0x1c8] sm:$0xff] %v433_v57  ;;  %v439_v60 = vld [vmem:[%s841_s0 + $0x3e0] sm:$0xff] }
  0x1f   :  { %436 = vst [vmem:[%s842_s1 + $0x1d0] sm:$0xff] %v435_v58  ;;  %438 = vst [vmem:[%s842_s1 + $0x1d8] sm:$0xff] %v437_v59  ;;  %v441_v61 = vld [vmem:[%s841_s0 + $0x3e8] sm:$0xff]  ;;  %v443_v62 = vld [vmem:[%s841_s0 + $0x3f0] sm:$0xff] }
  0x20   :  { %440 = vst [vmem:[%s842_s1 + $0x1e0] sm:$0xff] %v439_v60  ;;  %442 = vst [vmem:[%s842_s1 + $0x1e8] sm:$0xff] %v441_v61  ;;  %v445_v63 = vld [vmem:[%s841_s0 + $0x3f8] sm:$0xff] }
  0x21   :  { %444 = vst [vmem:[%s842_s1 + $0x1f0] sm:$0xff] %v443_v62  ;;  %446 = vst [vmem:[%s842_s1 + $0x1f8] sm:$0xff] %v445_v63 }

// kernel: custom-call
= control target key start
LH: loop header
LB: loop body
LE: loop exit
PB: predicated region body
PF: predicated region fallthrough
CT: control target
= control target key end

     0   :  { %s776_s0 = inlined_call_operand.vmem [shape: c64[2,4,16,16], index: 0, kind: input, shape index: {}]   ;;  %s777_s1 = inlined_call_operand.vmem [shape: f32[2,4,16,16], index: 1, kind: output, shape index: {}]  }
   0x1   :  { %v2_v0 = vld [vmem:[%s776_s0] sm:$0xff]  ;;  %v256_v1 = vld [vmem:[%s776_s0 + $0x8] sm:$0xff]  ;;  %v258_v2 = vld [vmem:[%s776_s0 + $0x10] sm:$0xff] }
   0x2   :  { %3 = vst [vmem:[%s777_s1] sm:$0xff] %v2_v0  ;;  %257 = vst [vmem:[%s777_s1 + $0x8] sm:$0xff] %v256_v1  ;;  %v260_v3 = vld [vmem:[%s776_s0 + $0x18] sm:$0xff]  ;;  %v262_v4 = vld [vmem:[%s776_s0 + $0x20] sm:$0xff] }
   0x3   :  { %259 = vst [vmem:[%s777_s1 + $0x10] sm:$0xff] %v258_v2  ;;  %v264_v5 = vld [vmem:[%s776_s0 + $0x28] sm:$0xff]  ;;  %261 = vst [vmem:[%s777_s1 + $0x18] sm:$0xff] %v260_v3  ;;  %v266_v6 = vld [vmem:[%s776_s0 + $0x30] sm:$0xff] }
   0x4   :  { %263 = vst [vmem:[%s777_s1 + $0x20] sm:$0xff] %v262_v4  ;;  %265 = vst [vmem:[%s777_s1 + $0x28] sm:$0xff] %v264_v5  ;;  %v268_v7 = vld [vmem:[%s776_s0 + $0x38] sm:$0xff]  ;;  %v270_v8 = vld [vmem:[%s776_s0 + $0x40] sm:$0xff] }
   0x5   :  { %267 = vst [vmem:[%s777_s1 + $0x30] sm:$0xff] %v266_v6  ;;  %269 = vst [vmem:[%s777_s1 + $0x38] sm:$0xff] %v268_v7  ;;  %v272_v9 = vld [vmem:[%s776_s0 + $0x48] sm:$0xff]  ;;  %v274_v10 = vld [vmem:[%s776_s0 + $0x50] sm:$0xff] }
   0x6   :  { %271 = vst [vmem:[%s777_s1 + $0x40] sm:$0xff] %v270_v8  ;;  %v276_v11 = vld [vmem:[%s776_s0 + $0x58] sm:$0xff]  ;;  %273 = vst [vmem:[%s777_s1 + $0x48] sm:$0xff] %v272_v9  ;;  %v278_v12 = vld [vmem:[%s776_s0 + $0x60] sm:$0xff] }
   0x7   :  { %275 = vst [vmem:[%s777_s1 + $0x50] sm:$0xff] %v274_v10  ;;  %277 = vst [vmem:[%s777_s1 + $0x58] sm:$0xff] %v276_v11  ;;  %v280_v13 = vld [vmem:[%s776_s0 + $0x68] sm:$0xff]  ;;  %v282_v14 = vld [vmem:[%s776_s0 + $0x70] sm:$0xff] }
   0x8   :  { %279 = vst [vmem:[%s777_s1 + $0x60] sm:$0xff] %v278_v12  ;;  %281 = vst [vmem:[%s777_s1 + $0x68] sm:$0xff] %v280_v13  ;;  %v284_v15 = vld [vmem:[%s776_s0 + $0x78] sm:$0xff]  ;;  %v286_v16 = vld [vmem:[%s776_s0 + $0x80] sm:$0xff] }
   0x9   :  { %283 = vst [vmem:[%s777_s1 + $0x70] sm:$0xff] %v282_v14  ;;  %v288_v17 = vld [vmem:[%s776_s0 + $0x88] sm:$0xff]  ;;  %285 = vst [vmem:[%s777_s1 + $0x78] sm:$0xff] %v284_v15  ;;  %v290_v18 = vld [vmem:[%s776_s0 + $0x90] sm:$0xff] }
   0xa   :  { %287 = vst [vmem:[%s777_s1 + $0x80] sm:$0xff] %v286_v16  ;;  %289 = vst [vmem:[%s777_s1 + $0x88] sm:$0xff] %v288_v17  ;;  %v292_v19 = vld [vmem:[%s776_s0 + $0x98] sm:$0xff]  ;;  %v294_v20 = vld [vmem:[%s776_s0 + $0xa0] sm:$0xff] }
   0xb   :  { %291 = vst [vmem:[%s777_s1 + $0x90] sm:$0xff] %v290_v18  ;;  %293 = vst [vmem:[%s777_s1 + $0x98] sm:$0xff] %v292_v19  ;;  %v296_v21 = vld [vmem:[%s776_s0 + $0xa8] sm:$0xff]  ;;  %v298_v22 = vld [vmem:[%s776_s0 + $0xb0] sm:$0xff] }
   0xc   :  { %295 = vst [vmem:[%s777_s1 + $0xa0] sm:$0xff] %v294_v20  ;;  %v300_v23 = vld [vmem:[%s776_s0 + $0xb8] sm:$0xff]  ;;  %297 = vst [vmem:[%s777_s1 + $0xa8] sm:$0xff] %v296_v21  ;;  %v302_v24 = vld [vmem:[%s776_s0 + $0xc0] sm:$0xff] }
   0xd   :  { %299 = vst [vmem:[%s777_s1 + $0xb0] sm:$0xff] %v298_v22  ;;  %301 = vst [vmem:[%s777_s1 + $0xb8] sm:$0xff] %v300_v23  ;;  %v304_v25 = vld [vmem:[%s776_s0 + $0xc8] sm:$0xff]  ;;  %v306_v26 = vld [vmem:[%s776_s0 + $0xd0] sm:$0xff] }
   0xe   :  { %303 = vst [vmem:[%s777_s1 + $0xc0] sm:$0xff] %v302_v24  ;;  %305 = vst [vmem:[%s777_s1 + $0xc8] sm:$0xff] %v304_v25  ;;  %v308_v27 = vld [vmem:[%s776_s0 + $0xd8] sm:$0xff]  ;;  %v310_v28 = vld [vmem:[%s776_s0 + $0xe0] sm:$0xff] }
   0xf   :  { %307 = vst [vmem:[%s777_s1 + $0xd0] sm:$0xff] %v306_v26  ;;  %v312_v29 = vld [vmem:[%s776_s0 + $0xe8] sm:$0xff]  ;;  %309 = vst [vmem:[%s777_s1 + $0xd8] sm:$0xff] %v308_v27  ;;  %v314_v30 = vld [vmem:[%s776_s0 + $0xf0] sm:$0xff] }
  0x10   :  { %311 = vst [vmem:[%s777_s1 + $0xe0] sm:$0xff] %v310_v28  ;;  %313 = vst [vmem:[%s777_s1 + $0xe8] sm:$0xff] %v312_v29  ;;  %v316_v31 = vld [vmem:[%s776_s0 + $0xf8] sm:$0xff]  ;;  %v318_v32 = vld [vmem:[%s776_s0 + $0x100] sm:$0xff] }
  0x11   :  { %315 = vst [vmem:[%s777_s1 + $0xf0] sm:$0xff] %v314_v30  ;;  %317 = vst [vmem:[%s777_s1 + $0xf8] sm:$0xff] %v316_v31  ;;  %v320_v33 = vld [vmem:[%s776_s0 + $0x108] sm:$0xff]  ;;  %v322_v34 = vld [vmem:[%s776_s0 + $0x110] sm:$0xff] }
  0x12   :  { %319 = vst [vmem:[%s777_s1 + $0x100] sm:$0xff] %v318_v32  ;;  %v324_v35 = vld [vmem:[%s776_s0 + $0x118] sm:$0xff]  ;;  %321 = vst [vmem:[%s777_s1 + $0x108] sm:$0xff] %v320_v33  ;;  %v326_v36 = vld [vmem:[%s776_s0 + $0x120] sm:$0xff] }
  0x13   :  { %323 = vst [vmem:[%s777_s1 + $0x110] sm:$0xff] %v322_v34  ;;  %325 = vst [vmem:[%s777_s1 + $0x118] sm:$0xff] %v324_v35  ;;  %v328_v37 = vld [vmem:[%s776_s0 + $0x128] sm:$0xff]  ;;  %v330_v38 = vld [vmem:[%s776_s0 + $0x130] sm:$0xff] }
  0x14   :  { %327 = vst [vmem:[%s777_s1 + $0x120] sm:$0xff] %v326_v36  ;;  %329 = vst [vmem:[%s777_s1 + $0x128] sm:$0xff] %v328_v37  ;;  %v332_v39 = vld [vmem:[%s776_s0 + $0x138] sm:$0xff]  ;;  %v334_v40 = vld [vmem:[%s776_s0 + $0x140] sm:$0xff] }
  0x15   :  { %331 = vst [vmem:[%s777_s1 + $0x130] sm:$0xff] %v330_v38  ;;  %v336_v41 = vld [vmem:[%s776_s0 + $0x148] sm:$0xff]  ;;  %333 = vst [vmem:[%s777_s1 + $0x138] sm:$0xff] %v332_v39  ;;  %v338_v42 = vld [vmem:[%s776_s0 + $0x150] sm:$0xff] }
  0x16   :  { %335 = vst [vmem:[%s777_s1 + $0x140] sm:$0xff] %v334_v40  ;;  %337 = vst [vmem:[%s777_s1 + $0x148] sm:$0xff] %v336_v41  ;;  %v340_v43 = vld [vmem:[%s776_s0 + $0x158] sm:$0xff]  ;;  %v342_v44 = vld [vmem:[%s776_s0 + $0x160] sm:$0xff] }
  0x17   :  { %339 = vst [vmem:[%s777_s1 + $0x150] sm:$0xff] %v338_v42  ;;  %341 = vst [vmem:[%s777_s1 + $0x158] sm:$0xff] %v340_v43  ;;  %v344_v45 = vld [vmem:[%s776_s0 + $0x168] sm:$0xff]  ;;  %v346_v46 = vld [vmem:[%s776_s0 + $0x170] sm:$0xff] }
  0x18   :  { %343 = vst [vmem:[%s777_s1 + $0x160] sm:$0xff] %v342_v44  ;;  %v348_v47 = vld [vmem:[%s776_s0 + $0x178] sm:$0xff]  ;;  %345 = vst [vmem:[%s777_s1 + $0x168] sm:$0xff] %v344_v45  ;;  %v350_v48 = vld [vmem:[%s776_s0 + $0x180] sm:$0xff] }
  0x19   :  { %347 = vst [vmem:[%s777_s1 + $0x170] sm:$0xff] %v346_v46  ;;  %349 = vst [vmem:[%s777_s1 + $0x178] sm:$0xff] %v348_v47  ;;  %v352_v49 = vld [vmem:[%s776_s0 + $0x188] sm:$0xff]  ;;  %v354_v50 = vld [vmem:[%s776_s0 + $0x190] sm:$0xff] }
  0x1a   :  { %351 = vst [vmem:[%s777_s1 + $0x180] sm:$0xff] %v350_v48  ;;  %353 = vst [vmem:[%s777_s1 + $0x188] sm:$0xff] %v352_v49  ;;  %v356_v51 = vld [vmem:[%s776_s0 + $0x198] sm:$0xff]  ;;  %v358_v52 = vld [vmem:[%s776_s0 + $0x1a0] sm:$0xff] }
  0x1b   :  { %355 = vst [vmem:[%s777_s1 + $0x190] sm:$0xff] %v354_v50  ;;  %v360_v53 = vld [vmem:[%s776_s0 + $0x1a8] sm:$0xff]  ;;  %357 = vst [vmem:[%s777_s1 + $0x198] sm:$0xff] %v356_v51  ;;  %v362_v54 = vld [vmem:[%s776_s0 + $0x1b0] sm:$0xff] }
  0x1c   :  { %359 = vst [vmem:[%s777_s1 + $0x1a0] sm:$0xff] %v358_v52  ;;  %361 = vst [vmem:[%s777_s1 + $0x1a8] sm:$0xff] %v360_v53  ;;  %v364_v55 = vld [vmem:[%s776_s0 + $0x1b8] sm:$0xff]  ;;  %v366_v56 = vld [vmem:[%s776_s0 + $0x1c0] sm:$0xff] }
  0x1d   :  { %363 = vst [vmem:[%s777_s1 + $0x1b0] sm:$0xff] %v362_v54  ;;  %365 = vst [vmem:[%s777_s1 + $0x1b8] sm:$0xff] %v364_v55  ;;  %v368_v57 = vld [vmem:[%s776_s0 + $0x1c8] sm:$0xff]  ;;  %v370_v58 = vld [vmem:[%s776_s0 + $0x1d0] sm:$0xff] }
  0x1e   :  { %367 = vst [vmem:[%s777_s1 + $0x1c0] sm:$0xff] %v366_v56  ;;  %v372_v59 = vld [vmem:[%s776_s0 + $0x1d8] sm:$0xff]  ;;  %369 = vst [vmem:[%s777_s1 + $0x1c8] sm:$0xff] %v368_v57  ;;  %v374_v60 = vld [vmem:[%s776_s0 + $0x1e0] sm:$0xff] }
  0x1f   :  { %371 = vst [vmem:[%s777_s1 + $0x1d0] sm:$0xff] %v370_v58  ;;  %373 = vst [vmem:[%s777_s1 + $0x1d8] sm:$0xff] %v372_v59  ;;  %v376_v61 = vld [vmem:[%s776_s0 + $0x1e8] sm:$0xff]  ;;  %v378_v62 = vld [vmem:[%s776_s0 + $0x1f0] sm:$0xff] }
  0x20   :  { %375 = vst [vmem:[%s777_s1 + $0x1e0] sm:$0xff] %v374_v60  ;;  %377 = vst [vmem:[%s777_s1 + $0x1e8] sm:$0xff] %v376_v61  ;;  %v380_v63 = vld [vmem:[%s776_s0 + $0x1f8] sm:$0xff] }
  0x21   :  { %379 = vst [vmem:[%s777_s1 + $0x1f0] sm:$0xff] %v378_v62  ;;  %381 = vst [vmem:[%s777_s1 + $0x1f8] sm:$0xff] %v380_v63 }

// kernel: custom-call.2
= control target key start
LH: loop header
LB: loop body
LE: loop exit
PB: predicated region body
PF: predicated region fallthrough
CT: control target
= control target key end

     0   :  { %s92_s0 = inlined_call_operand.vmem [shape: f32[2,1], index: 0, kind: input, shape index: {}]   ;;  %s93_s1 = inlined_call_operand.vmem [shape: f32[2,1], index: 1, kind: input, shape index: {}]   ;;  %s94_s2 = inlined_call_operand.hbm [shape: c64[2,1], index: 2, kind: output, shape index: {}]  }
   0x1   :  { %s3_s11 = scalar_lea.hbm %s94_s2, 16 }
   0x2   :  { %4 = vsyncpa [#allocation0], 0  ;;  %s5_s14 = sshll.u32 %s92_s0, 4  ;;  %s6_s14 = int_to_ptr.vmem [resolvable:$true] %s5_s14 }
   0x3   :  { %s18_s15 = scalar_lea.vmem %s6_s14, 16  ;;  %p23_p1 = scmp.lt.s32.totalorder %s6_s14, %s6_s14 }
   0x4   :  { %p19_p0 = scmp.ne.s32.totalorder %s6_s14, %s18_s15  ;;  %p24_p2 = scmp.lt.s32.totalorder %s18_s15, %s18_s15 }
   0x6   :  { %p25_p3 = por %p24_p2, %p23_p1 }
   0x8   :  { %p26_p4 = pnand %p25_p3, %p19_p0 }
   0xa   :  { %29 = shalt.err (!%p26_p4)  }
   0xb   :  { %8 = dma.vmem_to_hbm [thread:$0]  %s6_s14, 16, %s94_s2, [#allocation0] }
   0xc   :  { %61 = dma.done.wait [#allocation0], 16  }
   0xd   :  { %62 = vsyncadd [#allocation0], 4294967280 }
   0xe   :  { %10 = vsyncpa [#allocation0], 1 }
   0xf   :  { %11 = vsyncpa [#allocation1], 0  ;;  %s12_s0 = sshll.u32 %s93_s1, 4  ;;  %s13_s0 = int_to_ptr.vmem [resolvable:$true] %s12_s0 }
  0x10   :  { %s38_s20 = scalar_lea.vmem %s13_s0, 16  ;;  %p43_p6 = scmp.lt.s32.totalorder %s13_s0, %s13_s0 }
  0x11   :  { %p39_p5 = scmp.ne.s32.totalorder %s13_s0, %s38_s20  ;;  %p44_p7 = scmp.lt.s32.totalorder %s38_s20, %s38_s20 }
  0x13   :  { %p45_p8 = por %p44_p7, %p43_p6 }
  0x15   :  { %p46_p9 = pnand %p45_p8, %p39_p5 }
  0x17   :  { %49 = shalt.err (!%p46_p9)  }
  0x18   :  { %15 = dma.vmem_to_hbm [thread:$0]  %s13_s0, 16, %s3_s11, [#allocation1] }
  0x19   :  { %63 = dma.done.wait [#allocation1], 16  }
  0x1a   :  { %64 = vsyncadd [#allocation1], 4294967280 }
  0x1b   :  { %17 = vsyncpa [#allocation1], 1 }

// kernel: forward.1
= control target key start
LH: loop header
LB: loop body
LE: loop exit
PB: predicated region body
PF: predicated region fallthrough
CT: control target
= control target key end

     0   :  { %s7339_s24 = smov 0   ;;  %s10073_s0 = inlined_call_operand.vmem [shape: f32[2,18,18,128], index: 0, kind: input, shape index: {}]   ;;  %s10074_s1 = inlined_call_operand.vmem [shape: f32[9,128,128], index: 1, kind: input, shape index: {}]   ;;  %s10075_s2 = inlined_call_operand.vmem [shape: f32[2,128], index: 2, kind: input, shape index: {}]   ;;  %s10076_s3 = inlined_call_operand.vmem [shape: f32[9,128,128], index: 3, kind: input, shape index: {}]   ;;  %s10077_s4 = inlined_call_operand.vmem [shape: f32[2,128], index: 4, kind: input, shape index: {}]   ;;  %s10078_s5 = inlined_call_operand.vmem [shape: f32[2,128], index: 5, kind: input, shape index: {}]   ;;  %s10079_s6 = inlined_call_operand.vmem [shape: f32[2,1], index: 6, kind: input, shape index: {}]   ;;  %s10080_s7 = inlined_call_operand.vmem [shape: f32[2,1,128], index: 7, kind: output, shape index: {}]  }
   0x1 LB: > { %s4940_s25 = sadd.s32 4294967295, %s7294_s24   ;;  %p4944_p0 = scmp.ge.s32.totalorder %s7294_s24, 1  ;;  %s7294_s24 = sphi %s7339_s24, %s17_s24  }
   0x2   : > { %p237_p1 = scmp.lt.s32.totalorder %s7294_s24, 3 }
   0x4   : > { %p238_p2 = pnand %p4944_p0, %p237_p1 }
   0x6   : > { %241 = sbr.rel (%p238_p2) target bundleno = 1509 (0x5e5), region = 48 }
   0xb   : > { %v4961_v0 = vld [vmem:[%s10074_s1 + $0xf8] sm:$0xff]  ;;  %v4960_v2 = vld [vmem:[%s10074_s1 + $0xf0] sm:$0xff]  ;;  %v4959_v4 = vld [vmem:[%s10074_s1 + $0xe8] sm:$0xff]  ;;  %p267_p3 = scmp.lt.s32.totalorder %s4940_s25, 1  ;;  %s7297_s9 = smov 64   ;;  %vm4823_vm0 = vcmask 1041408  }
   0xc   : > { %v322_v1 = vld [vmem:[%s10074_s1 + $0x78] sm:$0xff]  ;;  %6044 = vmatprep.subr.mxu0 %v4961_v0  ;;  %v321_v3 = vld [vmem:[%s10074_s1 + $0x70] sm:$0xff]  ;;  %v320_v5 = vld [vmem:[%s10074_s1 + $0x68] sm:$0xff] }
   0xd   : > { %6124 = vmatprep.subr.mxu1 %v322_v1  ;;  %6045 = vmatpush3.msra.mxu0 %v4961_v0  ;;  %v4958_v6 = vld [vmem:[%s10074_s1 + $0xe0] sm:$0xff]  ;;  %v4957_v8 = vld [vmem:[%s10074_s1 + $0xd8] sm:$0xff]  ;;  %v4956_v10 = vld [vmem:[%s10074_s1 + $0xd0] sm:$0xff]  ;;  %s10229_s25 = smov (!%p267_p3, %s4940_s25), 1 }
   0xe   : > { %6125 = vmatpush3.msra.mxu1 %v322_v1  ;;  %6046 = vmatprep.subr.mxu0 %v4960_v2  ;;  %v319_v7 = vld [vmem:[%s10074_s1 + $0x60] sm:$0xff]  ;;  %v318_v9 = vld [vmem:[%s10074_s1 + $0x58] sm:$0xff]  ;;  %v317_v11 = vld [vmem:[%s10074_s1 + $0x50] sm:$0xff]  ;;  %s7192_s13 = smul.u32 432, %s10229_s25  ;;  %s274_s8 = scalar_lea.vmem %s10080_s7, %s10229_s25 }
   0xf   : > { %6126 = vmatprep.subr.mxu1 %v321_v3  ;;  %6047 = vmatpush3.msra.mxu0 %v4960_v2  ;;  %v4955_v12 = vld [vmem:[%s10074_s1 + $0xc8] sm:$0xff]  ;;  %v4954_v14 = vld [vmem:[%s10074_s1 + $0xc0] sm:$0xff]  ;;  %v4953_v16 = vld [vmem:[%s10074_s1 + $0xb8] sm:$0xff] }
  0x10   : > { %6127 = vmatpush3.msra.mxu1 %v321_v3  ;;  %6048 = vmatprep.subr.mxu0 %v4959_v4  ;;  %v316_v13 = vld [vmem:[%s10074_s1 + $0x48] sm:$0xff]  ;;  %v315_v15 = vld [vmem:[%s10074_s1 + $0x40] sm:$0xff]  ;;  %v314_v17 = vld [vmem:[%s10074_s1 + $0x38] sm:$0xff]  ;;  %s7447_s26 = scalar_lea.vmem %s10073_s0, %s7192_s13 }
  0x11   : > { %6128 = vmatprep.subr.mxu1 %v320_v5  ;;  %6049 = vmatpush3.msra.mxu0 %v4959_v4  ;;  %v4952_v18 = vld [vmem:[%s10074_s1 + $0xb0] sm:$0xff]  ;;  %v4951_v20 = vld [vmem:[%s10074_s1 + $0xa8] sm:$0xff]  ;;  %v4950_v22 = vld [vmem:[%s10074_s1 + $0xa0] sm:$0xff] }
  0x12   : > { %6129 = vmatpush3.msra.mxu1 %v320_v5  ;;  %6050 = vmatprep.subr.mxu0 %v4958_v6  ;;  %v313_v19 = vld [vmem:[%s10074_s1 + $0x30] sm:$0xff]  ;;  %v312_v21 = vld [vmem:[%s10074_s1 + $0x28] sm:$0xff]  ;;  %v311_v23 = vld [vmem:[%s10074_s1 + $0x20] sm:$0xff] }
  0x13   : > { %6130 = vmatprep.subr.mxu1 %v319_v7  ;;  %6051 = vmatpush3.msra.mxu0 %v4958_v6  ;;  %v4949_v24 = vld [vmem:[%s10074_s1 + $0x98] sm:$0xff]  ;;  %v4948_v26 = vld [vmem:[%s10074_s1 + $0x90] sm:$0xff]  ;;  %v4947_v28 = vld [vmem:[%s10074_s1 + $0x88] sm:$0xff] }
  0x14   : > { %6131 = vmatpush3.msra.mxu1 %v319_v7  ;;  %6052 = vmatprep.subr.mxu0 %v4957_v8  ;;  %v310_v25 = vld [vmem:[%s10074_s1 + $0x18] sm:$0xff]  ;;  %v309_v27 = vld [vmem:[%s10074_s1 + $0x10] sm:$0xff]  ;;  %v308_v29 = vld [vmem:[%s10074_s1 + $0x8] sm:$0xff] }
  0x15   : > { %6132 = vmatprep.subr.mxu1 %v318_v9  ;;  %6053 = vmatpush3.msra.mxu0 %v4957_v8  ;;  %v4946_v30 = vld [vmem:[%s10074_s1 + $0x80] sm:$0xff]  ;;  %v324_v34 = vld [vmem:[%s7447_s26 + $0x9] sm:$0xff]  ;;  %v4977_v36 = vld [vmem:[%s10074_s1 + $0x178] sm:$0xff] }
  0x16   : > { %6133 = vmatpush3.msra.mxu1 %v318_v9  ;;  %6054 = vmatprep.subr.mxu0 %v4956_v10  ;;  %v307_v31 = vld [vmem:[%s10074_s1] sm:$0xff]  ;;  %v276_v35 = vld [vmem:[%s7447_s26 + $0x8] sm:$0xff]  ;;  %v7466_v38 = vld [vmem:[%s7447_s26 + $0x18] sm:$0xff] }
  0x17   : > { %6134 = vmatprep.subr.mxu1 %v317_v11  ;;  %6055 = vmatpush3.msra.mxu0 %v4956_v10  ;;  %v323_v32 = vld [vmem:[%s7447_s26 + $0x1] sm:$0xff]  ;;  %v7463_v37 = vld [vmem:[%s7447_s26 + $0x19] sm:$0xff]  ;;  %v4976_v39 = vld [vmem:[%s10074_s1 + $0x170] sm:$0xff] }
  0x18   : > { %6135 = vmatpush3.msra.mxu1 %v317_v11  ;;  %6056 = vmatprep.subr.mxu0 %v4955_v12  ;;  %v275_v33 = vld [vmem:[%s7447_s26] sm:$0xff]  ;;  %v5025_v40 = vld [vmem:[%s10074_s1 + $0x1f8] sm:$0xff]  ;;  %v7486_v44 = vld [vmem:[%s7447_s26 + $0x30] sm:$0xff] }
  0x19   : > { %6136 = vmatprep.subr.mxu1 %v316_v13  ;;  %6057 = vmatpush3.msra.mxu0 %v4955_v12  ;;  %v7476_v41 = vld [vmem:[%s7447_s26 + $0x21] sm:$0xff]  ;;  %v7483_v43 = vld [vmem:[%s7447_s26 + $0x31] sm:$0xff]  ;;  %v7495_v46 = vld [vmem:[%s7447_s26 + $0x39] sm:$0xff] }
  0x1a   : > { %6137 = vmatpush3.msra.mxu1 %v316_v13  ;;  %6058 = vmatprep.subr.mxu0 %v4954_v14  ;;  %v7479_v42 = vld [vmem:[%s7447_s26 + $0x20] sm:$0xff]  ;;  %v4975_v45 = vld [vmem:[%s10074_s1 + $0x168] sm:$0xff]  ;;  %v7498_v47 = vld [vmem:[%s7447_s26 + $0x38] sm:$0xff] }
  0x1b   : > { %6138 = vmatprep.subr.mxu1 %v315_v15  ;;  %6059 = vmatpush3.msra.mxu0 %v4954_v14  ;;  %v7502_v48 = vld [vmem:[%s7447_s26 + $0x49] sm:$0xff]  ;;  %v4974_v50 = vld [vmem:[%s10074_s1 + $0x160] sm:$0xff]  ;;  %v7518_v52 = vld [vmem:[%s7447_s26 + $0x51] sm:$0xff] }
  0x1c   : > { %6139 = vmatpush3.msra.mxu1 %v315_v15  ;;  %6060 = vmatprep.subr.mxu0 %v4953_v16  ;;  %v7505_v49 = vld [vmem:[%s7447_s26 + $0x48] sm:$0xff]  ;;  %v5024_v51 = vld [vmem:[%s10074_s1 + $0x1f0] sm:$0xff]  ;;  %v7527_v55 = vld [vmem:[%s7447_s26 + $0x60] sm:$0xff] }
  0x1d   : > { %6140 = vmatprep.subr.mxu1 %v314_v17  ;;  %6061 = vmatpush3.msra.mxu0 %v4953_v16  ;;  %v7521_v53 = vld [vmem:[%s7447_s26 + $0x50] sm:$0xff]  ;;  %v7524_v54 = vld [vmem:[%s7447_s26 + $0x61] sm:$0xff]  ;;  %v4973_v56 = vld [vmem:[%s10074_s1 + $0x158] sm:$0xff] }
  0x1e   : > { %6141 = vmatpush3.msra.mxu1 %v314_v17  ;;  %6062 = vmatprep.subr.mxu0 %v4952_v18  ;;  %v5023_v57 = vld [vmem:[%s10074_s1 + $0x1e8] sm:$0xff]  ;;  %v7546_v60 = vld [vmem:[%s7447_s26 + $0x79] sm:$0xff]  ;;  %v4972_v62 = vld [vmem:[%s10074_s1 + $0x150] sm:$0xff] }
  0x1f   : > { %6142 = vmatprep.subr.mxu1 %v313_v19  ;;  %6063 = vmatpush3.msra.mxu0 %v4952_v18  ;;  %v7540_v58 = vld [vmem:[%s7447_s26 + $0x69] sm:$0xff]  ;;  %v7549_v61 = vld [vmem:[%s7447_s26 + $0x78] sm:$0xff]  ;;  %v5022_v63 = vld [vmem:[%s10074_s1 + $0x1e0] sm:$0xff] }
  0x20   : > { %6143 = vmatpush3.msra.mxu1 %v313_v19  ;;  %6064 = vmatprep.subr.mxu0 %v4951_v20  ;;  %v7543_v59 = vld [vmem:[%s7447_s26 + $0x68] sm:$0xff]  ;;  %v7565_v1 = vld [vmem:[%s7447_s26 + $0x80] sm:$0xff]  ;;  %v7568_v2 = vld [vmem:[%s7447_s26 + $0x91] sm:$0xff] }
  0x21   : > { %6144 = vmatprep.subr.mxu1 %v312_v21  ;;  %6065 = vmatpush3.msra.mxu0 %v4951_v20  ;;  %v7562_v0 = vld [vmem:[%s7447_s26 + $0x81] sm:$0xff]  ;;  %v7571_v3 = vld [vmem:[%s7447_s26 + $0x90] sm:$0xff]  ;;  %v5021_v5 = vld [vmem:[%s10074_s1 + $0x1d8] sm:$0xff] }
  0x22   : > { %6145 = vmatpush3.msra.mxu1 %v312_v21  ;;  %6066 = vmatprep.subr.mxu0 %v4950_v22  ;;  %v4971_v4 = vld [vmem:[%s10074_s1 + $0x148] sm:$0xff]  ;;  %v7584_v6 = vld [vmem:[%s7447_s26 + $0x99] sm:$0xff]  ;;  %v5020_v11 = vld [vmem:[%s10074_s1 + $0x1d0] sm:$0xff] }
  0x23   : > { %6146 = vmatprep.subr.mxu1 %v311_v23  ;;  %6067 = vmatpush3.msra.mxu0 %v4950_v22  ;;  %v7587_v7 = vld [vmem:[%s7447_s26 + $0x98] sm:$0xff]  ;;  %v7590_v8 = vld [vmem:[%s7447_s26 + $0xa9] sm:$0xff]  ;;  %v4970_v10 = vld [vmem:[%s10074_s1 + $0x140] sm:$0xff] }
  0x24   : > { %6147 = vmatpush3.msra.mxu1 %v311_v23  ;;  %6068 = vmatprep.subr.mxu0 %v4949_v24  ;;  %v7593_v9 = vld [vmem:[%s7447_s26 + $0xa8] sm:$0xff]  ;;  %v7606_v12 = vld [vmem:[%s7447_s26 + $0xb1] sm:$0xff]  ;;  %v7615_v15 = vld [vmem:[%s7447_s26 + $0xc0] sm:$0xff] }
  0x25   : > { %6148 = vmatprep.subr.mxu1 %v310_v25  ;;  %6069 = vmatpush3.msra.mxu0 %v4949_v24  ;;  %v7609_v13 = vld [vmem:[%s7447_s26 + $0xb0] sm:$0xff]  ;;  %v7612_v14 = vld [vmem:[%s7447_s26 + $0xc1] sm:$0xff]  ;;  %v4969_v16 = vld [vmem:[%s10074_s1 + $0x138] sm:$0xff] }
  0x26   : > { %6149 = vmatpush3.msra.mxu1 %v310_v25  ;;  %6070 = vmatprep.subr.mxu0 %v4948_v26  ;;  %v5019_v17 = vld [vmem:[%s10074_s1 + $0x1c8] sm:$0xff]  ;;  %v7634_v20 = vld [vmem:[%s7447_s26 + $0xd9] sm:$0xff]  ;;  %v4968_v22 = vld [vmem:[%s10074_s1 + $0x130] sm:$0xff] }
  0x27   : > { %6150 = vmatprep.subr.mxu1 %v309_v27  ;;  %6071 = vmatpush3.msra.mxu0 %v4948_v26  ;;  %v7628_v18 = vld [vmem:[%s7447_s26 + $0xc9] sm:$0xff]  ;;  %v7637_v21 = vld [vmem:[%s7447_s26 + $0xd8] sm:$0xff]  ;;  %v5018_v23 = vld [vmem:[%s10074_s1 + $0x1c0] sm:$0xff] }
  0x28   : > { %6151 = vmatpush3.msra.mxu1 %v309_v27  ;;  %6072 = vmatprep.subr.mxu0 %v4947_v28  ;;  %v7631_v19 = vld [vmem:[%s7447_s26 + $0xc8] sm:$0xff]  ;;  %v7653_v25 = vld [vmem:[%s7447_s26 + $0xe0] sm:$0xff]  ;;  %v7656_v26 = vld [vmem:[%s7447_s26 + $0xf1] sm:$0xff] }
  0x29   : > { %6152 = vmatprep.subr.mxu1 %v308_v29  ;;  %6073 = vmatpush3.msra.mxu0 %v4947_v28  ;;  %v7650_v24 = vld [vmem:[%s7447_s26 + $0xe1] sm:$0xff]  ;;  %v7659_v27 = vld [vmem:[%s7447_s26 + $0xf0] sm:$0xff] }
  0x2a   : > { %6153 = vmatpush3.msra.mxu1 %v308_v29  ;;  %6074 = vmatprep.subr.mxu0 %v4946_v30  ;;  %v4967_v28 = vld [vmem:[%s10074_s1 + $0x128] sm:$0xff]  ;;  %v5017_v29 = vld [vmem:[%s10074_s1 + $0x1b8] sm:$0xff] }
  0x2b   : > { %6154 = vmatprep.subr.mxu1 %v307_v31  ;;  %6075 = vmatpush3.msra.mxu0 %v4946_v30  ;;  %v7672_v30 = vld [vmem:[%s7447_s26 + $0xf9] sm:$0xff] }
  0x2c   : > { %6076 = vmatprep.mubr.f32.mxu0 %v323_v32  ;;  %6155 = vmatpush3.msra.mxu1 %v307_v31  ;;  %v7675_v31 = vld [vmem:[%s7447_s26 + $0xf8] sm:$0xff]  ;;  %v7678_v32 = vld [vmem:[%s7447_s26 + $0x109] sm:$0xff] }
  0x2d   : > { %6156 = vmatprep.mubr.f32.mxu1 %v275_v33  ;;  %6077 = vmatmul.mubr.f32.vlgmr.msra.gmra.mxu0 %v324_v34  ;;  %v7681_v33 = vld [vmem:[%s7447_s26 + $0x108] sm:$0xff]  ;;  %v4966_v34 = vld [vmem:[%s10074_s1 + $0x120] sm:$0xff] }
  0x2e   : > { %6157 = vmatmul.mubr.f32.vlgmr.msra.gmra.mxu1 %v276_v35  ;;  %6204 = vmatprep.subr.mxu0 %v4977_v36  ;;  %v5016_v35 = vld [vmem:[%s10074_s1 + $0x1b0] sm:$0xff] }
  0x2f   : > { %6079 = vmatprep.mubr.f32.mxu0 %v7463_v37  ;;  %6205 = vmatpush3.msra.mxu0 %v4977_v36  ;;  %v7694_v36 = vld [vmem:[%s7447_s26 + $0x111] sm:$0xff] }
  0x30   : > { %6159 = vmatprep.mubr.f32.mxu1 %v7466_v38  ;;  %6206 = vmatprep.subr.mxu0 %v4976_v39 }
  0x31   : > { %6284 = vmatprep.subr.mxu1 %v5025_v40  ;;  %6080 = vmatmul.mubr.f32.gmra.mxu0 %v7476_v41 }
  0x32   : > { %6160 = vmatmul.mubr.f32.gmra.mxu1 %v7479_v42  ;;  %6207 = vmatpush3.msra.mxu0 %v4976_v39  ;;  %v7697_v39 = vld [vmem:[%s7447_s26 + $0x110] sm:$0xff] }
  0x33   : > { %6082 = vmatprep.mubr.f32.mxu0 %v7483_v43  ;;  %6162 = vmatprep.mubr.f32.mxu1 %v7486_v44 }
  0x34   : > { %6208 = vmatprep.subr.mxu0 %v4975_v45  ;;  %6285 = vmatpush3.msra.mxu1 %v5025_v40  ;;  %v7700_v40 = vld [vmem:[%s7447_s26 + $0x121] sm:$0xff] }
  0x35   : > { %6209 = vmatpush3.msra.mxu0 %v4975_v45  ;;  %6286 = vmatprep.subr.mxu1 %v5024_v51  ;;  %v7703_v45 = vld [vmem:[%s7447_s26 + $0x120] sm:$0xff] }
  0x36   : > { %6083 = vmatmul.mubr.f32.gmra.mxu0 %v7495_v46  ;;  %6163 = vmatmul.mubr.f32.gmra.mxu1 %v7498_v47 }
  0x37   : > { %6085 = vmatprep.mubr.f32.mxu0 %v7502_v48  ;;  %6165 = vmatprep.mubr.f32.mxu1 %v7505_v49 }
  0x38   : > { %6210 = vmatprep.subr.mxu0 %v4974_v50  ;;  %6287 = vmatpush3.msra.mxu1 %v5024_v51  ;;  %v5015_v51 = vld [vmem:[%s10074_s1 + $0x1a8] sm:$0xff] }
  0x39   : > { %6211 = vmatpush3.msra.mxu0 %v4974_v50  ;;  %6288 = vmatprep.subr.mxu1 %v5023_v57  ;;  %v4965_v50 = vld [vmem:[%s10074_s1 + $0x118] sm:$0xff] }
  0x3a   : > { %6086 = vmatmul.mubr.f32.gmra.mxu0 %v7518_v52  ;;  %6166 = vmatmul.mubr.f32.gmra.mxu1 %v7521_v53 }
  0x3b   : > { %6088 = vmatprep.mubr.f32.mxu0 %v7524_v54  ;;  %6168 = vmatprep.mubr.f32.mxu1 %v7527_v55 }
  0x3c   : > { %6212 = vmatprep.subr.mxu0 %v4973_v56  ;;  %6289 = vmatpush3.msra.mxu1 %v5023_v57  ;;  %v7719_v57 = vld [vmem:[%s7447_s26 + $0x128] sm:$0xff] }
  0x3d   : > { %6213 = vmatpush3.msra.mxu0 %v4973_v56  ;;  %6290 = vmatprep.subr.mxu1 %v5022_v63  ;;  %v7716_v56 = vld [vmem:[%s7447_s26 + $0x129] sm:$0xff] }
  0x3e   : > { %6089 = vmatmul.mubr.f32.gmra.mxu0 %v7540_v58  ;;  %6169 = vmatmul.mubr.f32.gmra.mxu1 %v7543_v59 }
  0x3f   : > { %6091 = vmatprep.mubr.f32.mxu0 %v7546_v60  ;;  %6171 = vmatprep.mubr.f32.mxu1 %v7549_v61 }
  0x40   : > { %6214 = vmatprep.subr.mxu0 %v4972_v62  ;;  %6291 = vmatpush3.msra.mxu1 %v5022_v63  ;;  %v7725_v63 = vld [vmem:[%s7447_s26 + $0x138] sm:$0xff] }
  0x41   : > { %6215 = vmatpush3.msra.mxu0 %v4972_v62  ;;  %6292 = vmatprep.subr.mxu1 %v5021_v5  ;;  %v7722_v62 = vld [vmem:[%s7447_s26 + $0x139] sm:$0xff] }
  0x42   : > { %6092 = vmatmul.mubr.f32.gmra.mxu0 %v7562_v0  ;;  %6172 = vmatmul.mubr.f32.gmra.mxu1 %v7565_v1 }
  0x43   : > { %6094 = vmatprep.mubr.f32.mxu0 %v7568_v2  ;;  %6174 = vmatprep.mubr.f32.mxu1 %v7571_v3 }
  0x44   : > { %6216 = vmatprep.subr.mxu0 %v4971_v4  ;;  %6293 = vmatpush3.msra.mxu1 %v5021_v5  ;;  %v5014_v5 = vld [vmem:[%s10074_s1 + $0x1a0] sm:$0xff] }
  0x45   : > { %6217 = vmatpush3.msra.mxu0 %v4971_v4  ;;  %6294 = vmatprep.subr.mxu1 %v5020_v11  ;;  %v4964_v4 = vld [vmem:[%s10074_s1 + $0x110] sm:$0xff] }
  0x46   : > { %6095 = vmatmul.mubr.f32.gmra.mxu0 %v7584_v6  ;;  %6175 = vmatmul.mubr.f32.gmra.mxu1 %v7587_v7 }
  0x47   : > { %6097 = vmatprep.mubr.f32.mxu0 %v7590_v8  ;;  %6177 = vmatprep.mubr.f32.mxu1 %v7593_v9 }
  0x48   : > { %6218 = vmatprep.subr.mxu0 %v4970_v10  ;;  %6295 = vmatpush3.msra.mxu1 %v5020_v11  ;;  %v7741_v11 = vld [vmem:[%s7447_s26 + $0x140] sm:$0xff] }
  0x49   : > { %6219 = vmatpush3.msra.mxu0 %v4970_v10  ;;  %6296 = vmatprep.subr.mxu1 %v5019_v17  ;;  %v7738_v10 = vld [vmem:[%s7447_s26 + $0x141] sm:$0xff] }
  0x4a   : > { %6098 = vmatmul.mubr.f32.gmra.mxu0 %v7606_v12  ;;  %6178 = vmatmul.mubr.f32.gmra.mxu1 %v7609_v13 }
  0x4b   : > { %6100 = vmatprep.mubr.f32.mxu0 %v7612_v14  ;;  %6180 = vmatprep.mubr.f32.mxu1 %v7615_v15 }
  0x4c   : > { %6220 = vmatprep.subr.mxu0 %v4969_v16  ;;  %6297 = vmatpush3.msra.mxu1 %v5019_v17  ;;  %v7747_v17 = vld [vmem:[%s7447_s26 + $0x150] sm:$0xff] }
  0x4d   : > { %6221 = vmatpush3.msra.mxu0 %v4969_v16  ;;  %6298 = vmatprep.subr.mxu1 %v5018_v23  ;;  %v7744_v16 = vld [vmem:[%s7447_s26 + $0x151] sm:$0xff] }
  0x4e   : > { %6101 = vmatmul.mubr.f32.gmra.mxu0 %v7628_v18  ;;  %6181 = vmatmul.mubr.f32.gmra.mxu1 %v7631_v19  ;;  %10106 = vst [vmem:[#allocation3_spill] sm:$0xff] %v7744_v16 }
  0x4f   : > { %6103 = vmatprep.mubr.f32.mxu0 %v7634_v20  ;;  %6183 = vmatprep.mubr.f32.mxu1 %v7637_v21 }
  0x50   : > { %6222 = vmatprep.subr.mxu0 %v4968_v22  ;;  %6299 = vmatpush3.msra.mxu1 %v5018_v23  ;;  %v5013_v23 = vld [vmem:[%s10074_s1 + $0x198] sm:$0xff] }
  0x51   : > { %6223 = vmatpush3.msra.mxu0 %v4968_v22  ;;  %6300 = vmatprep.subr.mxu1 %v5017_v29  ;;  %v4963_v22 = vld [vmem:[%s10074_s1 + $0x108] sm:$0xff] }
  0x52   : > { %6104 = vmatmul.mubr.f32.gmra.mxu0 %v7650_v24  ;;  %6184 = vmatmul.mubr.f32.gmra.mxu1 %v7653_v25 }
  0x53   : > { %6106 = vmatprep.mubr.f32.mxu0 %v7656_v26  ;;  %6186 = vmatprep.mubr.f32.mxu1 %v7659_v27 }
  0x54   : > { %6224 = vmatprep.subr.mxu0 %v4967_v28  ;;  %6301 = vmatpush3.msra.mxu1 %v5017_v29  ;;  %v7763_v29 = vld [vmem:[%s7447_s26 + $0x158] sm:$0xff] }
  0x55   : > { %6225 = vmatpush3.msra.mxu0 %v4967_v28  ;;  %6302 = vmatprep.subr.mxu1 %v5016_v35  ;;  %v7760_v28 = vld [vmem:[%s7447_s26 + $0x159] sm:$0xff] }
  0x56   : > { %6107 = vmatmul.mubr.f32.gmra.mxu0 %v7672_v30  ;;  %6187 = vmatmul.mubr.f32.gmra.mxu1 %v7675_v31  ;;  %10107 = vst [vmem:[#allocation4_spill] sm:$0xff] %v7760_v28 }
  0x57   : > { %6109 = vmatprep.mubr.f32.mxu0 %v7678_v32  ;;  %6189 = vmatprep.mubr.f32.mxu1 %v7681_v33 }
  0x58   : > { %6226 = vmatprep.subr.mxu0 %v4966_v34  ;;  %6303 = vmatpush3.msra.mxu1 %v5016_v35  ;;  %v7769_v35 = vld [vmem:[%s7447_s26 + $0x168] sm:$0xff] }
  0x59   : > { %6227 = vmatpush3.msra.mxu0 %v4966_v34  ;;  %6304 = vmatprep.subr.mxu1 %v5015_v51  ;;  %v7766_v34 = vld [vmem:[%s7447_s26 + $0x169] sm:$0xff] }
  0x5a   : > { %6110 = vmatmul.mubr.f32.gmra.mxu0 %v7694_v36  ;;  %6190 = vmatmul.mubr.f32.gmra.mxu1 %v7697_v39  ;;  %10108 = vst [vmem:[#allocation5_spill] sm:$0xff] %v7766_v34 }
  0x5b   : > { %6112 = vmatprep.mubr.f32.mxu0 %v7700_v40  ;;  %6192 = vmatprep.mubr.f32.mxu1 %v7703_v45 }
  0x5c   : > { %6228 = vmatprep.subr.mxu0 %v4965_v50  ;;  %6305 = vmatpush3.msra.mxu1 %v5015_v51  ;;  %v5012_v51 = vld [vmem:[%s10074_s1 + $0x190] sm:$0xff] }
  0x5d   : > { %6229 = vmatpush3.msra.mxu0 %v4965_v50  ;;  %6306 = vmatprep.subr.mxu1 %v5014_v5  ;;  %v4962_v50 = vld [vmem:[%s10074_s1 + $0x100] sm:$0xff] }
  0x5e   : > { %6113 = vmatmul.mubr.f32.gmra.mxu0 %v7716_v56  ;;  %6193 = vmatmul.mubr.f32.gmra.mxu1 %v7719_v57 }
  0x5f   : > { %6115 = vmatprep.mubr.f32.mxu0 %v7722_v62  ;;  %6195 = vmatprep.mubr.f32.mxu1 %v7725_v63 }
  0x60   : > { %6230 = vmatprep.subr.mxu0 %v4964_v4  ;;  %6307 = vmatpush3.msra.mxu1 %v5014_v5  ;;  %v7785_v5 = vld [vmem:[%s7447_s26 + $0x170] sm:$0xff] }
  0x61   : > { %6231 = vmatpush3.msra.mxu0 %v4964_v4  ;;  %6308 = vmatprep.subr.mxu1 %v5013_v23  ;;  %v7782_v4 = vld [vmem:[%s7447_s26 + $0x171] sm:$0xff] }
  0x62   : > { %6116 = vmatmul.mubr.f32.gmra.mxu0 %v7738_v10  ;;  %6196 = vmatmul.mubr.f32.gmra.mxu1 %v7741_v11 }
  0x63   : > { %6118 = vmatprep.mubr.f32.mxu0 %v7744_v16  ;;  %6198 = vmatprep.mubr.f32.mxu1 %v7747_v17  ;;  %v823_v16 = vld [vmem:[%s7447_s26 + $0xa] sm:$0xff] }
  0x64   : > { %6232 = vmatprep.subr.mxu0 %v4963_v22  ;;  %6309 = vmatpush3.msra.mxu1 %v5013_v23  ;;  %v822_v23 = vld [vmem:[%s7447_s26 + $0x2] sm:$0xff] }
  0x65   : > { %6233 = vmatpush3.msra.mxu0 %v4963_v22  ;;  %6310 = vmatprep.subr.mxu1 %v5012_v51  ;;  %v5011_v22 = vld [vmem:[%s10074_s1 + $0x188] sm:$0xff] }
  0x66   : > { %6119 = vmatmul.mubr.f32.gmra.mxu0 %v7760_v28  ;;  %6199 = vmatmul.mubr.f32.gmra.mxu1 %v7763_v29  ;;  %v5010_v28 = vld [vmem:[%s10074_s1 + $0x180] sm:$0xff] }
  0x67   : > { %6121 = vmatprep.mubr.f32.mxu0 %v7766_v34  ;;  %6201 = vmatprep.mubr.f32.mxu1 %v7769_v35  ;;  %v5073_v34 = vld [vmem:[%s10074_s1 + $0x278] sm:$0xff] }
  0x68   : > { %6234 = vmatprep.subr.mxu0 %v4962_v50  ;;  %6311 = vmatpush3.msra.mxu1 %v5012_v51  ;;  %v5072_v51 = vld [vmem:[%s10074_s1 + $0x270] sm:$0xff] }
  0x69   : > { %6235 = vmatpush3.msra.mxu0 %v4962_v50  ;;  %6312 = vmatprep.subr.mxu1 %v5011_v22  ;;  %v7802_v50 = vld [vmem:[%s7447_s26 + $0x1a] sm:$0xff] }
  0x6a   : > { %6122 = vmatmul.mubr.f32.gmra.mxu0 %v7782_v4  ;;  %6202 = vmatmul.mubr.f32.gmra.mxu1 %v7785_v5 }
  0x6b   : > { %6236 = vmatprep.mubr.f32.mxu0 %v822_v23  ;;  %6313 = vmatpush3.msra.mxu1 %v5011_v22  ;;  %v7809_v23 = vld [vmem:[%s7447_s26 + $0x22] sm:$0xff] }
  0x6c   : > { %6364 = vmatprep.subr.mxu0 %v5073_v34  ;;  %6314 = vmatprep.subr.mxu1 %v5010_v28  ;;  %v5071_v22 = vld [vmem:[%s10074_s1 + $0x268] sm:$0xff] }
  0x6d   : > { %6316 = vmatprep.mubr.f32.mxu1 %v7466_v38  ;;  %6315 = vmatpush3.msra.mxu1 %v5010_v28  ;;  %v7816_v38 = vld [vmem:[%s7447_s26 + $0x32] sm:$0xff]  ;;  %v7829_v28 = vld [vmem:[%s7447_s26 + $0x3a] sm:$0xff] }
  0x6e   : > { %6237 = vmatmul.mubr.f32.vlgmr.msra.gmra.mxu0 %v823_v16  ;;  %6317 = vmatmul.mubr.f32.vlgmr.msra.gmra.mxu1 %v7479_v42  ;;  %v5070_v42 = vld [vmem:[%s10074_s1 + $0x260] sm:$0xff]  ;;  %v5121_v16 = vld [vmem:[%s10074_s1 + $0x2f8] sm:$0xff] }
  0x6f   : > { %6365 = vmatpush3.msra.mxu0 %v5073_v34  ;;  %6239 = vmatprep.mubr.f32.mxu0 %v7802_v50  ;;  %v5069_v34 = vld [vmem:[%s10074_s1 + $0x258] sm:$0xff] }
  0x70   : > { %6366 = vmatprep.subr.mxu0 %v5072_v51  ;;  %6319 = vmatprep.mubr.f32.mxu1 %v7486_v44  ;;  %v7833_v44 = vld [vmem:[%s7447_s26 + $0x4a] sm:$0xff] }
  0x71   : > { %6367 = vmatpush3.msra.mxu0 %v5072_v51  ;;  %6444 = vmatprep.subr.mxu1 %v5121_v16  ;;  %v7849_v51 = vld [vmem:[%s7447_s26 + $0x62] sm:$0xff] }
  0x72   : > { %6240 = vmatmul.mubr.f32.gmra.mxu0 %v7809_v23  ;;  %6368 = vmatprep.subr.mxu0 %v5071_v22 }
  0x73   : > { %6320 = vmatmul.mubr.f32.gmra.mxu1 %v7498_v47  ;;  %6242 = vmatprep.mubr.f32.mxu0 %v7816_v38  ;;  %v5120_v47 = vld [vmem:[%s10074_s1 + $0x2f0] sm:$0xff] }
  0x74   : > { %6322 = vmatprep.mubr.f32.mxu1 %v7505_v49  ;;  %6369 = vmatpush3.msra.mxu0 %v5071_v22  ;;  %v7845_v49 = vld [vmem:[%s7447_s26 + $0x52] sm:$0xff] }
  0x75   : > { %6370 = vmatprep.subr.mxu0 %v5070_v42  ;;  %6445 = vmatpush3.msra.mxu1 %v5121_v16  ;;  %v5068_v22 = vld [vmem:[%s10074_s1 + $0x250] sm:$0xff]  ;;  %v5067_v16 = vld [vmem:[%s10074_s1 + $0x248] sm:$0xff] }
  0x76   : > { %6243 = vmatmul.mubr.f32.gmra.mxu0 %v7829_v28  ;;  %6446 = vmatprep.subr.mxu1 %v5120_v47 }
  0x77   : > { %6323 = vmatmul.mubr.f32.gmra.mxu1 %v7521_v53  ;;  %6245 = vmatprep.mubr.f32.mxu0 %v7833_v44  ;;  %v5119_v53 = vld [vmem:[%s10074_s1 + $0x2e8] sm:$0xff] }
  0x78   : > { %6325 = vmatprep.mubr.f32.mxu1 %v7527_v55  ;;  %6371 = vmatpush3.msra.mxu0 %v5070_v42  ;;  %v7861_v55 = vld [vmem:[%s7447_s26 + $0x6a] sm:$0xff]  ;;  %v7865_v42 = vld [vmem:[%s7447_s26 + $0x7a] sm:$0xff] }
  0x79   : > { %6372 = vmatprep.subr.mxu0 %v5069_v34  ;;  %6447 = vmatpush3.msra.mxu1 %v5120_v47  ;;  %v5066_v47 = vld [vmem:[%s10074_s1 + $0x240] sm:$0xff] }
  0x7a   : > { %6246 = vmatmul.mubr.f32.gmra.mxu0 %v7845_v49  ;;  %6448 = vmatprep.subr.mxu1 %v5119_v53 }
  0x7b   : > { %6326 = vmatmul.mubr.f32.gmra.mxu1 %v7543_v59  ;;  %6248 = vmatprep.mubr.f32.mxu0 %v7849_v51  ;;  %v5118_v59 = vld [vmem:[%s10074_s1 + $0x2e0] sm:$0xff] }
  0x7c   : > { %6328 = vmatprep.mubr.f32.mxu1 %v7549_v61  ;;  %6373 = vmatpush3.msra.mxu0 %v5069_v34  ;;  %v7877_v61 = vld [vmem:[%s7447_s26 + $0x82] sm:$0xff]  ;;  %v7881_v34 = vld [vmem:[%s7447_s26 + $0x92] sm:$0xff] }
  0x7d   : > { %6374 = vmatprep.subr.mxu0 %v5068_v22  ;;  %6449 = vmatpush3.msra.mxu1 %v5119_v53  ;;  %v5065_v53 = vld [vmem:[%s10074_s1 + $0x238] sm:$0xff] }
  0x7e   : > { %6249 = vmatmul.mubr.f32.gmra.mxu0 %v7861_v55  ;;  %6450 = vmatprep.subr.mxu1 %v5118_v59 }
  0x7f   : > { %6329 = vmatmul.mubr.f32.gmra.mxu1 %v7565_v1  ;;  %6251 = vmatprep.mubr.f32.mxu0 %v7865_v42  ;;  %v5117_v1 = vld [vmem:[%s10074_s1 + $0x2d8] sm:$0xff] }
  0x80   : > { %6331 = vmatprep.mubr.f32.mxu1 %v7571_v3  ;;  %6375 = vmatpush3.msra.mxu0 %v5068_v22  ;;  %v7893_v3 = vld [vmem:[%s7447_s26 + $0x9a] sm:$0xff]  ;;  %v7897_v22 = vld [vmem:[%s7447_s26 + $0xaa] sm:$0xff] }
  0x81   : > { %6376 = vmatprep.subr.mxu0 %v5067_v16  ;;  %6451 = vmatpush3.msra.mxu1 %v5118_v59  ;;  %v5064_v59 = vld [vmem:[%s10074_s1 + $0x230] sm:$0xff] }
  0x82   : > { %6252 = vmatmul.mubr.f32.gmra.mxu0 %v7877_v61  ;;  %6452 = vmatprep.subr.mxu1 %v5117_v1 }
  0x83   : > { %6332 = vmatmul.mubr.f32.gmra.mxu1 %v7587_v7  ;;  %6254 = vmatprep.mubr.f32.mxu0 %v7881_v34  ;;  %v5116_v7 = vld [vmem:[%s10074_s1 + $0x2d0] sm:$0xff] }
  0x84   : > { %6334 = vmatprep.mubr.f32.mxu1 %v7593_v9  ;;  %6377 = vmatpush3.msra.mxu0 %v5067_v16  ;;  %v7909_v9 = vld [vmem:[%s7447_s26 + $0xb2] sm:$0xff]  ;;  %v7913_v16 = vld [vmem:[%s7447_s26 + $0xc2] sm:$0xff] }
  0x85   : > { %6378 = vmatprep.subr.mxu0 %v5066_v47  ;;  %6453 = vmatpush3.msra.mxu1 %v5117_v1  ;;  %v5063_v1 = vld [vmem:[%s10074_s1 + $0x228] sm:$0xff] }
  0x86   : > { %6255 = vmatmul.mubr.f32.gmra.mxu0 %v7893_v3  ;;  %6454 = vmatprep.subr.mxu1 %v5116_v7 }
  0x87   : > { %6335 = vmatmul.mubr.f32.gmra.mxu1 %v7609_v13  ;;  %6257 = vmatprep.mubr.f32.mxu0 %v7897_v22  ;;  %v5115_v13 = vld [vmem:[%s10074_s1 + $0x2c8] sm:$0xff] }
  0x88   : > { %6337 = vmatprep.mubr.f32.mxu1 %v7615_v15  ;;  %6379 = vmatpush3.msra.mxu0 %v5066_v47  ;;  %v7925_v15 = vld [vmem:[%s7447_s26 + $0xca] sm:$0xff]  ;;  %v7929_v47 = vld [vmem:[%s7447_s26 + $0xda] sm:$0xff] }
  0x89   : > { %6380 = vmatprep.subr.mxu0 %v5065_v53  ;;  %6455 = vmatpush3.msra.mxu1 %v5116_v7  ;;  %v5062_v7 = vld [vmem:[%s10074_s1 + $0x220] sm:$0xff] }
  0x8a   : > { %6258 = vmatmul.mubr.f32.gmra.mxu0 %v7909_v9  ;;  %6456 = vmatprep.subr.mxu1 %v5115_v13 }
  0x8b   : > { %6338 = vmatmul.mubr.f32.gmra.mxu1 %v7631_v19  ;;  %6260 = vmatprep.mubr.f32.mxu0 %v7913_v16  ;;  %v5114_v19 = vld [vmem:[%s10074_s1 + $0x2c0] sm:$0xff] }
  0x8c   : > { %6340 = vmatprep.mubr.f32.mxu1 %v7637_v21  ;;  %6381 = vmatpush3.msra.mxu0 %v5065_v53  ;;  %v7941_v21 = vld [vmem:[%s7447_s26 + $0xe2] sm:$0xff]  ;;  %v7945_v53 = vld [vmem:[%s7447_s26 + $0xf2] sm:$0xff] }
  0x8d   : > { %6382 = vmatprep.subr.mxu0 %v5064_v59  ;;  %6457 = vmatpush3.msra.mxu1 %v5115_v13  ;;  %v5061_v13 = vld [vmem:[%s10074_s1 + $0x218] sm:$0xff] }
  0x8e   : > { %6261 = vmatmul.mubr.f32.gmra.mxu0 %v7925_v15  ;;  %6458 = vmatprep.subr.mxu1 %v5114_v19 }
  0x8f   : > { %6341 = vmatmul.mubr.f32.gmra.mxu1 %v7653_v25  ;;  %6263 = vmatprep.mubr.f32.mxu0 %v7929_v47  ;;  %v5113_v25 = vld [vmem:[%s10074_s1 + $0x2b8] sm:$0xff] }
  0x90   : > { %6343 = vmatprep.mubr.f32.mxu1 %v7659_v27  ;;  %6383 = vmatpush3.msra.mxu0 %v5064_v59  ;;  %v7957_v27 = vld [vmem:[%s7447_s26 + $0xfa] sm:$0xff]  ;;  %v7961_v59 = vld [vmem:[%s7447_s26 + $0x10a] sm:$0xff] }
  0x91   : > { %6384 = vmatprep.subr.mxu0 %v5063_v1  ;;  %6459 = vmatpush3.msra.mxu1 %v5114_v19  ;;  %v5060_v19 = vld [vmem:[%s10074_s1 + $0x210] sm:$0xff] }
  0x92   : > { %6264 = vmatmul.mubr.f32.gmra.mxu0 %v7941_v21  ;;  %6460 = vmatprep.subr.mxu1 %v5113_v25 }
  0x93   : > { %6344 = vmatmul.mubr.f32.gmra.mxu1 %v7675_v31  ;;  %6266 = vmatprep.mubr.f32.mxu0 %v7945_v53  ;;  %v5112_v31 = vld [vmem:[%s10074_s1 + $0x2b0] sm:$0xff] }
  0x94   : > { %6346 = vmatprep.mubr.f32.mxu1 %v7681_v33  ;;  %6385 = vmatpush3.msra.mxu0 %v5063_v1  ;;  %v7973_v33 = vld [vmem:[%s7447_s26 + $0x112] sm:$0xff]  ;;  %v7977_v1 = vld [vmem:[%s7447_s26 + $0x122] sm:$0xff] }
  0x95   : > { %6386 = vmatprep.subr.mxu0 %v5062_v7  ;;  %6461 = vmatpush3.msra.mxu1 %v5113_v25  ;;  %v5059_v25 = vld [vmem:[%s10074_s1 + $0x208] sm:$0xff] }
  0x96   : > { %6267 = vmatmul.mubr.f32.gmra.mxu0 %v7957_v27  ;;  %6462 = vmatprep.subr.mxu1 %v5112_v31 }
  0x97   : > { %6347 = vmatmul.mubr.f32.gmra.mxu1 %v7697_v39  ;;  %6269 = vmatprep.mubr.f32.mxu0 %v7961_v59  ;;  %v5111_v39 = vld [vmem:[%s10074_s1 + $0x2a8] sm:$0xff] }
  0x98   : > { %6349 = vmatprep.mubr.f32.mxu1 %v7703_v45  ;;  %6387 = vmatpush3.msra.mxu0 %v5062_v7  ;;  %v7989_v45 = vld [vmem:[%s7447_s26 + $0x12a] sm:$0xff]  ;;  %v7993_v7 = vld [vmem:[%s7447_s26 + $0x13a] sm:$0xff] }
  0x99   : > { %6388 = vmatprep.subr.mxu0 %v5061_v13  ;;  %6463 = vmatpush3.msra.mxu1 %v5112_v31  ;;  %v5058_v31 = vld [vmem:[%s10074_s1 + $0x200] sm:$0xff] }
  0x9a   : > { %6270 = vmatmul.mubr.f32.gmra.mxu0 %v7973_v33  ;;  %6464 = vmatprep.subr.mxu1 %v5111_v39 }
  0x9b   : > { %6350 = vmatmul.mubr.f32.gmra.mxu1 %v7719_v57  ;;  %6272 = vmatprep.mubr.f32.mxu0 %v7977_v1  ;;  %v5110_v57 = vld [vmem:[%s10074_s1 + $0x2a0] sm:$0xff] }
  0x9c   : > { %6352 = vmatprep.mubr.f32.mxu1 %v7725_v63  ;;  %6389 = vmatpush3.msra.mxu0 %v5061_v13  ;;  %v8005_v63 = vld [vmem:[%s7447_s26 + $0x142] sm:$0xff]  ;;  %v8009_v13 = vld [vmem:[%s7447_s26 + $0x152] sm:$0xff] }
  0x9d   : > { %6390 = vmatprep.subr.mxu0 %v5060_v19  ;;  %6465 = vmatpush3.msra.mxu1 %v5111_v39  ;;  %v5108_v39 = vld [vmem:[%s10074_s1 + $0x290] sm:$0xff] }
  0x9e   : > { %6273 = vmatmul.mubr.f32.gmra.mxu0 %v7989_v45  ;;  %6466 = vmatprep.subr.mxu1 %v5110_v57 }
  0x9f   : > { %6353 = vmatmul.mubr.f32.gmra.mxu1 %v7741_v11  ;;  %6275 = vmatprep.mubr.f32.mxu0 %v7993_v7  ;;  %v5109_v11 = vld [vmem:[%s10074_s1 + $0x298] sm:$0xff] }
  0xa0   : > { %6355 = vmatprep.mubr.f32.mxu1 %v7747_v17  ;;  %6391 = vmatpush3.msra.mxu0 %v5060_v19  ;;  %v8021_v17 = vld [vmem:[%s7447_s26 + $0x15a] sm:$0xff]  ;;  %v8025_v19 = vld [vmem:[%s7447_s26 + $0x16a] sm:$0xff] }
  0xa1   : > { %6392 = vmatprep.subr.mxu0 %v5059_v25  ;;  %6467 = vmatpush3.msra.mxu1 %v5110_v57  ;;  %v8031_v57 = vld [vmem:[%s7447_s26 + $0x180] sm:$0xff] }
  0xa2   : > { %6276 = vmatmul.mubr.f32.gmra.mxu0 %v8005_v63  ;;  %6468 = vmatprep.subr.mxu1 %v5109_v11 }
  0xa3   : > { %6356 = vmatmul.mubr.f32.gmra.mxu1 %v7763_v29  ;;  %6278 = vmatprep.mubr.f32.mxu0 %v8009_v13  ;;  %v8037_v29 = vld [vmem:[%s7447_s26 + $0x172] sm:$0xff] }
  0xa4   : > { %6358 = vmatprep.mubr.f32.mxu1 %v7769_v35  ;;  %6393 = vmatpush3.msra.mxu0 %v5059_v25  ;;  %v5107_v35 = vld [vmem:[%s10074_s1 + $0x288] sm:$0xff] }
  0xa5   : > { %6394 = vmatprep.subr.mxu0 %v5058_v31  ;;  %6469 = vmatpush3.msra.mxu1 %v5109_v11  ;;  %v8044_v25 = vld [vmem:[%s7447_s26 + $0x188] sm:$0xff]  ;;  %v5169_v11 = vld [vmem:[%s10074_s1 + $0x378] sm:$0xff] }
  0xa6   : > { %6279 = vmatmul.mubr.f32.gmra.mxu0 %v8021_v17  ;;  %6470 = vmatprep.subr.mxu1 %v5108_v39 }
  0xa7   : > { %6359 = vmatmul.mubr.f32.gmra.mxu1 %v7785_v5  ;;  %6281 = vmatprep.mubr.f32.mxu0 %v8025_v19  ;;  %v5106_v5 = vld [vmem:[%s10074_s1 + $0x280] sm:$0xff] }
  0xa8   : > { %6361 = vmatprep.mubr.f32.mxu1 %v8031_v57  ;;  %6395 = vmatpush3.msra.mxu0 %v5058_v31  ;;  %v5168_v31 = vld [vmem:[%s10074_s1 + $0x370] sm:$0xff] }
  0xa9   : > { %6471 = vmatpush3.msra.mxu1 %v5108_v39  ;;  %6524 = vmatprep.subr.mxu0 %v5169_v11  ;;  %v5167_v39 = vld [vmem:[%s10074_s1 + $0x368] sm:$0xff] }
  0xaa   : > { %6282 = vmatmul.mubr.f32.gmra.mxu0 %v8037_v29  ;;  %6472 = vmatprep.subr.mxu1 %v5107_v35 }
  0xab   : > { %6362 = vmatmul.mubr.f32.gmra.mxu1 %v8044_v25  ;;  %6396 = vmatprep.mubr.f32.mxu0 %v7463_v37  ;;  %v5166_v37 = vld [vmem:[%s10074_s1 + $0x360] sm:$0xff] }
  0xac   : > { %6473 = vmatpush3.msra.mxu1 %v5107_v35  ;;  %6476 = vmatprep.mubr.f32.mxu1 %v7802_v50  ;;  %v5205_v50 = vld [vmem:[%s10074_s1 + $0x398] sm:$0xff]  ;;  %v5262_v35 = vld [vmem:[%s10074_s1 + $0x460] sm:$0xff] }
  0xad   : > { %6474 = vmatprep.subr.mxu1 %v5106_v5 }
  0xae   : > { %6397 = vmatmul.mubr.f32.vlgmr.msra.gmra.mxu0 %v7476_v41  ;;  %6475 = vmatpush3.msra.mxu1 %v5106_v5  ;;  %v5217_v41 = vld [vmem:[%s10074_s1 + $0x3f8] sm:$0xff]  ;;  %v5127_v5 = vld [vmem:[%s7447_s26 + $0x68] sm:$0xff] }
  0xaf   : > { %6525 = vmatpush3.msra.mxu0 %v5169_v11  ;;  %6477 = vmatmul.mubr.f32.vlgmr.msra.gmra.mxu1 %v7809_v23  ;;  %v5154_v23 = vld [vmem:[%s10074_s1 + $0x300] sm:$0xff] }
  0xb0   : > { %6399 = vmatprep.mubr.f32.mxu0 %v7483_v43  ;;  %6526 = vmatprep.subr.mxu0 %v5168_v31  ;;  %v5165_v43 = vld [vmem:[%s10074_s1 + $0x358] sm:$0xff] }
  0xb1   : > { %6479 = vmatprep.mubr.f32.mxu1 %v7816_v38  ;;  %6527 = vmatpush3.msra.mxu0 %v5168_v31  ;;  %v10111_v38 = vld [vmem:[#allocation5_spill] sm:$0xff] }
  0xb2   : > { %6400 = vmatmul.mubr.f32.gmra.mxu0 %v7495_v46  ;;  %6528 = vmatprep.subr.mxu0 %v5167_v39  ;;  %v5216_v46 = vld [vmem:[%s10074_s1 + $0x3f0] sm:$0xff] }
  0xb3   : > { %6480 = vmatmul.mubr.f32.gmra.mxu1 %v7829_v28  ;;  %6402 = vmatprep.mubr.f32.mxu0 %v7502_v48  ;;  %v5164_v48 = vld [vmem:[%s10074_s1 + $0x350] sm:$0xff]  ;;  %v8197_v28 = vld [vmem:[%s7447_s26 + $0x181] sm:$0xff] }
  0xb4   : > { %6482 = vmatprep.mubr.f32.mxu1 %v7833_v44  ;;  %6529 = vmatpush3.msra.mxu0 %v5167_v39  ;;  %v5204_v44 = vld [vmem:[%s10074_s1 + $0x390] sm:$0xff] }
  0xb5   : > { %6530 = vmatprep.subr.mxu0 %v5166_v37  ;;  %6604 = vmatprep.subr.mxu1 %v5217_v41 }
  0xb6   : > { %6403 = vmatmul.mubr.f32.gmra.mxu0 %v7518_v52  ;;  %6605 = vmatpush3.msra.mxu1 %v5217_v41  ;;  %v5215_v52 = vld [vmem:[%s10074_s1 + $0x3e8] sm:$0xff]  ;;  %v5128_v41 = vld [vmem:[%s7447_s26 + $0x78] sm:$0xff] }
  0xb7   : > { %6483 = vmatmul.mubr.f32.gmra.mxu1 %v7845_v49  ;;  %6405 = vmatprep.mubr.f32.mxu0 %v7524_v54  ;;  %v5163_v54 = vld [vmem:[%s10074_s1 + $0x348] sm:$0xff] }
  0xb8   : > { %6485 = vmatprep.mubr.f32.mxu1 %v7849_v51  ;;  %6531 = vmatpush3.msra.mxu0 %v5166_v37  ;;  %v8203_v49 = vld [vmem:[%s7447_s26 + $0x182] sm:$0xff] }
  0xb9   : > { %6532 = vmatprep.subr.mxu0 %v5165_v43  ;;  %6606 = vmatprep.subr.mxu1 %v5216_v46  ;;  %v8209_v51 = vld [vmem:[%s7447_s26 + $0x189] sm:$0xff] }
  0xba   : > { %6406 = vmatmul.mubr.f32.gmra.mxu0 %v7540_v58  ;;  %6607 = vmatpush3.msra.mxu1 %v5216_v46  ;;  %v5214_v58 = vld [vmem:[%s10074_s1 + $0x3e0] sm:$0xff]  ;;  %v5175_v37 = vld [vmem:[%s7447_s26 + $0x69] sm:$0xff] }
  0xbb   : > { %6486 = vmatmul.mubr.f32.gmra.mxu1 %v7861_v55  ;;  %6408 = vmatprep.mubr.f32.mxu0 %v7546_v60  ;;  %v5162_v60 = vld [vmem:[%s10074_s1 + $0x340] sm:$0xff]  ;;  %v5203_v55 = vld [vmem:[%s10074_s1 + $0x388] sm:$0xff] }
  0xbc   : > { %6488 = vmatprep.mubr.f32.mxu1 %v7865_v42  ;;  %6533 = vmatpush3.msra.mxu0 %v5165_v43  ;;  %v8216_v42 = vld [vmem:[%s7447_s26 + $0x18a] sm:$0xff]  ;;  %v5176_v46 = vld [vmem:[%s7447_s26 + $0x79] sm:$0xff] }
  0xbd   : > { %6534 = vmatprep.subr.mxu0 %v5164_v48  ;;  %6608 = vmatprep.subr.mxu1 %v5215_v52 }
  0xbe   : > { %6409 = vmatmul.mubr.f32.gmra.mxu0 %v7562_v0  ;;  %6609 = vmatpush3.msra.mxu1 %v5215_v52  ;;  %v5213_v0 = vld [vmem:[%s10074_s1 + $0x3d8] sm:$0xff] }
  0xbf   : > { %6489 = vmatmul.mubr.f32.gmra.mxu1 %v7877_v61  ;;  %6411 = vmatprep.mubr.f32.mxu0 %v7568_v2  ;;  %v5161_v2 = vld [vmem:[%s10074_s1 + $0x338] sm:$0xff] }
  0xc0   : > { %6491 = vmatprep.mubr.f32.mxu1 %v7881_v34  ;;  %6535 = vmatpush3.msra.mxu0 %v5164_v48  ;;  %v5265_v61 = vld [vmem:[%s10074_s1 + $0x478] sm:$0xff]  ;;  %v5202_v34 = vld [vmem:[%s10074_s1 + $0x380] sm:$0xff] }
  0xc1   : > { %6536 = vmatprep.subr.mxu0 %v5163_v54  ;;  %6610 = vmatprep.subr.mxu1 %v5214_v58 }
  0xc2   : > { %6412 = vmatmul.mubr.f32.gmra.mxu0 %v7584_v6  ;;  %6611 = vmatpush3.msra.mxu1 %v5214_v58  ;;  %v5212_v6 = vld [vmem:[%s10074_s1 + $0x3d0] sm:$0xff] }
  0xc3   : > { %6492 = vmatmul.mubr.f32.gmra.mxu1 %v7893_v3  ;;  %6414 = vmatprep.mubr.f32.mxu0 %v7590_v8  ;;  %v5160_v8 = vld [vmem:[%s10074_s1 + $0x330] sm:$0xff] }
  0xc4   : > { %6494 = vmatprep.mubr.f32.mxu1 %v7897_v22  ;;  %6537 = vmatpush3.msra.mxu0 %v5163_v54  ;;  %v5170_v3 = vld [vmem:[%s7447_s26 + $0x31] sm:$0xff] }
  0xc5   : > { %6538 = vmatprep.subr.mxu0 %v5162_v60  ;;  %6612 = vmatprep.subr.mxu1 %v5213_v0  ;;  %v5123_v22 = vld [vmem:[%s7447_s26 + $0x38] sm:$0xff] }
  0xc6   : > { %6415 = vmatmul.mubr.f32.gmra.mxu0 %v7606_v12  ;;  %6613 = vmatpush3.msra.mxu1 %v5213_v0  ;;  %v5211_v12 = vld [vmem:[%s10074_s1 + $0x3c8] sm:$0xff]  ;;  %v5261_v54 = vld [vmem:[%s10074_s1 + $0x458] sm:$0xff] }
  0xc7   : > { %6495 = vmatmul.mubr.f32.gmra.mxu1 %v7909_v9  ;;  %6417 = vmatprep.mubr.f32.mxu0 %v7612_v14  ;;  %v5159_v14 = vld [vmem:[%s10074_s1 + $0x328] sm:$0xff]  ;;  %v5171_v9 = vld [vmem:[%s7447_s26 + $0x39] sm:$0xff] }
  0xc8   : > { %6497 = vmatprep.mubr.f32.mxu1 %v7913_v16  ;;  %6539 = vmatpush3.msra.mxu0 %v5162_v60  ;;  %v5124_v16 = vld [vmem:[%s7447_s26 + $0x48] sm:$0xff]  ;;  %v5129_v60 = vld [vmem:[%s7447_s26 + $0x80] sm:$0xff] }
  0xc9   : > { %6540 = vmatprep.subr.mxu0 %v5161_v2  ;;  %6614 = vmatprep.subr.mxu1 %v5212_v6 }
  0xca   : > { %6418 = vmatmul.mubr.f32.gmra.mxu0 %v7628_v18  ;;  %6615 = vmatpush3.msra.mxu1 %v5212_v6  ;;  %v5210_v18 = vld [vmem:[%s10074_s1 + $0x3c0] sm:$0xff] }
  0xcb   : > { %6498 = vmatmul.mubr.f32.gmra.mxu1 %v7925_v15  ;;  %6420 = vmatprep.mubr.f32.mxu0 %v7634_v20  ;;  %v5158_v20 = vld [vmem:[%s10074_s1 + $0x320] sm:$0xff]  ;;  %v5264_v15 = vld [vmem:[%s10074_s1 + $0x470] sm:$0xff] }
  0xcc   : > { %6500 = vmatprep.mubr.f32.mxu1 %v7929_v47  ;;  %6541 = vmatpush3.msra.mxu0 %v5161_v2  ;;  %v5177_v6 = vld [vmem:[%s7447_s26 + $0x81] sm:$0xff] }
  0xcd   : > { %6542 = vmatprep.subr.mxu0 %v5160_v8  ;;  %6616 = vmatprep.subr.mxu1 %v5211_v12 }
  0xce   : > { %6421 = vmatmul.mubr.f32.gmra.mxu0 %v7650_v24  ;;  %6617 = vmatpush3.msra.mxu1 %v5211_v12  ;;  %v5209_v24 = vld [vmem:[%s10074_s1 + $0x3b8] sm:$0xff] }
  0xcf   : > { %6501 = vmatmul.mubr.f32.gmra.mxu1 %v7941_v21  ;;  %6423 = vmatprep.mubr.f32.mxu0 %v7656_v26  ;;  %v5157_v26 = vld [vmem:[%s10074_s1 + $0x318] sm:$0xff] }
  0xd0   : > { %6503 = vmatprep.mubr.f32.mxu1 %v7945_v53  ;;  %6543 = vmatpush3.msra.mxu0 %v5160_v8  ;;  %v5172_v53 = vld [vmem:[%s7447_s26 + $0x49] sm:$0xff] }
  0xd1   : > { %6544 = vmatprep.subr.mxu0 %v5159_v14  ;;  %6618 = vmatprep.subr.mxu1 %v5210_v18  ;;  %v5130_v8 = vld [vmem:[%s7447_s26 + $0x90] sm:$0xff] }
  0xd2   : > { %6424 = vmatmul.mubr.f32.gmra.mxu0 %v7672_v30  ;;  %6619 = vmatpush3.msra.mxu1 %v5210_v18  ;;  %v5208_v30 = vld [vmem:[%s10074_s1 + $0x3b0] sm:$0xff] }
  0xd3   : > { %6504 = vmatmul.mubr.f32.gmra.mxu1 %v7957_v27  ;;  %6426 = vmatprep.mubr.f32.mxu0 %v7678_v32  ;;  %v5156_v32 = vld [vmem:[%s10074_s1 + $0x310] sm:$0xff] }
  0xd4   : > { %6506 = vmatprep.mubr.f32.mxu1 %v7961_v59  ;;  %6545 = vmatpush3.msra.mxu0 %v5159_v14  ;;  %v5125_v59 = vld [vmem:[%s7447_s26 + $0x50] sm:$0xff] }
  0xd5   : > { %6546 = vmatprep.subr.mxu0 %v5158_v20  ;;  %6620 = vmatprep.subr.mxu1 %v5209_v24  ;;  %v5178_v14 = vld [vmem:[%s7447_s26 + $0x91] sm:$0xff] }
  0xd6   : > { %6427 = vmatmul.mubr.f32.gmra.mxu0 %v7694_v36  ;;  %6621 = vmatpush3.msra.mxu1 %v5209_v24  ;;  %v5207_v36 = vld [vmem:[%s10074_s1 + $0x3a8] sm:$0xff]  ;;  %v5260_v24 = vld [vmem:[%s10074_s1 + $0x450] sm:$0xff] }
  0xd7   : > { %6507 = vmatmul.mubr.f32.gmra.mxu1 %v7973_v33  ;;  %6429 = vmatprep.mubr.f32.mxu0 %v7700_v40  ;;  %v5155_v40 = vld [vmem:[%s10074_s1 + $0x308] sm:$0xff] }
  0xd8   : > { %6509 = vmatprep.mubr.f32.mxu1 %v7977_v1  ;;  %6547 = vmatpush3.msra.mxu0 %v5158_v20  ;;  %v5263_v33 = vld [vmem:[%s10074_s1 + $0x468] sm:$0xff] }
  0xd9   : > { %6548 = vmatprep.subr.mxu0 %v5157_v26  ;;  %6622 = vmatprep.subr.mxu1 %v5208_v30 }
  0xda   : > { %6430 = vmatmul.mubr.f32.gmra.mxu0 %v7716_v56  ;;  %6623 = vmatpush3.msra.mxu1 %v5208_v30  ;;  %v5206_v56 = vld [vmem:[%s10074_s1 + $0x3a0] sm:$0xff]  ;;  %v5131_v30 = vld [vmem:[%s7447_s26 + $0x98] sm:$0xff] }
  0xdb   : > { %6510 = vmatmul.mubr.f32.gmra.mxu1 %v7989_v45  ;;  %6432 = vmatprep.mubr.f32.mxu0 %v7722_v62  ;;  %v10109_v62 = vld [vmem:[#allocation3_spill] sm:$0xff] }
  0xdc   : > { %6512 = vmatprep.mubr.f32.mxu1 %v7993_v7  ;;  %6549 = vmatpush3.msra.mxu0 %v5157_v26  ;;  %v5173_v7 = vld [vmem:[%s7447_s26 + $0x51] sm:$0xff] }
  0xdd   : > { %6550 = vmatprep.subr.mxu0 %v5156_v32  ;;  %6624 = vmatprep.subr.mxu1 %v5207_v36 }
  0xde   : > { %6433 = vmatmul.mubr.f32.gmra.mxu0 %v7738_v10  ;;  %6625 = vmatpush3.msra.mxu1 %v5207_v36  ;;  %v10110_v10 = vld [vmem:[#allocation4_spill] sm:$0xff] }
  0xdf   : > { %6513 = vmatmul.mubr.f32.gmra.mxu1 %v8005_v63  ;;  %6435 = vmatprep.mubr.f32.mxu0 %v10109_v62  ;;  %v5126_v63 = vld [vmem:[%s7447_s26 + $0x60] sm:$0xff] }
  0xe0   : > { %6515 = vmatprep.mubr.f32.mxu1 %v8009_v13  ;;  %6551 = vmatpush3.msra.mxu0 %v5156_v32 }
  0xe1   : > { %6552 = vmatprep.subr.mxu0 %v5155_v40  ;;  %6626 = vmatprep.subr.mxu1 %v5206_v56 }
  0xe2   : > { %6436 = vmatmul.mubr.f32.gmra.mxu0 %v10110_v10  ;;  %6627 = vmatpush3.msra.mxu1 %v5206_v56  ;;  %v5132_v56 = vld [vmem:[%s7447_s26 + $0xa8] sm:$0xff] }
  0xe3   : > { %6516 = vmatmul.mubr.f32.gmra.mxu1 %v8021_v17  ;;  %6438 = vmatprep.mubr.f32.mxu0 %v10111_v38  ;;  %v5174_v17 = vld [vmem:[%s7447_s26 + $0x61] sm:$0xff]  ;;  %v5180_v10 = vld [vmem:[%s7447_s26 + $0xa9] sm:$0xff] }
  0xe4   : > { %6518 = vmatprep.mubr.f32.mxu1 %v8025_v19  ;;  %6553 = vmatpush3.msra.mxu0 %v5155_v40  ;;  %v5179_v40 = vld [vmem:[%s7447_s26 + $0x99] sm:$0xff]  ;;  %v5259_v38 = vld [vmem:[%s10074_s1 + $0x448] sm:$0xff] }
  0xe5   : > { %6628 = vmatprep.subr.mxu1 %v5205_v50  ;;  %6554 = vmatprep.subr.mxu0 %v5154_v23 }
  0xe6   : > { %6439 = vmatmul.mubr.f32.gmra.mxu0 %v7782_v4  ;;  %6629 = vmatpush3.msra.mxu1 %v5205_v50  ;;  %v5122_v4 = vld [vmem:[%s7447_s26 + $0x30] sm:$0xff] }
  0xe7   : > { %6519 = vmatmul.mubr.f32.gmra.mxu1 %v8037_v29  ;;  %6441 = vmatprep.mubr.f32.mxu0 %v8197_v28 }
  0xe8   : > { %6630 = vmatprep.subr.mxu1 %v5204_v44  ;;  %6521 = vmatprep.mubr.f32.mxu1 %v8203_v49 }
  0xe9   : > { %6555 = vmatpush3.msra.mxu0 %v5154_v23  ;;  %6631 = vmatpush3.msra.mxu1 %v5204_v44 }
  0xea   : > { %6442 = vmatmul.mubr.f32.gmra.mxu0 %v8209_v51  ;;  %6632 = vmatprep.subr.mxu1 %v5203_v55 }
  0xeb   : > { %6522 = vmatmul.mubr.f32.gmra.mxu1 %v8216_v42  ;;  %6556 = vmatprep.mubr.f32.mxu0 %v5122_v4 }
  0xec   : > { %6633 = vmatpush3.msra.mxu1 %v5203_v55  ;;  %6684 = vmatprep.subr.mxu0 %v5265_v61  ;;  %v5133_v55 = vld [vmem:[%s7447_s26 + $0xb0] sm:$0xff] }
  0xed   : > { %6634 = vmatprep.subr.mxu1 %v5202_v34  ;;  %6636 = vmatprep.mubr.f32.mxu1 %v5170_v3  ;;  %v6078_v47 = vpop.f32.mrf.mxu0  ;;  %v5134_v3 = vld [vmem:[%s7447_s26 + $0xc0] sm:$0xff] }
  0xee   : > { %v6158_v21 = vpop.f32.mrf.mxu1  ;;  %6557 = vmatmul.mubr.f32.vlgmr.msra.gmra.mxu0 %v5123_v22  ;;  %6635 = vmatpush3.msra.mxu1 %v5202_v34  ;;  %v5181_v34 = vld [vmem:[%s7447_s26 + $0xb1] sm:$0xff] }
  0xef   : > { %v8235_v27 = vadd.f32 %v6158_v21, %v6078_v47  ;;  %6685 = vmatpush3.msra.mxu0 %v5265_v61  ;;  %6637 = vmatmul.mubr.f32.vlgmr.msra.gmra.mxu1 %v5171_v9  ;;  %v438_v1 = vpop.f32.mrf.mxu0  ;;  %v5182_v9 = vld [vmem:[%s7447_s26 + $0xc1] sm:$0xff] }
  0xf0   : > { %v663_v45 = vpop.f32.mrf.mxu1  ;;  %6559 = vmatprep.mubr.f32.mxu0 %v5124_v16  ;;  %6686 = vmatprep.subr.mxu0 %v5264_v15  ;;  %v5258_v47 = vld [vmem:[%s10074_s1 + $0x440] sm:$0xff] }
  0xf1   : > { %v8243_v13 = vadd.f32 %v663_v45, %v438_v1  ;;  %6639 = vmatprep.mubr.f32.mxu1 %v5172_v53  ;;  %6687 = vmatpush3.msra.mxu0 %v5264_v15  ;;  %v6081_v19 = vpop.f32.mrf.mxu0  ;;  %v5135_v53 = vld [vmem:[%s7447_s26 + $0xc8] sm:$0xff]  ;;  %v5136_v45 = vld [vmem:[%s7447_s26 + $0xd8] sm:$0xff] }
  0xf2   : > { %v6161_v29 = vpop.f32.mrf.mxu1  ;;  %6560 = vmatmul.mubr.f32.gmra.mxu0 %v5125_v59  ;;  %6688 = vmatprep.subr.mxu0 %v5263_v33  ;;  %v5183_v1 = vld [vmem:[%s7447_s26 + $0xc9] sm:$0xff] }
  0xf3   : > { %v8249_v11 = vadd.f32 %v6161_v29, %v6081_v19  ;;  %6640 = vmatmul.mubr.f32.gmra.mxu1 %v5173_v7  ;;  %6562 = vmatprep.mubr.f32.mxu0 %v5126_v63  ;;  %v448_v31 = vpop.f32.mrf.mxu0  ;;  %v5184_v63 = vld [vmem:[%s7447_s26 + $0xd9] sm:$0xff] }
  0xf4   : > { %v673_v39 = vpop.f32.mrf.mxu1  ;;  %6642 = vmatprep.mubr.f32.mxu1 %v5174_v17  ;;  %6689 = vmatpush3.msra.mxu0 %v5263_v33  ;;  %v5257_v29 = vld [vmem:[%s10074_s1 + $0x438] sm:$0xff] }
  0xf5   : > { %v8254_v43 = vadd.f32 %v673_v39, %v448_v31  ;;  %6690 = vmatprep.subr.mxu0 %v5262_v35 }
  0xf6   : > { %v6084_v48 = vpop.f32.mrf.mxu0  ;;  %v6164_v52 = vpop.f32.mrf.mxu1  ;;  %6563 = vmatmul.mubr.f32.gmra.mxu0 %v5127_v5  ;;  %v5137_v5 = vld [vmem:[%s7447_s26 + $0xe0] sm:$0xff] }
  0xf7   : > { %v8260_v58 = vadd.f32 %v6164_v52, %v6084_v48  ;;  %6643 = vmatmul.mubr.f32.gmra.mxu1 %v5175_v37  ;;  %6565 = vmatprep.mubr.f32.mxu0 %v5128_v41  ;;  %v5185_v37 = vld [vmem:[%s7447_s26 + $0xe1] sm:$0xff]  ;;  %v5138_v41 = vld [vmem:[%s7447_s26 + $0xf0] sm:$0xff] }
  0xf8   : > { %v458_v0 = vpop.f32.mrf.mxu0  ;;  %v683_v2 = vpop.f32.mrf.mxu1  ;;  %6645 = vmatprep.mubr.f32.mxu1 %v5176_v46  ;;  %6691 = vmatpush3.msra.mxu0 %v5262_v35  ;;  %v5186_v48 = vld [vmem:[%s7447_s26 + $0xf1] sm:$0xff] }
  0xf9   : > { %v8265_v12 = vadd.f32 %v683_v2, %v458_v0  ;;  %6692 = vmatprep.subr.mxu0 %v5261_v54  ;;  %v5139_v2 = vld [vmem:[%s7447_s26 + $0xf8] sm:$0xff] }
  0xfa   : > { %v6087_v18 = vpop.f32.mrf.mxu0  ;;  %v6167_v20 = vpop.f32.mrf.mxu1  ;;  %6566 = vmatmul.mubr.f32.gmra.mxu0 %v5129_v60  ;;  %v5256_v60 = vld [vmem:[%s10074_s1 + $0x430] sm:$0xff] }
  0xfb   : > { %v8271_v26 = vadd.f32 %v6167_v20, %v6087_v18  ;;  %6646 = vmatmul.mubr.f32.gmra.mxu1 %v5177_v6  ;;  %6568 = vmatprep.mubr.f32.mxu0 %v5130_v8  ;;  %v5140_v18 = vld [vmem:[%s7447_s26 + $0x108] sm:$0xff] }
  0xfc   : > { %v468_v32 = vpop.f32.mrf.mxu0  ;;  %v693_v36 = vpop.f32.mrf.mxu1  ;;  %6648 = vmatprep.mubr.f32.mxu1 %v5178_v14  ;;  %6693 = vmatpush3.msra.mxu0 %v5261_v54  ;;  %v5187_v14 = vld [vmem:[%s7447_s26 + $0xf9] sm:$0xff] }
  0xfd   : > { %v8276_v62 = vadd.f32 %v693_v36, %v468_v32  ;;  %6694 = vmatprep.subr.mxu0 %v5260_v24  ;;  %v5255_v36 = vld [vmem:[%s10074_s1 + $0x428] sm:$0xff] }
  0xfe   : > { %v6090_v50 = vpop.f32.mrf.mxu0  ;;  %v6170_v23 = vpop.f32.mrf.mxu1  ;;  %6569 = vmatmul.mubr.f32.gmra.mxu0 %v5131_v30 }
  0xff   : > { %v8282_v44 = vadd.f32 %v6170_v23, %v6090_v50  ;;  %6649 = vmatmul.mubr.f32.gmra.mxu1 %v5179_v40  ;;  %6571 = vmatprep.mubr.f32.mxu0 %v5132_v56  ;;  %v5141_v56 = vld [vmem:[%s7447_s26 + $0x110] sm:$0xff] }
 0x100   : > { %v478_v4 = vpop.f32.mrf.mxu0  ;;  %v703_v61 = vpop.f32.mrf.mxu1  ;;  %6651 = vmatprep.mubr.f32.mxu1 %v5180_v10  ;;  %6695 = vmatpush3.msra.mxu0 %v5260_v24  ;;  %v5188_v24 = vld [vmem:[%s7447_s26 + $0x109] sm:$0xff]  ;;  %v5189_v23 = vld [vmem:[%s7447_s26 + $0x111] sm:$0xff] }
 0x101   : > { %v8287_v22 = vadd.f32 %v703_v61, %v478_v4  ;;  %6696 = vmatprep.subr.mxu0 %v5259_v38 }
 0x102   : > { %v6093_v16 = vpop.f32.mrf.mxu0  ;;  %v6173_v15 = vpop.f32.mrf.mxu1  ;;  %6572 = vmatmul.mubr.f32.gmra.mxu0 %v5133_v55  ;;  %v5190_v55 = vld [vmem:[%s7447_s26 + $0x121] sm:$0xff] }
 0x103   : > { %v8293_v21 = vadd.f32 %v6173_v15, %v6093_v16  ;;  %6652 = vmatmul.mubr.f32.gmra.mxu1 %v5181_v34  ;;  %6574 = vmatprep.mubr.f32.mxu0 %v5134_v3  ;;  %v5254_v34 = vld [vmem:[%s10074_s1 + $0x420] sm:$0xff] }
 0x104   : > { %v488_v59 = vpop.f32.mrf.mxu0  ;;  %v713_v33 = vpop.f32.mrf.mxu1  ;;  %6654 = vmatprep.mubr.f32.mxu1 %v5182_v9  ;;  %6697 = vmatpush3.msra.mxu0 %v5259_v38  ;;  %v5142_v38 = vld [vmem:[%s7447_s26 + $0x120] sm:$0xff]  ;;  %v5143_v9 = vld [vmem:[%s7447_s26 + $0x128] sm:$0xff] }
 0x105   : > { %v8298_v7 = vadd.f32 %v713_v33, %v488_v59  ;;  %6698 = vmatprep.subr.mxu0 %v5258_v47  ;;  %v5192_v59 = vld [vmem:[%s7447_s26 + $0x139] sm:$0xff] }
 0x106   : > { %v6096_v17 = vpop.f32.mrf.mxu0  ;;  %v6176_v19 = vpop.f32.mrf.mxu1  ;;  %6575 = vmatmul.mubr.f32.gmra.mxu0 %v5135_v53  ;;  %v5144_v53 = vld [vmem:[%s7447_s26 + $0x138] sm:$0xff] }
 0x107   : > { %v8304_v35 = vadd.f32 %v6176_v19, %v6096_v17  ;;  %6655 = vmatmul.mubr.f32.gmra.mxu1 %v5183_v1  ;;  %6577 = vmatprep.mubr.f32.mxu0 %v5136_v45  ;;  %v5253_v45 = vld [vmem:[%s10074_s1 + $0x418] sm:$0xff]  ;;  %v5145_v17 = vld [vmem:[%s7447_s26 + $0x140] sm:$0xff] }
 0x108   : > { %v498_v31 = vpop.f32.mrf.mxu0  ;;  %v723_v39 = vpop.f32.mrf.mxu1  ;;  %6657 = vmatprep.mubr.f32.mxu1 %v5184_v63  ;;  %6699 = vmatpush3.msra.mxu0 %v5258_v47  ;;  %v5191_v47 = vld [vmem:[%s7447_s26 + $0x129] sm:$0xff] }
 0x109   : > { %v8309_v46 = vadd.f32 %v723_v39, %v498_v31  ;;  %6700 = vmatprep.subr.mxu0 %v5257_v29  ;;  %v5146_v31 = vld [vmem:[%s7447_s26 + $0x150] sm:$0xff] }
 0x10a   : > { %v6099_v52 = vpop.f32.mrf.mxu0  ;;  %v6179_v54 = vpop.f32.mrf.mxu1  ;;  %6578 = vmatmul.mubr.f32.gmra.mxu0 %v5137_v5  ;;  %v5193_v5 = vld [vmem:[%s7447_s26 + $0x141] sm:$0xff]  ;;  %v5194_v39 = vld [vmem:[%s7447_s26 + $0x151] sm:$0xff] }
 0x10b   : > { %v8315_v0 = vadd.f32 %v6179_v54, %v6099_v52  ;;  %6658 = vmatmul.mubr.f32.gmra.mxu1 %v5185_v37  ;;  %6580 = vmatprep.mubr.f32.mxu0 %v5138_v41  ;;  %v5147_v54 = vld [vmem:[%s7447_s26 + $0x158] sm:$0xff] }
 0x10c   : > { %v508_v6 = vpop.f32.mrf.mxu0  ;;  %v733_v8 = vpop.f32.mrf.mxu1  ;;  %6660 = vmatprep.mubr.f32.mxu1 %v5186_v48  ;;  %6701 = vmatpush3.msra.mxu0 %v5257_v29  ;;  %v5252_v48 = vld [vmem:[%s10074_s1 + $0x410] sm:$0xff] }
 0x10d   : > { %v8320_v20 = vadd.f32 %v733_v8, %v508_v6  ;;  %6702 = vmatprep.subr.mxu0 %v5256_v60  ;;  %v5195_v6 = vld [vmem:[%s7447_s26 + $0x159] sm:$0xff]  ;;  %v5148_v8 = vld [vmem:[%s7447_s26 + $0x168] sm:$0xff] }
 0x10e   : > { %v6102_v30 = vpop.f32.mrf.mxu0  ;;  %v6182_v32 = vpop.f32.mrf.mxu1  ;;  %6581 = vmatmul.mubr.f32.gmra.mxu0 %v5139_v2 }
 0x10f   : > { %v8326_v40 = vadd.f32 %v6182_v32, %v6102_v30  ;;  %6661 = vmatmul.mubr.f32.gmra.mxu1 %v5187_v14  ;;  %6583 = vmatprep.mubr.f32.mxu0 %v5140_v18  ;;  %v5196_v14 = vld [vmem:[%s7447_s26 + $0x169] sm:$0xff] }
 0x110   : > { %v8329_v10 = vpop.f32.mrf.mxu0  ;;  %v8331_v50 = vpop.f32.mrf.mxu1  ;;  %6663 = vmatprep.mubr.f32.mxu1 %v5188_v24  ;;  %6703 = vmatpush3.msra.mxu0 %v5256_v60  ;;  %v5251_v30 = vld [vmem:[%s10074_s1 + $0x408] sm:$0xff] }
 0x111   : > { %6704 = vmatprep.subr.mxu0 %v5255_v36 }
 0x112   : > { %v6105_v4 = vpop.f32.mrf.mxu0  ;;  %v6185_v61 = vpop.f32.mrf.mxu1  ;;  %6584 = vmatmul.mubr.f32.gmra.mxu0 %v5141_v56 }
 0x113   : > { %v8339_v3 = vadd.f32 %v6185_v61, %v6105_v4  ;;  %6664 = vmatmul.mubr.f32.gmra.mxu1 %v5189_v23  ;;  %6586 = vmatprep.mubr.f32.mxu0 %v5142_v38  ;;  %v5197_v38 = vld [vmem:[%s7447_s26 + $0x171] sm:$0xff]  ;;  %v5250_v61 = vld [vmem:[%s10074_s1 + $0x400] sm:$0xff] }
 0x114   : > { %v8342_v16 = vpop.f32.mrf.mxu0  ;;  %v8344_v15 = vpop.f32.mrf.mxu1  ;;  %6666 = vmatprep.mubr.f32.mxu1 %v5190_v55  ;;  %6705 = vmatpush3.msra.mxu0 %v5255_v36  ;;  %v5149_v36 = vld [vmem:[%s7447_s26 + $0x170] sm:$0xff] }
 0x115   : > { %6706 = vmatprep.subr.mxu0 %v5254_v34 }
 0x116   : > { %v6108_v33 = vpop.f32.mrf.mxu0  ;;  %v6188_v1 = vpop.f32.mrf.mxu1  ;;  %6587 = vmatmul.mubr.f32.gmra.mxu0 %v5143_v9 }
 0x117   : > { %v8352_v63 = vadd.f32 %v6188_v1, %v6108_v33  ;;  %6667 = vmatmul.mubr.f32.gmra.mxu1 %v5191_v47  ;;  %6589 = vmatprep.mubr.f32.mxu0 %v5144_v53  ;;  %v5152_v53 = vld [vmem:[%s7447_s26 + $0x198] sm:$0xff] }
 0x118   : > { %v8355_v19 = vpop.f32.mrf.mxu0  ;;  %v8357_v29 = vpop.f32.mrf.mxu1  ;;  %6669 = vmatprep.mubr.f32.mxu1 %v5192_v59  ;;  %6707 = vmatpush3.msra.mxu0 %v5254_v34  ;;  %v5200_v59 = vld [vmem:[%s7447_s26 + $0x199] sm:$0xff] }
 0x119   : > { %6708 = vmatprep.subr.mxu0 %v5253_v45 }
 0x11a   : > { %v6111_v37 = vpop.f32.mrf.mxu0  ;;  %v6191_v41 = vpop.f32.mrf.mxu1  ;;  %6590 = vmatmul.mubr.f32.gmra.mxu0 %v5145_v17 }
 0x11b   : > { %v8365_v52 = vadd.f32 %v6191_v41, %v6111_v37  ;;  %6670 = vmatmul.mubr.f32.gmra.mxu1 %v5193_v5  ;;  %6592 = vmatprep.mubr.f32.mxu0 %v5146_v31  ;;  %v5201_v5 = vld [vmem:[%s7447_s26 + $0x1a1] sm:$0xff]  ;;  %v5218_v31 = vld [vmem:[%s7447_s26 + $0x32] sm:$0xff] }
 0x11c   : > { %v8368_v60 = vpop.f32.mrf.mxu0  ;;  %v8370_v2 = vpop.f32.mrf.mxu1  ;;  %6672 = vmatprep.mubr.f32.mxu1 %v5194_v39  ;;  %6709 = vmatpush3.msra.mxu0 %v5253_v45 }
 0x11d   : > { %6710 = vmatprep.subr.mxu0 %v5252_v48 }
 0x11e   : > { %v6114_v18 = vpop.f32.mrf.mxu0  ;;  %v6194_v24 = vpop.f32.mrf.mxu1  ;;  %6593 = vmatmul.mubr.f32.gmra.mxu0 %v5147_v54 }
 0x11f   : > { %v8378_v32 = vadd.f32 %v6194_v24, %v6114_v18  ;;  %6673 = vmatmul.mubr.f32.gmra.mxu1 %v5195_v6  ;;  %6595 = vmatprep.mubr.f32.mxu0 %v5148_v8  ;;  %v5221_v18 = vld [vmem:[%s7447_s26 + $0x52] sm:$0xff] }
 0x120   : > { %v8381_v56 = vpop.f32.mrf.mxu0  ;;  %v8383_v23 = vpop.f32.mrf.mxu1  ;;  %6675 = vmatprep.mubr.f32.mxu1 %v5196_v14  ;;  %6711 = vmatpush3.msra.mxu0 %v5252_v48  ;;  %v5220_v48 = vld [vmem:[%s7447_s26 + $0x4a] sm:$0xff] }
 0x121   : > { %6712 = vmatprep.subr.mxu0 %v5251_v30 }
 0x122   : > { %v6117_v55 = vpop.f32.mrf.mxu0  ;;  %v6197_v4 = vpop.f32.mrf.mxu1  ;;  %6596 = vmatmul.mubr.f32.gmra.mxu0 %v5149_v36 }
 0x123   : > { %v8389_v34 = vadd.f32 %v6197_v4, %v6117_v55  ;;  %6676 = vmatmul.mubr.f32.gmra.mxu1 %v5197_v38  ;;  %6598 = vmatprep.mubr.f32.mxu0 %v8031_v57  ;;  %v5153_v57 = vld [vmem:[%s7447_s26 + $0x1a0] sm:$0xff] }
 0x124   : > { %v8392_v9 = vpop.f32.mrf.mxu0  ;;  %v8394_v47 = vpop.f32.mrf.mxu1  ;;  %6678 = vmatprep.mubr.f32.mxu1 %v8197_v28  ;;  %6713 = vmatpush3.msra.mxu0 %v5251_v30  ;;  %v5222_v30 = vld [vmem:[%s7447_s26 + $0x62] sm:$0xff] }
 0x125   : > { %10112 = vst [vmem:[#allocation3_spill] sm:$0xff] %v8394_v47  ;;  %6714 = vmatprep.subr.mxu0 %v5250_v61 }
 0x126   : > { %v6120_v33 = vpop.f32.mrf.mxu0  ;;  %v6200_v1 = vpop.f32.mrf.mxu1  ;;  %6599 = vmatmul.mubr.f32.gmra.mxu0 %v8044_v25 }
 0x127   : > { %v8400_v45 = vadd.f32 %v6200_v1, %v6120_v33  ;;  %6679 = vmatmul.mubr.f32.gmra.mxu1 %v8209_v51  ;;  %6601 = vmatprep.mubr.f32.mxu0 %v5152_v53  ;;  %v5219_v51 = vld [vmem:[%s7447_s26 + $0x3a] sm:$0xff]  ;;  %v5223_v53 = vld [vmem:[%s7447_s26 + $0x6a] sm:$0xff] }
 0x128   : > { %v8404_v17 = vpop.f32.mrf.mxu0  ;;  %v8406_v28 = vpop.f32.mrf.mxu1  ;;  %6681 = vmatprep.mubr.f32.mxu1 %v5200_v59  ;;  %6715 = vmatpush3.msra.mxu0 %v5250_v61  ;;  %v5224_v33 = vld [vmem:[%s7447_s26 + $0x7a] sm:$0xff] }
 0x12a   : > { %v6123_v39 = vpop.f32.mrf.mxu0  ;;  %v6203_v37 = vpop.f32.mrf.mxu1  ;;  %6602 = vmatmul.mubr.f32.gmra.mxu0 %v5153_v57 }
 0x12b   : > { %v8410_v25 = vadd.f32 %v6203_v37, %v6123_v39  ;;  %6682 = vmatmul.mubr.f32.gmra.mxu1 %v5201_v5  ;;  %6716 = vmatprep.mubr.f32.mxu0 %v5218_v31  ;;  %v5225_v39 = vld [vmem:[%s7447_s26 + $0x82] sm:$0xff] }
 0x12c   : > { %v8413_v41 = vpop.f32.mrf.mxu0  ;;  %v8416_v54 = vpop.f32.mrf.mxu1 }
 0x12e   : > { %v6238_v6 = vpop.f32.mrf.mxu0  ;;  %6717 = vmatmul.mubr.f32.vlgmr.msra.gmra.mxu0 %v5219_v51  ;;  %v6318_v14 = vpop.f32.mrf.mxu1  ;;  %v5226_v51 = vld [vmem:[%s7447_s26 + $0x92] sm:$0xff] }
 0x12f   : > { %v1097_v8 = vadd.f32 %v6238_v6, %v8235_v27  ;;  %6719 = vmatprep.mubr.f32.mxu0 %v5220_v48 }
 0x130   : > { %v937_v24 = vpop.f32.mrf.mxu0  ;;  %v8426_v55 = vpop.f32.mrf.mxu1 }
 0x131   : > { %v8422_v36 = vadd.f32 %v937_v24, %v8243_v13  ;;  %v8424_v38 = vadd.f32 %v6318_v14, %v1097_v8 }
 0x132   : > { %v6241_v4 = vpop.f32.mrf.mxu0  ;;  %6720 = vmatmul.mubr.f32.gmra.mxu0 %v5221_v18  ;;  %v5227_v18 = vld [vmem:[%s7447_s26 + $0x9a] sm:$0xff] }
 0x133   : > { %v1099_v61 = vadd.f32 %v6241_v4, %v8249_v11  ;;  %v6321_v27 = vpop.f32.mrf.mxu1  ;;  %6722 = vmatprep.mubr.f32.mxu0 %v5222_v30  ;;  %v5228_v30 = vld [vmem:[%s7447_s26 + $0xaa] sm:$0xff] }
 0x134   : > { %v947_v59 = vpop.f32.mrf.mxu0 }
 0x135   : > { %v8432_v1 = vadd.f32 %v947_v59, %v8254_v43  ;;  %v8434_v13 = vadd.f32 %v6321_v27, %v1099_v61  ;;  %v8436_v57 = vpop.f32.mrf.mxu1  ;;  %v5229_v59 = vld [vmem:[%s7447_s26 + $0xb2] sm:$0xff] }
 0x136   : > { %10114 = vst [vmem:[#allocation5_spill] sm:$0xff] %v8436_v57  ;;  %v6244_v5 = vpop.f32.mrf.mxu0  ;;  %6723 = vmatmul.mubr.f32.gmra.mxu0 %v5223_v53 }
 0x137   : > { %10113 = vst [vmem:[#allocation4_spill] sm:$0xff] %v8432_v1  ;;  %v1101_v31 = vadd.f32 %v6244_v5, %v8260_v58  ;;  %v6324_v11 = vpop.f32.mrf.mxu1  ;;  %6725 = vmatprep.mubr.f32.mxu0 %v5224_v33  ;;  %v5230_v5 = vld [vmem:[%s7447_s26 + $0xc2] sm:$0xff] }
 0x138   : > { %v957_v37 = vpop.f32.mrf.mxu0 }
 0x139   : > { %v8442_v48 = vadd.f32 %v957_v37, %v8265_v12  ;;  %v8444_v43 = vadd.f32 %v6324_v11, %v1101_v31  ;;  %v8446_v6 = vpop.f32.mrf.mxu1 }
 0x13a   : > { %v6247_v8 = vpop.f32.mrf.mxu0  ;;  %6726 = vmatmul.mubr.f32.gmra.mxu0 %v5225_v39 }
 0x13b   : > { %v1103_v14 = vadd.f32 %v6247_v8, %v8271_v26  ;;  %v6327_v58 = vpop.f32.mrf.mxu1  ;;  %6728 = vmatprep.mubr.f32.mxu0 %v5226_v51  ;;  %v5231_v51 = vld [vmem:[%s7447_s26 + $0xca] sm:$0xff] }
 0x13c   : > { %v967_v24 = vpop.f32.mrf.mxu0 }
 0x13d   : > { %v8452_v4 = vadd.f32 %v967_v24, %v8276_v62  ;;  %v8454_v12 = vadd.f32 %v6327_v58, %v1103_v14  ;;  %v8456_v61 = vpop.f32.mrf.mxu1  ;;  %v5232_v14 = vld [vmem:[%s7447_s26 + $0xda] sm:$0xff] }
 0x13e   : > { %10116 = vst [vmem:[#allocation7_spill] sm:$0xff] %v8456_v61  ;;  %v6250_v27 = vpop.f32.mrf.mxu0  ;;  %6729 = vmatmul.mubr.f32.gmra.mxu0 %v5227_v18 }
 0x13f   : > { %10115 = vst [vmem:[#allocation6_spill] sm:$0xff] %v8452_v4  ;;  %v1105_v53 = vadd.f32 %v6250_v27, %v8282_v44  ;;  %v6330_v26 = vpop.f32.mrf.mxu1  ;;  %6731 = vmatprep.mubr.f32.mxu0 %v5228_v30  ;;  %v5233_v27 = vld [vmem:[%s7447_s26 + $0xe2] sm:$0xff] }
 0x140   : > { %v977_v33 = vpop.f32.mrf.mxu0 }
 0x141   : > { %v8462_v31 = vadd.f32 %v977_v33, %v8287_v22  ;;  %v8464_v62 = vadd.f32 %v6330_v26, %v1105_v53  ;;  %v8466_v11 = vpop.f32.mrf.mxu1  ;;  %v5234_v26 = vld [vmem:[%s7447_s26 + $0xf2] sm:$0xff] }
 0x142   : > { %v6253_v39 = vpop.f32.mrf.mxu0  ;;  %6732 = vmatmul.mubr.f32.gmra.mxu0 %v5229_v59 }
 0x143   : > { %v1107_v37 = vadd.f32 %v6253_v39, %v8293_v21  ;;  %v6333_v44 = vpop.f32.mrf.mxu1  ;;  %6734 = vmatprep.mubr.f32.mxu0 %v5230_v5 }
 0x144   : > { %v987_v8 = vpop.f32.mrf.mxu0 }
 0x145   : > { %v8472_v58 = vadd.f32 %v987_v8, %v8298_v7  ;;  %v8474_v22 = vadd.f32 %v6333_v44, %v1107_v37  ;;  %v8476_v18 = vpop.f32.mrf.mxu1  ;;  %v5235_v37 = vld [vmem:[%s7447_s26 + $0xfa] sm:$0xff] }
 0x146   : > { %10118 = vst [vmem:[#allocation9_spill] sm:$0xff] %v8476_v18  ;;  %v6256_v24 = vpop.f32.mrf.mxu0  ;;  %6735 = vmatmul.mubr.f32.gmra.mxu0 %v5231_v51  ;;  %v5236_v51 = vld [vmem:[%s7447_s26 + $0x10a] sm:$0xff]  ;;  %v5241_v18 = vld [vmem:[%s7447_s26 + $0x142] sm:$0xff] }
 0x147   : > { %10117 = vst [vmem:[#allocation8_spill] sm:$0xff] %v8472_v58  ;;  %v1109_v30 = vadd.f32 %v6256_v24, %v8304_v35  ;;  %v6336_v21 = vpop.f32.mrf.mxu1  ;;  %6737 = vmatprep.mubr.f32.mxu0 %v5232_v14 }
 0x148   : > { %v997_v53 = vpop.f32.mrf.mxu0 }
 0x149   : > { %v8482_v59 = vadd.f32 %v997_v53, %v8309_v46  ;;  %v8484_v7 = vadd.f32 %v6336_v21, %v1109_v30  ;;  %v8486_v33 = vpop.f32.mrf.mxu1  ;;  %v5237_v21 = vld [vmem:[%s7447_s26 + $0x112] sm:$0xff]  ;;  %v5238_v53 = vld [vmem:[%s7447_s26 + $0x122] sm:$0xff] }
 0x14a   : > { %v6259_v5 = vpop.f32.mrf.mxu0  ;;  %6738 = vmatmul.mubr.f32.gmra.mxu0 %v5233_v27 }
 0x14b   : > { %v1111_v39 = vadd.f32 %v6259_v5, %v8315_v0  ;;  %v6339_v35 = vpop.f32.mrf.mxu1  ;;  %6740 = vmatprep.mubr.f32.mxu0 %v5234_v26 }
 0x14c   : > { %v1007_v44 = vpop.f32.mrf.mxu0 }
 0x14d   : > { %v8492_v8 = vadd.f32 %v1007_v44, %v8320_v20  ;;  %v8494_v46 = vadd.f32 %v6339_v35, %v1111_v39  ;;  %v8496_v14 = vpop.f32.mrf.mxu1  ;;  %v5240_v44 = vld [vmem:[%s7447_s26 + $0x13a] sm:$0xff] }
 0x14e   : > { %v6262_v24 = vpop.f32.mrf.mxu0  ;;  %6741 = vmatmul.mubr.f32.gmra.mxu0 %v5235_v37  ;;  %v5239_v37 = vld [vmem:[%s7447_s26 + $0x12a] sm:$0xff] }
 0x14f   : > { %v1113_v30 = vadd.f32 %v6262_v24, %v8326_v40  ;;  %v6342_v0 = vpop.f32.mrf.mxu1  ;;  %6743 = vmatprep.mubr.f32.mxu0 %v5236_v51 }
 0x150   : > { %v8500_v27 = vpop.f32.mrf.mxu0 }
 0x151   : > { %v8503_v26 = vadd.f32 %v6342_v0, %v1113_v30  ;;  %v8505_v20 = vpop.f32.mrf.mxu1 }
 0x152   : > { %v6265_v5 = vpop.f32.mrf.mxu0  ;;  %6744 = vmatmul.mubr.f32.gmra.mxu0 %v5237_v21 }
 0x153   : > { %v1115_v39 = vadd.f32 %v6265_v5, %v8339_v3  ;;  %v6345_v35 = vpop.f32.mrf.mxu1  ;;  %6746 = vmatprep.mubr.f32.mxu0 %v5238_v53  ;;  %v5242_v53 = vld [vmem:[%s7447_s26 + $0x152] sm:$0xff] }
 0x154   : > { %v8509_v40 = vpop.f32.mrf.mxu0 }
 0x155   : > { %v8512_v51 = vadd.f32 %v6345_v35, %v1115_v39  ;;  %v8514_v24 = vpop.f32.mrf.mxu1 }
 0x156   : > { %v6268_v30 = vpop.f32.mrf.mxu0  ;;  %6747 = vmatmul.mubr.f32.gmra.mxu0 %v5239_v37  ;;  %v5243_v37 = vld [vmem:[%s7447_s26 + $0x15a] sm:$0xff] }
 0x157   : > { %v1117_v0 = vadd.f32 %v6268_v30, %v8352_v63  ;;  %v6348_v21 = vpop.f32.mrf.mxu1  ;;  %6749 = vmatprep.mubr.f32.mxu0 %v5240_v44  ;;  %v5244_v63 = vld [vmem:[%s7447_s26 + $0x16a] sm:$0xff] }
 0x158   : > { %v8518_v3 = vpop.f32.mrf.mxu0 }
 0x159   : > { %v8521_v5 = vadd.f32 %v6348_v21, %v1117_v0  ;;  %v8523_v58 = vpop.f32.mrf.mxu1 }
 0x15a   : > { %v6271_v39 = vpop.f32.mrf.mxu0  ;;  %6750 = vmatmul.mubr.f32.gmra.mxu0 %v5241_v18  ;;  %v5245_v18 = vld [vmem:[%s7447_s26 + $0x172] sm:$0xff] }
 0x15b   : > { %v1119_v35 = vadd.f32 %v6271_v39, %v8365_v52  ;;  %v6351_v61 = vpop.f32.mrf.mxu1  ;;  %6752 = vmatprep.mubr.f32.mxu0 %v5242_v53 }
 0x15c   : > { %v8527_v4 = vpop.f32.mrf.mxu0 }
 0x15d   : > { %v8530_v44 = vadd.f32 %v6351_v61, %v1119_v35  ;;  %v8532_v30 = vpop.f32.mrf.mxu1 }
 0x15e   : > { %v6274_v0 = vpop.f32.mrf.mxu0  ;;  %6753 = vmatmul.mubr.f32.gmra.mxu0 %v5243_v37 }
 0x15f   : > { %v1121_v21 = vadd.f32 %v6274_v0, %v8378_v32  ;;  %v6354_v57 = vpop.f32.mrf.mxu1  ;;  %6755 = vmatprep.mubr.f32.mxu0 %v5244_v63  ;;  %v5248_v32 = vld [vmem:[%s7447_s26 + $0x19a] sm:$0xff] }
 0x160   : > { %v8536_v1 = vpop.f32.mrf.mxu0 }
 0x161   : > { %v8538_v52 = vadd.f32 %v6354_v57, %v1121_v21  ;;  %v8540_v53 = vpop.f32.mrf.mxu1  ;;  %v804_v57 = vadd.f32 %v8406_v28, %v8404_v17 }
 0x162   : > { %v6277_v39 = vpop.f32.mrf.mxu0  ;;  %6756 = vmatmul.mubr.f32.gmra.mxu0 %v5245_v18 }
 0x163   : > { %10119 = vst [vmem:[#allocation10_spill] sm:$0xff] %v8538_v52  ;;  %v1123_v61 = vadd.f32 %v6277_v39, %v8389_v34  ;;  %v6357_v35 = vpop.f32.mrf.mxu1  ;;  %6758 = vmatprep.mubr.f32.mxu0 %v8203_v49  ;;  %v5249_v34 = vld [vmem:[%s7447_s26 + $0x1a2] sm:$0xff] }
 0x164   : > { %v8544_v37 = vpop.f32.mrf.mxu0 }
 0x165   : > { %10120 = vst [vmem:[#allocation11_spill] sm:$0xff] %v8544_v37  ;;  %v8547_v0 = vadd.f32 %v6357_v35, %v1123_v61  ;;  %v8549_v63 = vpop.f32.mrf.mxu1  ;;  %v814_v35 = vadd.f32 %v8416_v54, %v8413_v41 }
 0x166   : > { %10122 = vst [vmem:[#allocation13_spill] sm:$0xff] %v8549_v63  ;;  %v6280_v47 = vpop.f32.mrf.mxu0  ;;  %6759 = vmatmul.mubr.f32.gmra.mxu0 %v8216_v42 }
 0x167   : > { %10121 = vst [vmem:[#allocation12_spill] sm:$0xff] %v8547_v0  ;;  %v1125_v21 = vadd.f32 %v6280_v47, %v8400_v45  ;;  %v6360_v18 = vpop.f32.mrf.mxu1  ;;  %6761 = vmatprep.mubr.f32.mxu0 %v5248_v32 }
 0x168   : > { %v1077_v39 = vpop.f32.mrf.mxu0 }
 0x169   : > { %v1124_v49 = vadd.f32 %v1077_v39, %v804_v57  ;;  %v8556_v52 = vadd.f32 %v6360_v18, %v1125_v21  ;;  %v1384_v37 = vpop.f32.mrf.mxu1  ;;  %v1403_v57 = vadd.f32 %v8426_v55, %v8422_v36 }
 0x16a   : > { %v6283_v61 = vpop.f32.mrf.mxu0  ;;  %6762 = vmatmul.mubr.f32.gmra.mxu0 %v5249_v34 }
 0x16b   : > { %v1127_v42 = vadd.f32 %v6283_v61, %v8410_v25  ;;  %v8561_v0 = vadd.f32 %v1384_v37, %v1124_v49  ;;  %v6363_v17 = vpop.f32.mrf.mxu1 }
 0x16c   : > { %v1087_v28 = vpop.f32.mrf.mxu0 }
 0x16d   : > { %v1126_v47 = vadd.f32 %v1087_v28, %v814_v35  ;;  %v8563_v45 = vadd.f32 %v6363_v17, %v1127_v42  ;;  %v1394_v32 = vpop.f32.mrf.mxu1 }
 0x16e   : > { %v6398_v63 = vpop.f32.mrf.mxu0 }
 0x16f   : > { %v8567_v21 = vadd.f32 %v1394_v32, %v1126_v47  ;;  %v1710_v18 = vadd.f32 %v6398_v63, %v8424_v38  ;;  %v6478_v34 = vpop.f32.mrf.mxu1  ;;  %v1407_v38 = vadd.f32 %v8446_v6, %v8442_v48 }
 0x170   : > { %v1550_v41 = vpop.f32.mrf.mxu0 }
 0x171   : > { %v1709_v54 = vadd.f32 %v1550_v41, %v1403_v57  ;;  %v8570_v25 = vadd.f32 %v6478_v34, %v1710_v18  ;;  %v1856_v37 = vpop.f32.mrf.mxu1 }
 0x172   : > { %v6401_v39 = vpop.f32.mrf.mxu0 }
 0x173   : > { %v1712_v49 = vadd.f32 %v6401_v39, %v8434_v13  ;;  %v8573_v61 = vadd.f32 %v1856_v37, %v1709_v54  ;;  %v6481_v35 = vpop.f32.mrf.mxu1 }
 0x174   : > { %v8575_v42 = vpop.f32.mrf.mxu0 }
 0x175   : > { %v8577_v17 = vadd.f32 %v6481_v35, %v1712_v49  ;;  %v8579_v36 = vpop.f32.mrf.mxu1 }
 0x176   : > { %v6404_v55 = vpop.f32.mrf.mxu0 }
 0x177   : > { %v1714_v63 = vadd.f32 %v6404_v55, %v8444_v43  ;;  %v6484_v28 = vpop.f32.mrf.mxu1  ;;  %v1411_v43 = vadd.f32 %v8466_v11, %v8462_v31 }
 0x178   : > { %v1570_v47 = vpop.f32.mrf.mxu0 }
 0x179   : > { %v1713_v32 = vadd.f32 %v1570_v47, %v1407_v38  ;;  %v8584_v57 = vadd.f32 %v6484_v28, %v1714_v63  ;;  %v1876_v13 = vpop.f32.mrf.mxu1 }
 0x17a   : > { %v6407_v18 = vpop.f32.mrf.mxu0 }
 0x17b   : > { %v8587_v34 = vadd.f32 %v6407_v18, %v8454_v12  ;;  %v8589_v41 = vadd.f32 %v1876_v13, %v1713_v32  ;;  %v8591_v54 = vpop.f32.mrf.mxu1 }
 0x17c   : > { %v8593_v37 = vpop.f32.mrf.mxu0 }
 0x17d   : > { %v8595_v39 = vpop.f32.mrf.mxu1 }
 0x17e   : > { %v6410_v48 = vpop.f32.mrf.mxu0 }
 0x17f   : > { %v1718_v6 = vadd.f32 %v6410_v48, %v8464_v62  ;;  %v6490_v49 = vpop.f32.mrf.mxu1  ;;  %v1415_v62 = vadd.f32 %v8486_v33, %v8482_v59 }
 0x180   : > { %v1590_v35 = vpop.f32.mrf.mxu0 }
 0x181   : > { %v1717_v55 = vadd.f32 %v1590_v35, %v1411_v43  ;;  %v8600_v38 = vadd.f32 %v6490_v49, %v1718_v6  ;;  %v1896_v12 = vpop.f32.mrf.mxu1 }
 0x182   : > { %v6413_v63 = vpop.f32.mrf.mxu0 }
 0x183   : > { %v8603_v28 = vadd.f32 %v6413_v63, %v8474_v22  ;;  %v8605_v47 = vadd.f32 %v1896_v12, %v1717_v55  ;;  %v8607_v32 = vpop.f32.mrf.mxu1  ;;  %v744_v22 = vadd.f32 %v8331_v50, %v8329_v10  ;;  %v1417_v12 = vadd.f32 %v8496_v14, %v8492_v8 }
 0x184   : > { %v8609_v13 = vpop.f32.mrf.mxu0  ;;  %v754_v10 = vadd.f32 %v8344_v15, %v8342_v16 }
 0x185   : > { %v8611_v18 = vpop.f32.mrf.mxu1  ;;  %v1112_v63 = vadd.f32 %v8500_v27, %v744_v22 }
 0x186   : > { %10123 = vst [vmem:[#allocation14_spill] sm:$0xff] %v8611_v18  ;;  %v6416_v31 = vpop.f32.mrf.mxu0  ;;  %v1114_v14 = vadd.f32 %v8509_v40, %v754_v10 }
 0x187   : > { %v1722_v11 = vadd.f32 %v6416_v31, %v8484_v7  ;;  %v6496_v48 = vpop.f32.mrf.mxu1  ;;  %v1419_v8 = vadd.f32 %v8505_v20, %v1112_v63 }
 0x188   : > { %v1610_v43 = vpop.f32.mrf.mxu0 }
 0x189   : > { %v1721_v6 = vadd.f32 %v1610_v43, %v1415_v62  ;;  %v8618_v49 = vadd.f32 %v6496_v48, %v1722_v11  ;;  %v1916_v35 = vpop.f32.mrf.mxu1  ;;  %v764_v48 = vadd.f32 %v8357_v29, %v8355_v19  ;;  %v774_v19 = vadd.f32 %v8370_v2, %v8368_v60 }
 0x18a   : > { %v6419_v55 = vpop.f32.mrf.mxu0 }
 0x18b   : > { %v8624_v18 = vadd.f32 %v6419_v55, %v8494_v46  ;;  %v8626_v59 = vadd.f32 %v1916_v35, %v1721_v6  ;;  %v8628_v7 = vpop.f32.mrf.mxu1  ;;  %v1421_v6 = vadd.f32 %v8514_v24, %v1114_v14  ;;  %v1116_v35 = vadd.f32 %v8518_v3, %v764_v48  ;;  %v10124_v48 = vld [vmem:[#allocation3_spill] sm:$0xff] }
 0x18c   : > { %v1620_v33 = vpop.f32.mrf.mxu0  ;;  %v1118_v3 = vadd.f32 %v8527_v4, %v774_v19 }
 0x18d   : > { %v8632_v50 = vadd.f32 %v1620_v33, %v1417_v12  ;;  %v8634_v31 = vpop.f32.mrf.mxu1  ;;  %v1423_v24 = vadd.f32 %v8523_v58, %v1116_v35 }
 0x18e   : > { %v6422_v62 = vpop.f32.mrf.mxu0 }
 0x18f   : > { %v1726_v46 = vadd.f32 %v6422_v62, %v8503_v26  ;;  %v6502_v27 = vpop.f32.mrf.mxu1  ;;  %v784_v62 = vadd.f32 %v8383_v23, %v8381_v56  ;;  %v794_v56 = vadd.f32 %v10124_v48, %v8392_v9 }
 0x190   : > { %v1630_v11 = vpop.f32.mrf.mxu0 }
 0x191   : > { %v1725_v43 = vadd.f32 %v1630_v11, %v1419_v8  ;;  %v8641_v22 = vadd.f32 %v6502_v27, %v1726_v46  ;;  %v1936_v16 = vpop.f32.mrf.mxu1  ;;  %v1425_v46 = vadd.f32 %v8532_v30, %v1118_v3  ;;  %v1120_v27 = vadd.f32 %v8536_v1, %v784_v62 }
 0x192   : > { %v6425_v15 = vpop.f32.mrf.mxu0 }
 0x193   : > { %v8646_v20 = vadd.f32 %v6425_v15, %v8512_v51  ;;  %v8648_v40 = vadd.f32 %v1936_v16, %v1725_v43  ;;  %v8650_v26 = vpop.f32.mrf.mxu1  ;;  %v1427_v30 = vadd.f32 %v8540_v53, %v1120_v27  ;;  %v10125_v15 = vld [vmem:[#allocation11_spill] sm:$0xff] }
 0x194   : > { %v1640_v55 = vpop.f32.mrf.mxu0  ;;  %v1122_v1 = vadd.f32 %v10125_v15, %v794_v56 }
 0x195   : > { %v8654_v29 = vadd.f32 %v1640_v55, %v1421_v6  ;;  %v8656_v12 = vpop.f32.mrf.mxu1  ;;  %v10126_v6 = vld [vmem:[#allocation10_spill] sm:$0xff] }
 0x196   : > { %v6428_v63 = vpop.f32.mrf.mxu0 }
 0x197   : > { %v1730_v51 = vadd.f32 %v6428_v63, %v8521_v5  ;;  %v6508_v33 = vpop.f32.mrf.mxu1 }
 0x198   : > { %v1650_v10 = vpop.f32.mrf.mxu0 }
 0x199   : > { %v1729_v8 = vadd.f32 %v1650_v10, %v1423_v24  ;;  %v8663_v14 = vadd.f32 %v6508_v33, %v1730_v51  ;;  %v1956_v60 = vpop.f32.mrf.mxu1  ;;  %v10127_v51 = vld [vmem:[#allocation13_spill] sm:$0xff]  ;;  %v10128_v33 = vld [vmem:[#allocation12_spill] sm:$0xff] }
 0x19a   : > { %v6431_v2 = vpop.f32.mrf.mxu0  ;;  %v1429_v9 = vadd.f32 %v10127_v51, %v1122_v1 }
 0x19b   : > { %v8668_v58 = vadd.f32 %v6431_v2, %v8530_v44  ;;  %v8670_v4 = vadd.f32 %v1956_v60, %v1729_v8  ;;  %v8672_v5 = vpop.f32.mrf.mxu1 }
 0x19c   : > { %v1660_v11 = vpop.f32.mrf.mxu0 }
 0x19d   : > { %v8676_v23 = vadd.f32 %v1660_v11, %v1425_v46  ;;  %v8678_v43 = vpop.f32.mrf.mxu1 }
 0x19e   : > { %v6434_v16 = vpop.f32.mrf.mxu0 }
 0x19f   : > { %v1734_v44 = vadd.f32 %v6434_v16, %v10126_v6  ;;  %v6514_v35 = vpop.f32.mrf.mxu1 }
 0x1a0   : > { %v1670_v55 = vpop.f32.mrf.mxu0 }
 0x1a1   : > { %v1733_v19 = vadd.f32 %v1670_v55, %v1427_v30  ;;  %v8683_v63 = vadd.f32 %v6514_v35, %v1734_v44  ;;  %v1976_v24 = vpop.f32.mrf.mxu1 }
 0x1a2   : > { %v6437_v3 = vpop.f32.mrf.mxu0 }
 0x1a3   : > { %v8687_v10 = vadd.f32 %v6437_v3, %v10128_v33  ;;  %v8689_v62 = vadd.f32 %v1976_v24, %v1733_v19  ;;  %v8691_v8 = vpop.f32.mrf.mxu1 }
 0x1a4   : > { %10130 = vst [vmem:[#allocation11_spill] sm:$0xff] %v8691_v8  ;;  %v1680_v53 = vpop.f32.mrf.mxu0 }
 0x1a5   : > { %10129 = vst [vmem:[#allocation3_spill] sm:$0xff] %v8687_v10  ;;  %v8693_v60 = vadd.f32 %v1680_v53, %v1429_v9  ;;  %v8695_v2 = vpop.f32.mrf.mxu1 }
 0x1a6   : > { %10132 = vst [vmem:[#allocation13_spill] sm:$0xff] %v8695_v2  ;;  %v6440_v46 = vpop.f32.mrf.mxu0  ;;  %v10152_v2 = vld [vmem:[#allocation5_spill] sm:$0xff] }
 0x1a7   : > { %10131 = vst [vmem:[#allocation10_spill] sm:$0xff] %v8693_v60  ;;  %v1738_v27 = vadd.f32 %v6440_v46, %v8556_v52  ;;  %v6520_v11 = vpop.f32.mrf.mxu1 }
 0x1a8   : > { %v1690_v48 = vpop.f32.mrf.mxu0 }
 0x1a9   : > { %v1737_v56 = vadd.f32 %v1690_v48, %v8561_v0  ;;  %v8699_v16 = vadd.f32 %v6520_v11, %v1738_v27  ;;  %v1996_v30 = vpop.f32.mrf.mxu1 }
 0x1aa   : > { %v6443_v15 = vpop.f32.mrf.mxu0 }
 0x1ab   : > { %v1740_v1 = vadd.f32 %v6443_v15, %v8563_v45  ;;  %v8702_v6 = vadd.f32 %v1996_v30, %v1737_v56  ;;  %v6523_v44 = vpop.f32.mrf.mxu1 }
 0x1ac   : > { %v1700_v35 = vpop.f32.mrf.mxu0 }
 0x1ad   : > { %v1739_v55 = vadd.f32 %v1700_v35, %v8567_v21  ;;  %v8705_v19 = vadd.f32 %v6523_v44, %v1740_v1  ;;  %v2006_v24 = vpop.f32.mrf.mxu1 }
 0x1ae   : > { %v6558_v52 = vpop.f32.mrf.mxu0 }
 0x1af   : > { %v8707_v3 = vadd.f32 %v2006_v24, %v1739_v55  ;;  %v8710_v0 = vadd.f32 %v6558_v52, %v8570_v25  ;;  %v8712_v51 = vpop.f32.mrf.mxu1 }
 0x1b0   : > { %10134 = vst [vmem:[#allocation15_spill] sm:$0xff] %v8712_v51  ;;  %v2163_v9 = vpop.f32.mrf.mxu0 }
 0x1b1   : > { %10133 = vst [vmem:[#allocation12_spill] sm:$0xff] %v8710_v0  ;;  %v8715_v45 = vadd.f32 %v2163_v9, %v8573_v61  ;;  %v8717_v33 = vpop.f32.mrf.mxu1 }
 0x1b2   : > { %10136 = vst [vmem:[#allocation17_spill] sm:$0xff] %v8717_v33  ;;  %v6561_v53 = vpop.f32.mrf.mxu0 }
 0x1b3   : > { %10135 = vst [vmem:[#allocation16_spill] sm:$0xff] %v8715_v45  ;;  %v8720_v21 = vadd.f32 %v6561_v53, %v8577_v17  ;;  %v8722_v46 = vpop.f32.mrf.mxu1 }
 0x1b4   : > { %v8724_v27 = vpop.f32.mrf.mxu0 }
 0x1b5   : > { %v8729_v48 = vpop.f32.mrf.mxu1 }
 0x1b6   : > { %v6564_v11 = vpop.f32.mrf.mxu0 }
 0x1b7   : > { %v8727_v25 = vadd.f32 %v6564_v11, %v8584_v57  ;;  %v8736_v15 = vpop.f32.mrf.mxu1 }
 0x1b8   : > { %v2183_v56 = vpop.f32.mrf.mxu0  ;;  %10139 = vst [vmem:[#allocation20_spill] sm:$0xff] %v8736_v15 }
 0x1b9   : > { %10137 = vst [vmem:[#allocation18_spill] sm:$0xff] %v8727_v25  ;;  %v8732_v61 = vadd.f32 %v2183_v56, %v8589_v41  ;;  %v8740_v44 = vpop.f32.mrf.mxu1 }
 0x1ba   : > { %v8734_v30 = vpop.f32.mrf.mxu0  ;;  %10140 = vst [vmem:[#allocation21_spill] sm:$0xff] %v8740_v44 }
 0x1bb   : > { %10138 = vst [vmem:[#allocation19_spill] sm:$0xff] %v8732_v61  ;;  %v8750_v41 = vpop.f32.mrf.mxu1 }
 0x1bc   : > { %v8738_v17 = vpop.f32.mrf.mxu0 }
 0x1bd   : > { %v8754_v53 = vpop.f32.mrf.mxu1 }
 0x1be   : > { %v6570_v1 = vpop.f32.mrf.mxu0 }
 0x1bf   : > { %v8743_v35 = vadd.f32 %v6570_v1, %v8600_v38 }
 0x1c0   : > { %v2203_v57 = vpop.f32.mrf.mxu0 }
 0x1c1   : > { %10141 = vst [vmem:[#allocation22_spill] sm:$0xff] %v8743_v35  ;;  %v8746_v55 = vadd.f32 %v2203_v57, %v8605_v47  ;;  %v8764_v47 = vpop.f32.mrf.mxu1 }
 0x1c2   : > { %v8748_v24 = vpop.f32.mrf.mxu0  ;;  %10144 = vst [vmem:[#allocation25_spill] sm:$0xff] %v8764_v47 }
 0x1c3   : > { %10142 = vst [vmem:[#allocation23_spill] sm:$0xff] %v8746_v55  ;;  %v8768_v35 = vpop.f32.mrf.mxu1 }
 0x1c4   : > { %v8752_v52 = vpop.f32.mrf.mxu0  ;;  %10145 = vst [vmem:[#allocation26_spill] sm:$0xff] %v8768_v35 }
 0x1c5   : > { %v8787_v35 = vpop.f32.mrf.mxu1 }
 0x1c6   : > { %v6576_v9 = vpop.f32.mrf.mxu0 }
 0x1c7   : > { %v8757_v11 = vadd.f32 %v6576_v9, %v8618_v49  ;;  %v5281_v49 = vld [vmem:[%s10076_s3 + $0xf8] sm:$0xff] }
 0x1c8   : > { %v2223_v56 = vpop.f32.mrf.mxu0  ;;  %6764 = vmatprep.subr.mxu1 %v5281_v49 }
 0x1c9   : > { %10143 = vst [vmem:[#allocation24_spill] sm:$0xff] %v8757_v11  ;;  %v8760_v38 = vadd.f32 %v2223_v56, %v8626_v59  ;;  %v5280_v59 = vld [vmem:[%s10076_s3 + $0xf0] sm:$0xff]  ;;  %v7296_v56 = vmov 0.0   ;;  %6765 = vmatpush3.msra.mxu1 %v5281_v49 }
 0x1ca   : > { %v8762_v1 = vpop.f32.mrf.mxu0  ;;  %3333 = vst [vmem:[#allocation2 + $0x30] sm:$0xff] %v7296_v56  ;;  %3334 = vst [vmem:[#allocation2 + $0x38] sm:$0xff] %v7296_v56  ;;  %6766 = vmatprep.subr.mxu1 %v5280_v59 }
 0x1cb   : > { %3327 = vst [vmem:[#allocation2] sm:$0xff] %v7296_v56  ;;  %3328 = vst [vmem:[#allocation2 + $0x8] sm:$0xff] %v7296_v56  ;;  %6767 = vmatpush3.msra.mxu1 %v5280_v59 }
 0x1cc   : > { %v8766_v57 = vpop.f32.mrf.mxu0  ;;  %3329 = vst [vmem:[#allocation2 + $0x10] sm:$0x3] %v7296_v56  ;;  %3330 = vst [vmem:[#allocation2 + $0x18] sm:$0xff] %v7296_v56 }
 0x1cd   : > { %3331 = vst [vmem:[#allocation2 + $0x20] sm:$0xff] %v7296_v56  ;;  %3332 = vst [vmem:[#allocation2 + $0x28] sm:$0x3] %v7296_v56 }
 0x1ce   : > { %v6582_v55 = vpop.f32.mrf.mxu0  ;;  %3335 = vst [vmem:[#allocation2 + $0x40] sm:$0x3] %v7296_v56  ;;  %3336 = vst [vmem:[#allocation2 + $0x48] sm:$0xff] %v7296_v56 }
 0x1cf   : > { %v8771_v44 = vadd.f32 %v6582_v55, %v8641_v22  ;;  %3337 = vst [vmem:[#allocation2 + $0x50] sm:$0xff] %v7296_v56  ;;  %3338 = vst [vmem:[#allocation2 + $0x58] sm:$0x3] %v7296_v56  ;;  %v5279_v55 = vld [vmem:[%s10076_s3 + $0xe8] sm:$0xff] }
 0x1d0   : > { %v2243_v9 = vpop.f32.mrf.mxu0  ;;  %3339 = vst [vmem:[#allocation2 + $0x60] sm:$0xff] %v7296_v56  ;;  %3340 = vst [vmem:[#allocation2 + $0x68] sm:$0xff] %v7296_v56  ;;  %6768 = vmatprep.subr.mxu1 %v5279_v55 }
 0x1d1   : > { %3341 = vst [vmem:[#allocation2 + $0x70] sm:$0x3] %v7296_v56  ;;  %3342 = vst [vmem:[#allocation2 + $0x78] sm:$0xff] %v7296_v56  ;;  %v8780_v22 = vadd.f32 %v2243_v9, %v8648_v40  ;;  %6769 = vmatpush3.msra.mxu1 %v5279_v55 }
 0x1d2   : > { %3343 = vst [vmem:[#allocation2 + $0x80] sm:$0xff] %v7296_v56  ;;  %3344 = vst [vmem:[#allocation2 + $0x88] sm:$0x3] %v7296_v56  ;;  %v8785_v11 = vpop.f32.mrf.mxu0 }
 0x1d3   : > { %3345 = vst [vmem:[#allocation2 + $0x90] sm:$0xff] %v7296_v56  ;;  %3346 = vst [vmem:[#allocation2 + $0x98] sm:$0xff] %v7296_v56 }
 0x1d4   : > { %3347 = vst [vmem:[#allocation2 + $0xa0] sm:$0x3] %v7296_v56  ;;  %3348 = vst [vmem:[#allocation2 + $0xa8] sm:$0xff] %v7296_v56  ;;  %v8789_v47 = vpop.f32.mrf.mxu0 }
 0x1d5   : > { %3349 = vst [vmem:[#allocation2 + $0xb0] sm:$0xff] %v7296_v56  ;;  %3350 = vst [vmem:[#allocation2 + $0xb8] sm:$0x3] %v7296_v56 }
 0x1d6   : > { %3351 = vst [vmem:[#allocation2 + $0xc0] sm:$0xff] %v7296_v56  ;;  %3352 = vst [vmem:[#allocation2 + $0xc8] sm:$0xff] %v7296_v56  ;;  %v6588_v61 = vpop.f32.mrf.mxu0 }
 0x1d7   : > { %3353 = vst [vmem:[#allocation2 + $0xd0] sm:$0x3] %v7296_v56  ;;  %3354 = vst [vmem:[#allocation2 + $0xd8] sm:$0xff] %v7296_v56  ;;  %v8794_v40 = vadd.f32 %v6588_v61, %v8663_v14 }
 0x1d8   : > { %3355 = vst [vmem:[#allocation2 + $0xe0] sm:$0xff] %v7296_v56  ;;  %3356 = vst [vmem:[#allocation2 + $0xe8] sm:$0x3] %v7296_v56  ;;  %v2263_v49 = vpop.f32.mrf.mxu0 }
 0x1d9   : > { %3357 = vst [vmem:[#allocation2 + $0xf0] sm:$0xff] %v7296_v56  ;;  %3358 = vst [vmem:[#allocation2 + $0xf8] sm:$0xff] %v7296_v56  ;;  %v8797_v9 = vadd.f32 %v2263_v49, %v8670_v4 }
 0x1da   : > { %3359 = vst [vmem:[#allocation2 + $0x100] sm:$0x3] %v7296_v56  ;;  %3360 = vst [vmem:[#allocation2 + $0x108] sm:$0xff] %v7296_v56  ;;  %v8799_v15 = vpop.f32.mrf.mxu0 }
 0x1db   : > { %3361 = vst [vmem:[#allocation2 + $0x110] sm:$0xff] %v7296_v56  ;;  %3362 = vst [vmem:[#allocation2 + $0x118] sm:$0x3] %v7296_v56 }
 0x1dc   : > { %3363 = vst [vmem:[#allocation2 + $0x120] sm:$0xff] %v7296_v56  ;;  %3364 = vst [vmem:[#allocation2 + $0x128] sm:$0xff] %v7296_v56  ;;  %v8803_v33 = vpop.f32.mrf.mxu0 }
 0x1dd   : > { %3365 = vst [vmem:[#allocation2 + $0x130] sm:$0x3] %v7296_v56  ;;  %3366 = vst [vmem:[#allocation2 + $0x138] sm:$0xff] %v7296_v56 }
 0x1de   : > { %3367 = vst [vmem:[#allocation2 + $0x140] sm:$0xff] %v7296_v56  ;;  %3368 = vst [vmem:[#allocation2 + $0x148] sm:$0x3] %v7296_v56  ;;  %v6594_v59 = vpop.f32.mrf.mxu0 }
 0x1df   : > { %3369 = vst [vmem:[#allocation2 + $0x150] sm:$0xff] %v7296_v56  ;;  %3370 = vst [vmem:[#allocation2 + $0x158] sm:$0xff] %v7296_v56  ;;  %v8808_v55 = vadd.f32 %v6594_v59, %v8683_v63  ;;  %v2967_v59 = vlaneseq }
 0x1e0   : > { %3371 = vst [vmem:[#allocation2 + $0x160] sm:$0x3] %v7296_v56  ;;  %3372 = vst [vmem:[#allocation2 + $0x168] sm:$0xff] %v7296_v56  ;;  %v2283_v51 = vpop.f32.mrf.mxu0 }
 0x1e1   : > { %3373 = vst [vmem:[#allocation2 + $0x170] sm:$0xff] %v7296_v56  ;;  %3374 = vst [vmem:[#allocation2 + $0x178] sm:$0x3] %v7296_v56  ;;  %v8811_v14 = vadd.f32 %v2283_v51, %v8689_v62 }
 0x1e2   : > { %3375 = vst [vmem:[#allocation2 + $0x180] sm:$0xff] %v7296_v56  ;;  %3376 = vst [vmem:[#allocation2 + $0x188] sm:$0xff] %v7296_v56  ;;  %v8813_v61 = vpop.f32.mrf.mxu0 }
 0x1e3   : > { %3377 = vst [vmem:[#allocation2 + $0x190] sm:$0x3] %v7296_v56  ;;  %v8791_v56 = vpop.f32.mrf.mxu1  ;;  %10147 = vst [vmem:[#allocation28_spill] sm:$0xff] %v8808_v55 }
 0x1e4   : > { %10148 = vst [vmem:[#allocation29_spill] sm:$0xff] %v8811_v14  ;;  %10149 = vst [vmem:[#allocation30_spill] sm:$0xff] %v8813_v61  ;;  %v8817_v49 = vpop.f32.mrf.mxu0 }
 0x1e5   : > { %v8801_v25 = vpop.f32.mrf.mxu1  ;;  %10150 = vst [vmem:[#allocation31_spill] sm:$0xff] %v8817_v49 }
 0x1e6   : > { %10146 = vst [vmem:[#allocation27_spill] sm:$0xff] %v8801_v25  ;;  %v6600_v0 = vpop.f32.mrf.mxu0  ;;  %v10151_v25 = vld [vmem:[#allocation4_spill] sm:$0xff] }
 0x1e7   : > { %v8805_v45 = vpop.f32.mrf.mxu1  ;;  %v1405_v60 = vadd.f32 %v10152_v2, %v10151_v25  ;;  %v8824_v10 = vadd.f32 %v6600_v0, %v8699_v16  ;;  %v8835_v2 = vshrl.u32 %v2967_v59, 7 }
 0x1e8   : > { %v2303_v63 = vpop.f32.mrf.mxu0 }
 0x1e9   : > { %v8815_v4 = vpop.f32.mrf.mxu1  ;;  %v1711_v62 = vadd.f32 %v8575_v42, %v1405_v60  ;;  %v8828_v51 = vadd.f32 %v2303_v63, %v8702_v6  ;;  %10154 = vst [vmem:[#allocation5_spill] sm:$0xff] %v8835_v2  ;;  %v10156_v42 = vld [vmem:[#allocation6_spill] sm:$0xff]  ;;  %v10157_v60 = vld [vmem:[#allocation7_spill] sm:$0xff] }
 0x1ea   : > { %v6603_v14 = vpop.f32.mrf.mxu0  ;;  %v1409_v6 = vadd.f32 %v10157_v60, %v10156_v42 }
 0x1eb   : > { %v8821_v8 = vpop.f32.mrf.mxu1  ;;  %10153 = vst [vmem:[#allocation4_spill] sm:$0xff] %v8828_v51  ;;  %v8833_v49 = vadd.f32 %v6603_v14, %v8705_v19  ;;  %v2017_v25 = vadd.f32 %v8579_v36, %v1711_v62  ;;  %v10086_v19 = vsub.s32 0, %v8835_v2  ;;  %v8855_v36 = vld [vmem:[%s10075_s2] sm:$0x3] }
 0x1ec   : > { %v2313_v55 = vpop.f32.mrf.mxu0  ;;  %v1715_v59 = vadd.f32 %v8593_v37, %v1409_v6  ;;  %10158 = vst [vmem:[#allocation6_spill] sm:$0xff] %v8855_v36  ;;  %v5297_v37 = vld [vmem:[%s10076_s3 + $0x178] sm:$0xff] }
 0x1ed   : > { %v8830_v61 = vpop.f32.mrf.mxu1  ;;  %v8839_v16 = vadd.f32 %v2313_v55, %v8707_v3  ;;  %v2324_v63 = vadd.f32 %v8724_v27, %v2017_v25  ;;  %v2022_v55 = vadd.f32 %v8591_v54, %v8587_v34  ;;  %v2631_v27 = vadd.f32 %v8722_v46, %v8720_v21  ;;  %6852 = vmatprep.subr.mxu0 %v5297_v37  ;;  %v10159_v6 = vld [vmem:[#allocation8_spill] sm:$0xff] }
 0x1ee   : > { %v8841_v0 = vpop.f32.mrf.mxu0  ;;  %v8870_v42 = vrot.slane %v8855_v36, %v10086_v19  ;;  %v2021_v34 = vadd.f32 %v8595_v39, %v1715_v59  ;;  %6853 = vmatpush3.msra.mxu0 %v5297_v37 }
 0x1ef   : > { %10155 = vst [vmem:[#allocation32_spill] sm:$0xff] %v8839_v16  ;;  %v8846_v51 = vpop.f32.mrf.mxu1  ;;  %v2630_v62 = vadd.f32 %v8729_v48, %v2324_v63  ;;  %v2329_v54 = vadd.f32 %v8734_v30, %v2022_v55  ;;  %v5296_v48 = vld [vmem:[%s10076_s3 + $0x170] sm:$0xff]  ;;  %v10160_v63 = vld [vmem:[#allocation9_spill] sm:$0xff]  ;;  %v5295_v30 = vld [vmem:[%s10076_s3 + $0x168] sm:$0xff] }
 0x1f0   : > { %v8849_v14 = vpop.f32.mrf.mxu0  ;;  %v1413_v16 = vadd.f32 %v10160_v63, %v10159_v6  ;;  %6854 = vmatprep.subr.mxu0 %v5296_v48  ;;  %v2328_v19 = vadd.f32 %v8738_v17, %v2021_v34  ;;  %v5276_v63 = vld [vmem:[%s10076_s3 + $0xd0] sm:$0xff] }
 0x1f1   : > { %v8862_v25 = vpop.f32.mrf.mxu1  ;;  %6855 = vmatpush3.msra.mxu0 %v5296_v48  ;;  %v2635_v55 = vadd.f32 %v8750_v41, %v2329_v54  ;;  %v5277_v54 = vld [vmem:[%s10076_s3 + $0xd8] sm:$0xff] }
 0x1f2   : > { %v6721_v3 = vpop.f32.mrf.mxu0  ;;  %v1719_v59 = vadd.f32 %v8609_v13, %v1413_v16  ;;  %6856 = vmatprep.subr.mxu0 %v5295_v30  ;;  %v5294_v13 = vld [vmem:[%s10076_s3 + $0x160] sm:$0xff]  ;;  %v2026_v16 = vadd.f32 %v8607_v32, %v8603_v28  ;;  %v2634_v37 = vadd.f32 %v8754_v53, %v2328_v19  ;;  %v5293_v28 = vld [vmem:[%s10076_s3 + $0x158] sm:$0xff]  ;;  %v10161_v32 = vld [vmem:[#allocation14_spill] sm:$0xff] }
 0x1f3   : > { %v2937_v21 = vadd.f32 %v6721_v3, %v2631_v27  ;;  %v8882_v36 = vpop.f32.mrf.mxu1  ;;  %6857 = vmatpush3.msra.mxu0 %v5295_v30 }
 0x1f4   : > { %v2785_v60 = vpop.f32.mrf.mxu0  ;;  %6858 = vmatprep.subr.mxu0 %v5294_v13  ;;  %v2333_v53 = vadd.f32 %v8748_v24, %v2026_v16  ;;  %v5292_v24 = vld [vmem:[%s10076_s3 + $0x150] sm:$0xff]  ;;  %v5275_v16 = vld [vmem:[%s10076_s3 + $0xc8] sm:$0xff] }
 0x1f5   : > { %v2936_v46 = vadd.f32 %v2785_v60, %v2630_v62  ;;  %v8895_v27 = vadd.f32 %v8870_v42, %v2937_v21  ;;  %v5278_v62 = vld [vmem:[%s10076_s3 + $0xe0] sm:$0xff]  ;;  %v8910_v60 = vpop.f32.mrf.mxu1  ;;  %v2025_v21 = vadd.f32 %v10161_v32, %v1719_v59  ;;  %6859 = vmatpush3.msra.mxu0 %v5294_v13 }
 0x1f6   : > { %v8879_v2 = vpop.f32.mrf.mxu0  ;;  %6770 = vmatprep.subr.mxu1 %v5278_v62  ;;  %6860 = vmatprep.subr.mxu0 %v5293_v28  ;;  %v5290_v32 = vld [vmem:[%s10076_s3 + $0x140] sm:$0xff] }
 0x1f7   : > { %v8885_v39 = vadd.f32 %v8870_v42, %v2936_v46  ;;  %6771 = vmatpush3.msra.mxu1 %v5278_v62  ;;  %v8927_v6 = vmul.f32 %v8895_v27, %v8895_v27  ;;  %6861 = vmatpush3.msra.mxu0 %v5293_v28  ;;  %v2332_v59 = vadd.f32 %v8752_v52, %v2025_v21  ;;  %v5291_v52 = vld [vmem:[%s10076_s3 + $0x148] sm:$0xff] }
 0x1f8   : > { %v8891_v3 = vpop.f32.mrf.mxu0  ;;  %6772 = vmatprep.subr.mxu1 %v5277_v54  ;;  %6862 = vmatprep.subr.mxu0 %v5292_v24 }
 0x1f9   : > { %v8899_v17 = vmul.f32 %v8885_v39, %v8885_v39  ;;  %6773 = vmatpush3.msra.mxu1 %v5277_v54  ;;  %v2030_v54 = vadd.f32 %v8628_v7, %v8624_v18  ;;  %6863 = vmatpush3.msra.mxu0 %v5292_v24  ;;  %v5273_v18 = vld [vmem:[%s10076_s3 + $0xb8] sm:$0xff]  ;;  %v2029_v7 = vadd.f32 %v8634_v31, %v8632_v50 }
 0x1fa   : > { %v6727_v41 = vpop.f32.mrf.mxu0  ;;  %6774 = vmatprep.subr.mxu1 %v5276_v63  ;;  %6864 = vmatprep.subr.mxu0 %v5291_v52  ;;  %v2640_v50 = vadd.f32 %v8805_v45, %v8760_v38 }
 0x1fb   : > { %v2941_v34 = vadd.f32 %v6727_v41, %v2635_v55  ;;  %3039 = vrot.lane.b32.xlu0 %v8899_v17, %s7297_s9  ;;  %v8938_v55 = vpop.f32.mrf.mxu1  ;;  %6775 = vmatpush3.msra.mxu1 %v5276_v63  ;;  %v2337_v63 = vadd.f32 %v8762_v1, %v2030_v54  ;;  %v5288_v1 = vld [vmem:[%s10076_s3 + $0x130] sm:$0xff]  ;;  %v5271_v54 = vld [vmem:[%s10076_s3 + $0xa8] sm:$0xff] }
 0x1fc   : > { %v2805_v19 = vpop.f32.mrf.mxu0  ;;  %6776 = vmatprep.subr.mxu1 %v5275_v16  ;;  %6865 = vmatpush3.msra.mxu0 %v5291_v52  ;;  %v2336_v52 = vadd.f32 %v8766_v57, %v2029_v7  ;;  %v5287_v57 = vld [vmem:[%s10076_s3 + $0x128] sm:$0xff]  ;;  %v5270_v7 = vld [vmem:[%s10076_s3 + $0xa0] sm:$0xff] }
 0x1fd   : > { %v8923_v46 = vadd.f32 %v8870_v42, %v2941_v34  ;;  %v2940_v48 = vadd.f32 %v2805_v19, %v2634_v37  ;;  %v2639_v37 = vadd.f32 %v8787_v35, %v2333_v53  ;;  %6777 = vmatpush3.msra.mxu1 %v5275_v16  ;;  %v5274_v34 = vld [vmem:[%s10076_s3 + $0xc0] sm:$0xff]  ;;  %v2638_v35 = vadd.f32 %v8791_v56, %v2332_v59  ;;  %v8969_v21 = vpop.f32.mrf.mxu1  ;;  %v5289_v56 = vld [vmem:[%s10076_s3 + $0x138] sm:$0xff]  ;;  %v5272_v16 = vld [vmem:[%s10076_s3 + $0xb0] sm:$0xff] }
 0x1fe   : > { %v8935_v30 = vpop.f32.mrf.mxu0  ;;  %6778 = vmatprep.subr.mxu1 %v5274_v34  ;;  %6866 = vmatprep.subr.mxu0 %v5290_v32 }
 0x1ff   : > { %v8941_v62 = vadd.f32 %v8870_v42, %v2940_v48  ;;  %3041 = vrot.lane.b32.xlu0 %v8927_v6, %s7297_s9  ;;  %v8947_v13 = vmul.f32 %v8923_v46, %v8923_v46  ;;  %6779 = vmatpush3.msra.mxu1 %v5274_v34 }
 0x200   : > { %v8952_v41 = vpop.f32.mrf.mxu0  ;;  %6780 = vmatprep.subr.mxu1 %v5273_v18  ;;  %6867 = vmatpush3.msra.mxu0 %v5290_v32 }
 0x201   : > { %3049 = vrot.lane.b32.xlu1 %v8947_v13, %s7297_s9  ;;  %v8973_v19 = vmul.f32 %v8941_v62, %v8941_v62  ;;  %6781 = vmatpush3.msra.mxu1 %v5273_v18 }
 0x202   : > { %v6733_v28 = vpop.f32.mrf.mxu0  ;;  %6868 = vmatprep.subr.mxu0 %v5289_v56  ;;  %6782 = vmatprep.subr.mxu1 %v5272_v16 }
 0x203   : > { %v2945_v53 = vadd.f32 %v6733_v28, %v2639_v37  ;;  %v9000_v37 = vpop.f32.mrf.mxu1  ;;  %6869 = vmatpush3.msra.mxu0 %v5289_v56  ;;  %6783 = vmatpush3.msra.mxu1 %v5272_v16  ;;  %v2643_v28 = vadd.f32 %v8815_v4, %v2337_v63  ;;  %v5286_v4 = vld [vmem:[%s10076_s3 + $0x120] sm:$0xff]  ;;  %v5285_v16 = vld [vmem:[%s10076_s3 + $0x118] sm:$0xff] }
 0x204   : > { %v2825_v48 = vpop.f32.mrf.mxu0  ;;  %6870 = vmatprep.subr.mxu0 %v5288_v1  ;;  %6784 = vmatprep.subr.mxu1 %v5271_v54 }
 0x205   : > { %v8985_v24 = vadd.f32 %v8870_v42, %v2945_v53  ;;  %v2944_v59 = vadd.f32 %v2825_v48, %v2638_v35  ;;  %3047 = vrot.lane.b32.xlu1 %v8973_v19, %s7297_s9  ;;  %v2034_v53 = vadd.f32 %v8650_v26, %v8646_v20  ;;  %6871 = vmatpush3.msra.mxu0 %v5288_v1  ;;  %v9031_v56 = vpop.f32.mrf.mxu1 }
 0x206   : > { %v8991_v31 = vpop.f32.mrf.mxu0  ;;  %v2642_v48 = vadd.f32 %v8821_v8, %v2336_v52  ;;  %6872 = vmatprep.subr.mxu0 %v5287_v57  ;;  %v2033_v20 = vadd.f32 %v8656_v12, %v8654_v29  ;;  %6785 = vmatpush3.msra.mxu1 %v5271_v54  ;;  %v5269_v8 = vld [vmem:[%s10076_s3 + $0x98] sm:$0xff]  ;;  %v2645_v1 = vadd.f32 %v8830_v61, %v8771_v44  ;;  %v5268_v54 = vld [vmem:[%s10076_s3 + $0x90] sm:$0xff] }
 0x207   : > { %v9003_v34 = vadd.f32 %v8870_v42, %v2944_v59  ;;  %v9007_v45 = vmul.f32 %v8985_v24, %v8985_v24  ;;  %v2341_v26 = vadd.f32 %v8785_v11, %v2034_v53  ;;  %6873 = vmatpush3.msra.mxu0 %v5287_v57  ;;  %6786 = vmatprep.subr.mxu1 %v5270_v7  ;;  %v9058_v57 = vpop.f32.mrf.mxu1 }
 0x208   : > { %v2835_v38 = vpop.f32.mrf.mxu0  ;;  %6874 = vmatprep.subr.mxu0 %v5286_v4  ;;  %v2644_v12 = vadd.f32 %v8846_v51, %v8780_v22  ;;  %v2340_v11 = vadd.f32 %v8789_v47, %v2033_v20  ;;  %6787 = vmatpush3.msra.mxu1 %v5270_v7  ;;  %v5284_v47 = vld [vmem:[%s10076_s3 + $0x110] sm:$0xff]  ;;  %v5267_v7 = vld [vmem:[%s10076_s3 + $0x88] sm:$0xff] }
 0x209   : > { %v2946_v32 = vadd.f32 %v2835_v38, %v2640_v50  ;;  %3057 = vrot.lane.b32.xlu1 %v9007_v45, %s7297_s9  ;;  %v9020_v35 = vmul.f32 %v9003_v34, %v9003_v34  ;;  %6875 = vmatpush3.msra.mxu0 %v5286_v4  ;;  %v2647_v22 = vadd.f32 %v8862_v25, %v2341_v26  ;;  %v5283_v25 = vld [vmem:[%s10076_s3 + $0x108] sm:$0xff]  ;;  %v6677_v20 = vpop.f32.mrf.mxu1 }
 0x20a   : > { %v6739_v18 = vpop.f32.mrf.mxu0  ;;  %6788 = vmatprep.subr.mxu1 %v5269_v8  ;;  %6876 = vmatprep.subr.mxu0 %v5285_v16  ;;  %v2038_v4 = vadd.f32 %v8672_v5, %v8668_v58  ;;  %v5282_v58 = vld [vmem:[%s10076_s3 + $0x100] sm:$0xff]  ;;  %v2037_v5 = vadd.f32 %v8678_v43, %v8676_v23 }
 0x20b   : > { %v9034_v63 = vadd.f32 %v8870_v42, %v2946_v32  ;;  %v2949_v59 = vadd.f32 %v6739_v18, %v2643_v28  ;;  %3055 = vrot.lane.b32.xlu0 %v9020_v35, %s7297_s9  ;;  %6789 = vmatpush3.msra.mxu1 %v5269_v8  ;;  %v5266_v8 = vld [vmem:[%s10076_s3 + $0x80] sm:$0xff] }
 0x20c   : > { %v2845_v50 = vpop.f32.mrf.mxu0  ;;  %6877 = vmatpush3.msra.mxu0 %v5285_v16  ;;  %6790 = vmatprep.subr.mxu1 %v5268_v54  ;;  %v2344_v23 = vadd.f32 %v8803_v33, %v2037_v5 }
 0x20d   : > { %10162 = vst [vmem:[#allocation7_spill] sm:$0xff] %v9034_v63  ;;  %v9050_v52 = vadd.f32 %v8870_v42, %v2949_v59  ;;  %v2948_v29 = vadd.f32 %v2845_v50, %v2642_v48  ;;  %6878 = vmatprep.subr.mxu0 %v5284_v47  ;;  %6791 = vmatpush3.msra.mxu1 %v5268_v54 }
 0x20e   : > { %v6742_v38 = vpop.f32.mrf.mxu0  ;;  %v2646_v59 = vadd.f32 %v8882_v36, %v2340_v11  ;;  %6879 = vmatpush3.msra.mxu0 %v5284_v47  ;;  %v2649_v36 = vadd.f32 %v8910_v60, %v8794_v40  ;;  %6792 = vmatprep.subr.mxu1 %v5267_v7  ;;  %v2648_v54 = vadd.f32 %v8938_v55, %v8797_v9  ;;  %v2599_v40 = vpop.f32.mrf.mxu1 }
 0x20f   : > { %v9061_v44 = vadd.f32 %v8870_v42, %v2948_v29  ;;  %v2951_v61 = vadd.f32 %v6742_v38, %v2645_v1  ;;  %v9065_v28 = vmul.f32 %v9050_v52, %v9050_v52  ;;  %6880 = vmatprep.subr.mxu0 %v5283_v25  ;;  %v3446_v1 = vld [vmem:[#allocation2 + $0x1] ss:$2 sm:$0xff]  ;;  %v2345_v29 = vadd.f32 %v8799_v15, %v2038_v4  ;;  %v3689_v38 = vld [vmem:[#allocation2 + $0x2] ss:$2 sm:$0xff] }
 0x210   : > { %v2855_v51 = vpop.f32.mrf.mxu0  ;;  %6793 = vmatpush3.msra.mxu1 %v5267_v7  ;;  %6881 = vmatpush3.msra.mxu0 %v5283_v25  ;;  %v10167_v7 = vld [vmem:[#allocation11_spill] sm:$0xff]  ;;  %v2650_v4 = vadd.f32 %v9000_v37, %v2344_v23 }
 0x211   : > { %v9072_v32 = vadd.f32 %v8870_v42, %v2951_v61  ;;  %v2950_v53 = vadd.f32 %v2855_v51, %v2644_v12  ;;  %3065 = vrot.lane.b32.xlu1 %v9065_v28, %s7297_s9  ;;  %v9078_v18 = vmul.f32 %v9061_v44, %v9061_v44  ;;  %6794 = vmatprep.subr.mxu1 %v5266_v8 }
 0x212   : > { %v6745_v48 = vpop.f32.mrf.mxu0  ;;  %6882 = vmatprep.subr.mxu0 %v5282_v58  ;;  %6795 = vmatpush3.msra.mxu1 %v5266_v8  ;;  %v2651_v9 = vadd.f32 %v8969_v21, %v2345_v29  ;;  %v10170_v8 = vld [vmem:[#allocation13_spill] sm:$0xff] }
 0x213   : > { %10163 = vst [vmem:[#allocation8_spill] sm:$0xff] %v9072_v32  ;;  %v9090_v26 = vadd.f32 %v8870_v42, %v2950_v53  ;;  %v2953_v50 = vadd.f32 %v6745_v48, %v2647_v22  ;;  %3063 = vrot.lane.b32.xlu0 %v9078_v18, %s7297_s9  ;;  %6796 = vmatprep.mubr.f32.mxu1 %v3446_v1  ;;  %v10166_v53 = vld [vmem:[#allocation3_spill] sm:$0xff]  ;;  %v6680_v48 = vpop.f32.mrf.mxu1  ;;  %v10172_v1 = vld [vmem:[#allocation30_spill] sm:$0xff] }
 0x214   : > { %v2865_v16 = vpop.f32.mrf.mxu0  ;;  %6883 = vmatpush3.msra.mxu0 %v5282_v58  ;;  %6884 = vmatprep.mubr.f32.mxu0 %v3689_v38  ;;  %v2042_v25 = vadd.f32 %v10167_v7, %v10166_v53  ;;  %v10173_v38 = vld [vmem:[#allocation29_spill] sm:$0xff]  ;;  %v10176_v53 = vld [vmem:[#allocation15_spill] sm:$0xff] }
 0x215   : > { %10164 = vst [vmem:[#allocation9_spill] sm:$0xff] %v9090_v26  ;;  %v9106_v12 = vadd.f32 %v8870_v42, %v2953_v50  ;;  %v2952_v11 = vadd.f32 %v2865_v16, %v2646_v59  ;;  %v10169_v50 = vld [vmem:[#allocation10_spill] sm:$0xff] }
 0x216   : > { %v6748_v43 = vpop.f32.mrf.mxu0  ;;  %v2041_v58 = vadd.f32 %v10170_v8, %v10169_v50  ;;  %v2349_v29 = vadd.f32 %v10172_v1, %v2042_v25  ;;  %v10178_v8 = vld [vmem:[#allocation16_spill] sm:$0xff] }
 0x217   : > { %v9112_v60 = vadd.f32 %v8870_v42, %v2952_v11  ;;  %v2955_v15 = vadd.f32 %v6748_v43, %v2649_v36  ;;  %v9116_v61 = vmul.f32 %v9106_v12, %v9106_v12  ;;  %v10171_v36 = vld [vmem:[#allocation28_spill] sm:$0xff]  ;;  %v10174_v43 = vld [vmem:[#allocation31_spill] sm:$0xff] }
 0x218   : > { %v2875_v47 = vpop.f32.mrf.mxu0  ;;  %v2653_v16 = vadd.f32 %v9031_v56, %v10171_v36 }
 0x219   : > { %v9120_v33 = vadd.f32 %v8870_v42, %v2955_v15  ;;  %v2954_v55 = vadd.f32 %v2875_v47, %v2648_v54  ;;  %3073 = vrot.lane.b32.xlu1 %v9116_v61, %s7297_s9  ;;  %v9126_v22 = vmul.f32 %v9112_v60, %v9112_v60  ;;  %v2652_v54 = vadd.f32 %v9058_v57, %v10173_v38  ;;  %v2609_v47 = vpop.f32.mrf.mxu1  ;;  %v9176_v38 = vld [vmem:[%s10076_s3 + $0x78] sm:$0xff] }
 0x21a   : > { %v6751_v51 = vpop.f32.mrf.mxu0  ;;  %v2348_v15 = vadd.f32 %v10174_v43, %v2041_v58  ;;  %v10179_v58 = vld [vmem:[#allocation17_spill] sm:$0xff]  ;;  %6808 = vmatprep.subr.mxu1 %v9176_v38 }
 0x21b   : > { %10165 = vst [vmem:[#allocation14_spill] sm:$0xff] %v9120_v33  ;;  %v9132_v21 = vadd.f32 %v8870_v42, %v2954_v55  ;;  %v2957_v59 = vadd.f32 %v6751_v51, %v2651_v9  ;;  %3071 = vrot.lane.b32.xlu0 %v9126_v22, %s7297_s9  ;;  %v10175_v51 = vld [vmem:[#allocation12_spill] sm:$0xff] }
 0x21c   : > { %v2885_v5 = vpop.f32.mrf.mxu0  ;;  %v2629_v7 = vadd.f32 %v10176_v53, %v10175_v51  ;;  %v2654_v1 = vadd.f32 %v2599_v40, %v2348_v15  ;;  %v10182_v40 = vld [vmem:[#allocation20_spill] sm:$0xff]  ;;  %v2657_v15 = vadd.f32 %v6680_v48, %v8824_v10  ;;  %v10183_v53 = vld [vmem:[#allocation19_spill] sm:$0xff] }
 0x21d   : > { %10168 = vst [vmem:[#allocation3_spill] sm:$0xff] %v9132_v21  ;;  %v9142_v11 = vadd.f32 %v8870_v42, %v2957_v59  ;;  %v2956_v37 = vadd.f32 %v2885_v5, %v2650_v4  ;;  %v2655_v4 = vadd.f32 %v6677_v20, %v2349_v29  ;;  %v2628_v5 = vadd.f32 %v10179_v58, %v10178_v8 }
 0x21e   : > { %v6754_v23 = vpop.f32.mrf.mxu0  ;;  %v2935_v36 = vadd.f32 %v8841_v0, %v2629_v7  ;;  %v10181_v0 = vld [vmem:[#allocation18_spill] sm:$0xff]  ;;  %v10184_v7 = vld [vmem:[#allocation21_spill] sm:$0xff] }
 0x21f   : > { %v9148_v9 = vadd.f32 %v8870_v42, %v2956_v37  ;;  %v2959_v55 = vadd.f32 %v6754_v23, %v2653_v16  ;;  %v9152_v56 = vmul.f32 %v9142_v11, %v9142_v11  ;;  %v6683_v37 = vpop.f32.mrf.mxu1  ;;  %v2633_v43 = vadd.f32 %v10182_v40, %v10181_v0 }
 0x220   : > { %v2895_v25 = vpop.f32.mrf.mxu0  ;;  %v9190_v8 = vadd.f32 %v8870_v42, %v2935_v36  ;;  %v10187_v36 = vld [vmem:[#allocation25_spill] sm:$0xff] }
 0x221   : > { %v9157_v59 = vadd.f32 %v8870_v42, %v2959_v55  ;;  %v2958_v57 = vadd.f32 %v2895_v25, %v2652_v54  ;;  %3081 = vrot.lane.b32.xlu1 %v9152_v56, %s7297_s9  ;;  %v9163_v50 = vmul.f32 %v9148_v9, %v9148_v9  ;;  %v2934_v54 = vadd.f32 %v8849_v14, %v2628_v5  ;;  %v2619_v58 = vpop.f32.mrf.mxu1 }
 0x222   : > { %v6757_v16 = vpop.f32.mrf.mxu0  ;;  %v2632_v25 = vadd.f32 %v10184_v7, %v10183_v53  ;;  %v2939_v5 = vadd.f32 %v8879_v2, %v2633_v43  ;;  %v10191_v53 = vld [vmem:[#allocation32_spill] sm:$0xff] }
 0x223   : > { %10177 = vst [vmem:[#allocation11_spill] sm:$0xff] %v9157_v59  ;;  %v9169_v20 = vadd.f32 %v8870_v42, %v2958_v57  ;;  %v2961_v29 = vadd.f32 %v6757_v16, %v2655_v4  ;;  %3079 = vrot.lane.b32.xlu0 %v9163_v50, %s7297_s9  ;;  %v10185_v4 = vld [vmem:[#allocation4_spill] sm:$0xff]  ;;  %v9209_v2 = vadd.f32 %v8870_v42, %v2934_v54 }
 0x224   : > { %v2905_v23 = vpop.f32.mrf.mxu0  ;;  %v2656_v57 = vadd.f32 %v2609_v47, %v10185_v4  ;;  %v10186_v47 = vld [vmem:[#allocation22_spill] sm:$0xff]  ;;  %v2938_v40 = vadd.f32 %v8891_v3, %v2632_v25  ;;  %v2658_v7 = vadd.f32 %v2619_v58, %v10191_v53  ;;  %v9227_v3 = vmul.f32 %v9190_v8, %v9190_v8 }
 0x225   : > { %10180 = vst [vmem:[#allocation10_spill] sm:$0xff] %v9169_v20  ;;  %v9184_v55 = vadd.f32 %v8870_v42, %v2961_v29  ;;  %v2960_v51 = vadd.f32 %v2905_v23, %v2654_v1  ;;  %v9203_v1 = vld [vmem:[%s10076_s3 + $0x278] sm:$0xff]  ;;  %v2637_v29 = vadd.f32 %v10187_v36, %v10186_v47  ;;  %v2659_v23 = vadd.f32 %v6683_v37, %v8833_v49  ;;  %v10189_v49 = vld [vmem:[#allocation23_spill] sm:$0xff]  ;;  %v10190_v37 = vld [vmem:[#allocation26_spill] sm:$0xff] }
 0x226   : > { %v6760_v14 = vpop.f32.mrf.mxu0  ;;  %6940 = vmatprep.subr.mxu0 %v9203_v1  ;;  %v2636_v54 = vadd.f32 %v10190_v37, %v10189_v49  ;;  %v9230_v25 = vadd.f32 %v8870_v42, %v2939_v5  ;;  %v10193_v47 = vld [vmem:[#allocation24_spill] sm:$0xff]  ;;  %v10194_v36 = vld [vmem:[#allocation27_spill] sm:$0xff]  ;;  %v9242_v49 = vmul.f32 %v9209_v2, %v9209_v2  ;;  %v9245_v5 = vadd.f32 %v8870_v42, %v2938_v40 }
 0x227   : > { %v9194_v16 = vadd.f32 %v8870_v42, %v2960_v51  ;;  %v2963_v10 = vadd.f32 %v6760_v14, %v2657_v15  ;;  %v9198_v48 = vmul.f32 %v9184_v55, %v9184_v55  ;;  %v2641_v58 = vadd.f32 %v10194_v36, %v10193_v47 }
 0x228   : > { %v2915_v0 = vpop.f32.mrf.mxu0  ;;  %v9312_v47 = vmul.f32 %v9090_v26, %v9090_v26  ;;  %v9318_v36 = vmul.f32 %v9120_v33, %v9120_v33 }
 0x229   : > { %v9214_v43 = vadd.f32 %v8870_v42, %v2963_v10  ;;  %v2962_v15 = vadd.f32 %v2915_v0, %v2656_v57  ;;  %3089 = vrot.lane.b32.xlu1 %v9198_v48, %s7297_s9  ;;  %v9220_v51 = vmul.f32 %v9194_v16, %v9194_v16  ;;  %v2943_v57 = vadd.f32 %v8935_v30, %v2637_v29 }
 0x22a   : > { %v6763_v4 = vpop.f32.mrf.mxu0  ;;  %v2942_v30 = vadd.f32 %v8952_v41, %v2636_v54  ;;  %v2947_v37 = vadd.f32 %v8991_v31, %v2641_v58  ;;  %v9264_v41 = vmul.f32 %v9230_v25, %v9230_v25  ;;  %v9273_v54 = vmul.f32 %v9245_v5, %v9245_v5 }
 0x22b   : > { %10188 = vst [vmem:[#allocation13_spill] sm:$0xff] %v9214_v43  ;;  %v9234_v14 = vadd.f32 %v8870_v42, %v2962_v15  ;;  %v2965_v10 = vadd.f32 %v6763_v4, %v2659_v23  ;;  %3087 = vrot.lane.b32.xlu0 %v9220_v51, %s7297_s9  ;;  %v9254_v15 = vadd.f32 %v8870_v42, %v2943_v57 }
 0x22c   : > { %v2925_v0 = vpop.f32.mrf.mxu0  ;;  %v9267_v40 = vadd.f32 %v8870_v42, %v2942_v30  ;;  %v9276_v31 = vadd.f32 %v8870_v42, %v2947_v37  ;;  %v9300_v57 = vmul.f32 %v9034_v63, %v9034_v63  ;;  %v9324_v58 = vmul.f32 %v9132_v21, %v9132_v21 }
 0x22d   : > { %10192 = vst [vmem:[#allocation28_spill] sm:$0xff] %v9234_v14  ;;  %v9249_v29 = vadd.f32 %v8870_v42, %v2965_v10  ;;  %v2964_v23 = vadd.f32 %v2925_v0, %v2658_v7  ;;  %3037 = vrot.lane.b32.xlu1 %v9227_v3, %s7297_s9  ;;  %10196 = vst [vmem:[#allocation29_spill] sm:$0xff] %v9254_v15  ;;  %v9282_v7 = vmul.f32 %v9254_v15, %v9254_v15 }
 0x22e   : > { %10198 = vst [vmem:[#allocation12_spill] sm:$0xff] %v9267_v40  ;;  %10199 = vst [vmem:[#allocation15_spill] sm:$0xff] %v9276_v31  ;;  %v9288_v4 = vmul.f32 %v9267_v40, %v9267_v40  ;;  %v9306_v10 = vmul.f32 %v9072_v32, %v9072_v32  ;;  %v9330_v0 = vmul.f32 %v9157_v59, %v9157_v59 }
 0x22f   : > { %10195 = vst [vmem:[#allocation30_spill] sm:$0xff] %v9249_v29  ;;  %v9258_v53 = vadd.f32 %v8870_v42, %v2964_v23  ;;  %3035 = vrot.lane.b32.xlu0 %v9242_v49, %s7297_s9  ;;  %v9294_v42 = vmul.f32 %v9276_v31, %v9276_v31  ;;  %v9336_v30 = vmul.f32 %v9169_v20, %v9169_v20 }
 0x230   : > { %v9342_v23 = vmul.f32 %v9214_v43, %v9214_v43  ;;  %v9348_v37 = vmul.f32 %v9234_v14, %v9234_v14  ;;  %v9354_v20 = vmul.f32 %v9249_v29, %v9249_v29 }
 0x231   : > { %10197 = vst [vmem:[#allocation31_spill] sm:$0xff] %v9258_v53  ;;  %3045 = vrot.lane.b32.xlu1 %v9264_v41, %s7297_s9  ;;  %v9360_v43 = vmul.f32 %v9258_v53, %v9258_v53  ;;  %v10203_v53 = vld [vmem:[#allocation5_spill] sm:$0xff] }
 0x232   : > { %10200 = vst [vmem:[#allocation16_spill] sm:$0xff] %v9348_v37  ;;  %10201 = vst [vmem:[#allocation17_spill] sm:$0xff] %v9354_v20  ;;  %v10105_v15 = vsub.s32 1, %v10203_v53 }
 0x233   : > { %3043 = vrot.lane.b32.xlu0 %v9273_v54, %s7297_s9  ;;  %10202 = vst [vmem:[#allocation18_spill] sm:$0xff] %v9360_v43 }
 0x235   : > { %3053 = vrot.lane.b32.xlu1 %v9282_v7, %s7297_s9 }
 0x237   : > { %3051 = vrot.lane.b32.xlu0 %v9288_v4, %s7297_s9 }
 0x239   : > { %3061 = vrot.lane.b32.xlu1 %v9294_v42, %s7297_s9 }
 0x23b   : > { %3059 = vrot.lane.b32.xlu0 %v9300_v57, %s7297_s9 }
 0x23d   : > { %3069 = vrot.lane.b32.xlu1 %v9306_v10, %s7297_s9 }
 0x23f   : > { %3067 = vrot.lane.b32.xlu0 %v9312_v47, %s7297_s9 }
 0x241   : > { %3077 = vrot.lane.b32.xlu1 %v9318_v36, %s7297_s9 }
 0x243   : > { %3075 = vrot.lane.b32.xlu0 %v9324_v58, %s7297_s9 }
 0x245   : > { %3085 = vrot.lane.b32.xlu1 %v9330_v0, %s7297_s9 }
 0x247   : > { %3083 = vrot.lane.b32.xlu0 %v9336_v30, %s7297_s9 }
 0x249   : > { %3093 = vrot.lane.b32.xlu1 %v9342_v23, %s7297_s9 }
 0x24b   : > { %3091 = vrot.lane.b32.xlu0 %v9348_v37, %s7297_s9 }
 0x24d   : > { %3097 = vrot.lane.b32.xlu1 %v9354_v20, %s7297_s9 }
 0x24f   : > { %3095 = vrot.lane.b32.xlu0 %v9360_v43, %s7297_s9 }
 0x26d   : > { %v3040_v59 = vpop.permute.xlu0 %3039 }
 0x26e   : > { %v3101_v14 = vadd.f32 %v3040_v59, %v8899_v17  ;;  %v10204_v17 = vld [vmem:[#allocation6_spill] sm:$0xff] }
 0x270   : > { %v3133_v21 = vadd.f32 1e-12, %v3101_v14 }
 0x271   : > { %v3042_v33 = vpop.permute.xlu0 %3041 }
 0x272   : > { %7206 = vrsqrt.f32 %v3133_v21  ;;  %v3102_v26 = vadd.f32 %v3042_v33, %v8927_v6  ;;  %v9372_v21 = vrot.slane %v10204_v17, %v10105_v15 }
 0x273   : > { %v3050_v29 = vpop.permute.xlu1 %3049 }
 0x274   : > { %v3134_v32 = vadd.f32 1e-12, %v3102_v26  ;;  %v3106_v63 = vadd.f32 %v3050_v29, %v8947_v13 }
 0x276   : > { %7208 = vrsqrt.f32 %v3134_v32  ;;  %v3138_v31 = vadd.f32 1e-12, %v3106_v63 }
 0x277   : > { %v3048_v40 = vpop.permute.xlu1 %3047 }
 0x278   : > { %7210 = vrsqrt.f32 %v3138_v31  ;;  %v3105_v43 = vadd.f32 %v3048_v40, %v8973_v19 }
 0x27a   : > { %v3137_v20 = vadd.f32 1e-12, %v3105_v43 }
 0x27b   : > { %v3058_v37 = vpop.permute.xlu1 %3057 }
 0x27c   : > { %7212 = vrsqrt.f32 %v3137_v20  ;;  %v3110_v6 = vadd.f32 %v3058_v37, %v9007_v45 }
 0x27d   : > { %v3056_v26 = vpop.permute.xlu0 %3055 }
 0x27e   : > { %v3142_v13 = vadd.f32 1e-12, %v3110_v6  ;;  %v3109_v63 = vadd.f32 %v3056_v26, %v9020_v35 }
 0x27f   : > { %v7207_v32 = vpop.eup %7206 }
 0x280   : > { %v3201_v33 = vmul.f32 %v7207_v32, %v9372_v21  ;;  %7214 = vrsqrt.f32 %v3142_v13  ;;  %v3141_v59 = vadd.f32 1e-12, %v3109_v63 }
 0x282   : > { %v3233_v19 = vadd.f32 1.0, %v3201_v33  ;;  %7216 = vrsqrt.f32 %v3141_v59 }
 0x283   : > { %v7209_v43 = vpop.eup %7208  ;;  %v3066_v14 = vpop.permute.xlu1 %3065 }
 0x284   : > { %v3265_v29 = vmax.f32 %v3233_v19, 0.0  ;;  %v3202_v40 = vmul.f32 %v7209_v43, %v9372_v21  ;;  %v3114_v20 = vadd.f32 %v3066_v14, %v9065_v28 }
 0x285   : > { %v7211_v31 = vpop.eup %7210  ;;  %v3064_v45 = vpop.permute.xlu0 %3063 }
 0x286   : > { %v3297_v37 = vmul.f32 %v3265_v29, %v8885_v39  ;;  %v3234_v17 = vadd.f32 1.0, %v3202_v40  ;;  %v3206_v35 = vmul.f32 %v7211_v31, %v9372_v21  ;;  %v3146_v6 = vadd.f32 1e-12, %v3114_v20 }
 0x287   : > { %v3113_v26 = vadd.f32 %v3064_v45, %v9078_v18 }
 0x288   : > { %3384 = vst [vmem:[#allocation2 + $0x31] sm:$0xff] %v3297_v37  ;;  %v3266_v13 = vmax.f32 %v3234_v17, 0.0  ;;  %v3238_v63 = vadd.f32 1.0, %v3206_v35  ;;  %7218 = vrsqrt.f32 %v3146_v6 }
 0x289   : > { %v7213_v32 = vpop.eup %7212  ;;  %v3145_v33 = vadd.f32 1e-12, %v3113_v26 }
 0x28a   : > { %v3298_v59 = vmul.f32 %v3266_v13, %v8895_v27  ;;  %v3270_v19 = vmax.f32 %v3238_v63, 0.0  ;;  %v3205_v28 = vmul.f32 %v7213_v32, %v9372_v21  ;;  %v3443_v13 = vld [vmem:[%s10076_s3 + $0x70] sm:$0xff] }
 0x28b   : > { %7220 = vrsqrt.f32 %v3145_v33  ;;  %v3074_v43 = vpop.permute.xlu1 %3073 }
 0x28c   : > { %3385 = vst [vmem:[#allocation2 + $0x39] sm:$0xff] %v3298_v59  ;;  %v3302_v39 = vmul.f32 %v3270_v19, %v8923_v46  ;;  %v3237_v14 = vadd.f32 1.0, %v3205_v28  ;;  %v3118_v29 = vadd.f32 %v3074_v43, %v9116_v61 }
 0x28d   : > { %v7215_v18 = vpop.eup %7214  ;;  %v3072_v40 = vpop.permute.xlu0 %3071 }
 0x28e   : > { %3389 = vst [vmem:[#allocation2 + $0x69] sm:$0xff] %v3302_v39  ;;  %v3269_v20 = vmax.f32 %v3237_v14, 0.0  ;;  %v3210_v31 = vmul.f32 %v7215_v18, %v9372_v21  ;;  %v3150_v45 = vadd.f32 1e-12, %v3118_v29  ;;  %v3117_v27 = vadd.f32 %v3072_v40, %v9126_v22  ;;  %v3442_v39 = vld [vmem:[%s10076_s3 + $0x68] sm:$0xff] }
 0x28f   : > { %v7217_v37 = vpop.eup %7216  ;;  %v5327_v14 = vld [vmem:[%s10076_s3 + $0x268] sm:$0xff] }
 0x290   : > { %v3301_v17 = vmul.f32 %v3269_v20, %v8941_v62  ;;  %v3242_v35 = vadd.f32 1.0, %v3210_v31  ;;  %v3209_v6 = vmul.f32 %v7217_v37, %v9372_v21  ;;  %7222 = vrsqrt.f32 %v3150_v45  ;;  %v5328_v62 = vld [vmem:[%s10076_s3 + $0x270] sm:$0xff]  ;;  %v3441_v20 = vld [vmem:[%s10076_s3 + $0x60] sm:$0xff]  ;;  %v3440_v37 = vld [vmem:[%s10076_s3 + $0x58] sm:$0xff] }
 0x291   : > { %v3149_v46 = vadd.f32 1e-12, %v3117_v27 }
 0x292   : > { %3388 = vst [vmem:[#allocation2 + $0x61] sm:$0xff] %v3301_v17  ;;  %v3274_v26 = vmax.f32 %v3242_v35, 0.0  ;;  %v3241_v61 = vadd.f32 1.0, %v3209_v6  ;;  %v5325_v17 = vld [vmem:[%s10076_s3 + $0x258] sm:$0xff] }
 0x293   : > { %7224 = vrsqrt.f32 %v3149_v46  ;;  %v3082_v63 = vpop.permute.xlu1 %3081  ;;  %v3448_v32 = vld [vmem:[#allocation2 + $0x31] ss:$2 sm:$0xff]  ;;  %v3691_v33 = vld [vmem:[#allocation2 + $0x32] ss:$2 sm:$0xff] }
 0x294   : > { %v3306_v22 = vmul.f32 %v3274_v26, %v8985_v24  ;;  %v3273_v59 = vmax.f32 %v3241_v61, 0.0  ;;  %v3122_v19 = vadd.f32 %v3082_v63, %v9152_v56  ;;  %6797 = vmatmul.mubr.f32.vlgmr.msra.gmra.mxu1 %v3448_v32  ;;  %6885 = vmatmul.mubr.f32.vlgmr.msra.gmra.mxu0 %v3691_v33  ;;  %v3439_v61 = vld [vmem:[%s10076_s3 + $0x50] sm:$0xff] }
 0x295   : > { %v7219_v28 = vpop.eup %7218  ;;  %v3080_v43 = vpop.permute.xlu0 %3079  ;;  %6809 = vmatpush3.msra.mxu1 %v9176_v38  ;;  %6941 = vmatpush3.msra.mxu0 %v9203_v1 }
 0x296   : > { %3393 = vst [vmem:[#allocation2 + $0x99] sm:$0xff] %v3306_v22  ;;  %v3305_v24 = vmul.f32 %v3273_v59, %v9003_v34  ;;  %v3214_v56 = vmul.f32 %v7219_v28, %v9372_v21  ;;  %v3154_v29 = vadd.f32 1e-12, %v3122_v19  ;;  %v3121_v18 = vadd.f32 %v3080_v43, %v9163_v50  ;;  %6810 = vmatprep.subr.mxu1 %v3443_v13  ;;  %v5326_v34 = vld [vmem:[%s10076_s3 + $0x260] sm:$0xff]  ;;  %v3438_v22 = vld [vmem:[%s10076_s3 + $0x48] sm:$0xff] }
 0x297   : > { %6942 = vmatprep.subr.mxu0 %v5328_v62  ;;  %6811 = vmatpush3.msra.mxu1 %v3443_v13  ;;  %v5324_v13 = vld [vmem:[%s10076_s3 + $0x250] sm:$0xff] }
 0x298   : > { %6943 = vmatpush3.msra.mxu0 %v5328_v62  ;;  %v7221_v38 = vpop.eup %7220  ;;  %3392 = vst [vmem:[#allocation2 + $0x91] sm:$0xff] %v3305_v24  ;;  %v3246_v40 = vadd.f32 1.0, %v3214_v56  ;;  %7226 = vrsqrt.f32 %v3154_v29  ;;  %v3153_v1 = vadd.f32 1e-12, %v3121_v18  ;;  %6812 = vmatprep.subr.mxu1 %v3442_v39  ;;  %v3437_v18 = vld [vmem:[%s10076_s3 + $0x40] sm:$0xff] }
 0x299   : > { %6944 = vmatprep.subr.mxu0 %v5327_v14  ;;  %v3213_v50 = vmul.f32 %v7221_v38, %v9372_v21  ;;  %v3450_v31 = vld [vmem:[#allocation2 + $0x61] ss:$2 sm:$0xff]  ;;  %v3693_v45 = vld [vmem:[#allocation2 + $0x62] ss:$2 sm:$0xff]  ;;  %6813 = vmatpush3.msra.mxu1 %v3442_v39 }
 0x29a   : > { %6945 = vmatpush3.msra.mxu0 %v5327_v14  ;;  %v3278_v27 = vmax.f32 %v3246_v40, 0.0  ;;  %7228 = vrsqrt.f32 %v3153_v1  ;;  %6799 = vmatprep.mubr.f32.mxu1 %v3450_v31  ;;  %v5323_v39 = vld [vmem:[%s10076_s3 + $0x248] sm:$0xff]  ;;  %v5322_v38 = vld [vmem:[%s10076_s3 + $0x240] sm:$0xff]  ;;  %v5321_v31 = vld [vmem:[%s10076_s3 + $0x238] sm:$0xff] }
 0x29b   : > { %6887 = vmatprep.mubr.f32.mxu0 %v3693_v45  ;;  %v3245_v35 = vadd.f32 1.0, %v3213_v50  ;;  %v3090_v6 = vpop.permute.xlu1 %3089  ;;  %6814 = vmatprep.subr.mxu1 %v3441_v20  ;;  %v3436_v50 = vld [vmem:[%s10076_s3 + $0x38] sm:$0xff] }
 0x29c   : > { %6946 = vmatprep.subr.mxu0 %v5326_v34  ;;  %v3310_v46 = vmul.f32 %v3278_v27, %v9050_v52  ;;  %v3126_v26 = vadd.f32 %v3090_v6, %v9198_v48  ;;  %6815 = vmatpush3.msra.mxu1 %v3441_v20  ;;  %v3435_v6 = vld [vmem:[%s10076_s3 + $0x30] sm:$0xff] }
 0x29d   : > { %6947 = vmatpush3.msra.mxu0 %v5326_v34  ;;  %v7223_v63 = vpop.eup %7222  ;;  %v3277_v32 = vmax.f32 %v3245_v35, 0.0  ;;  %v3088_v33 = vpop.permute.xlu0 %3087  ;;  %6816 = vmatprep.subr.mxu1 %v3440_v37 }
 0x29e   : > { %6948 = vmatprep.subr.mxu0 %v5325_v17  ;;  %3397 = vst [vmem:[#allocation2 + $0xc9] sm:$0xff] %v3310_v46  ;;  %v3218_v52 = vmul.f32 %v7223_v63, %v9372_v21  ;;  %v3158_v62 = vadd.f32 1e-12, %v3126_v26  ;;  %v3125_v48 = vadd.f32 %v3088_v33, %v9220_v51  ;;  %6817 = vmatpush3.msra.mxu1 %v3440_v37  ;;  %v5320_v46 = vld [vmem:[%s10076_s3 + $0x230] sm:$0xff] }
 0x29f   : > { %6949 = vmatpush3.msra.mxu0 %v5325_v17  ;;  %v3309_v59 = vmul.f32 %v3277_v32, %v9061_v44  ;;  %v3038_v19 = vpop.permute.xlu1 %3037  ;;  %v3452_v28 = vld [vmem:[#allocation2 + $0x91] ss:$2 sm:$0xff]  ;;  %v3695_v43 = vld [vmem:[#allocation2 + $0x92] ss:$2 sm:$0xff]  ;;  %6818 = vmatprep.subr.mxu1 %v3439_v61  ;;  %v3434_v32 = vld [vmem:[%s10076_s3 + $0x28] sm:$0xff] }
 0x2a0   : > { %6950 = vmatprep.subr.mxu0 %v5324_v13  ;;  %v7225_v14 = vpop.eup %7224  ;;  %v3250_v24 = vadd.f32 1.0, %v3218_v52  ;;  %7230 = vrsqrt.f32 %v3158_v62  ;;  %v3157_v51 = vadd.f32 1e-12, %v3125_v48  ;;  %v3100_v56 = vadd.f32 %v3038_v19, %v9227_v3  ;;  %6800 = vmatmul.mubr.f32.gmra.mxu1 %v3452_v28  ;;  %v5319_v19 = vld [vmem:[%s10076_s3 + $0x228] sm:$0xff] }
 0x2a1   : > { %6888 = vmatmul.mubr.f32.gmra.mxu0 %v3695_v43  ;;  %3396 = vst [vmem:[#allocation2 + $0xc1] sm:$0xff] %v3309_v59  ;;  %v3217_v44 = vmul.f32 %v7225_v14, %v9372_v21  ;;  %v3036_v29 = vpop.permute.xlu0 %3035  ;;  %6819 = vmatpush3.msra.mxu1 %v3439_v61  ;;  %v3433_v59 = vld [vmem:[%s10076_s3 + $0x20] sm:$0xff] }
 0x2a2   : > { %6951 = vmatpush3.msra.mxu0 %v5324_v13  ;;  %v3282_v40 = vmax.f32 %v3250_v24, 0.0  ;;  %7232 = vrsqrt.f32 %v3157_v51  ;;  %v3132_v1 = vadd.f32 1e-12, %v3100_v56  ;;  %v3099_v3 = vadd.f32 %v3036_v29, %v9242_v49  ;;  %6820 = vmatprep.subr.mxu1 %v3438_v22  ;;  %v3432_v24 = vld [vmem:[%s10076_s3 + $0x18] sm:$0xff]  ;;  %v5318_v51 = vld [vmem:[%s10076_s3 + $0x220] sm:$0xff] }
 0x2a3   : > { %6952 = vmatprep.subr.mxu0 %v5323_v39  ;;  %v3249_v20 = vadd.f32 1.0, %v3217_v44  ;;  %v3046_v34 = vpop.permute.xlu1 %3045  ;;  %6821 = vmatpush3.msra.mxu1 %v3438_v22 }
 0x2a4   : > { %6953 = vmatpush3.msra.mxu0 %v5323_v39  ;;  %v3314_v45 = vmul.f32 %v3282_v40, %v9106_v12  ;;  %7234 = vrsqrt.f32 %v3132_v1  ;;  %v3131_v27 = vadd.f32 1e-12, %v3099_v3  ;;  %v3104_v49 = vadd.f32 %v3046_v34, %v9264_v41  ;;  %6822 = vmatprep.subr.mxu1 %v3437_v18  ;;  %v3431_v40 = vld [vmem:[%s10076_s3 + $0x10] sm:$0xff]  ;;  %v5317_v1 = vld [vmem:[%s10076_s3 + $0x218] sm:$0xff] }
 0x2a5   : > { %6954 = vmatprep.subr.mxu0 %v5322_v38  ;;  %v7227_v37 = vpop.eup %7226  ;;  %v3281_v17 = vmax.f32 %v3249_v20, 0.0  ;;  %v3044_v35 = vpop.permute.xlu0 %3043  ;;  %6823 = vmatpush3.msra.mxu1 %v3437_v18 }
 0x2a6   : > { %6955 = vmatpush3.msra.mxu0 %v5322_v38  ;;  %3401 = vst [vmem:[#allocation2 + $0xf9] sm:$0xff] %v3314_v45  ;;  %v3222_v12 = vmul.f32 %v7227_v37, %v9372_v21  ;;  %7236 = vrsqrt.f32 %v3131_v27  ;;  %v3136_v41 = vadd.f32 1e-12, %v3104_v49  ;;  %v3103_v26 = vadd.f32 %v3044_v35, %v9273_v54  ;;  %6824 = vmatprep.subr.mxu1 %v3436_v50 }
 0x2a7   : > { %6956 = vmatprep.subr.mxu0 %v5321_v31  ;;  %v7229_v61 = vpop.eup %7228  ;;  %v3313_v13 = vmul.f32 %v3281_v17, %v9112_v60  ;;  %v3054_v63 = vpop.permute.xlu1 %3053  ;;  %6825 = vmatpush3.msra.mxu1 %v3436_v50 }
 0x2a8   : > { %6957 = vmatpush3.msra.mxu0 %v5321_v31  ;;  %v3254_v33 = vadd.f32 1.0, %v3222_v12  ;;  %v3221_v52 = vmul.f32 %v7229_v61, %v9372_v21  ;;  %7238 = vrsqrt.f32 %v3136_v41  ;;  %v3135_v62 = vadd.f32 1e-12, %v3103_v26  ;;  %v3454_v48 = vld [vmem:[#allocation2 + $0xc1] ss:$2 sm:$0xff]  ;;  %6826 = vmatprep.subr.mxu1 %v3435_v6 }
 0x2a9   : > { %6958 = vmatprep.subr.mxu0 %v5320_v46  ;;  %3400 = vst [vmem:[#allocation2 + $0xf1] sm:$0xff] %v3313_v13  ;;  %v3108_v54 = vadd.f32 %v3054_v63, %v9282_v7  ;;  %6802 = vmatprep.mubr.f32.mxu1 %v3454_v48  ;;  %v3697_v60 = vld [vmem:[#allocation2 + $0xc2] ss:$2 sm:$0xff]  ;;  %v3052_v22 = vpop.permute.xlu0 %3051 }
 0x2aa   : > { %6827 = vmatpush3.msra.mxu1 %v3435_v6  ;;  %v3286_v28 = vmax.f32 %v3254_v33, 0.0  ;;  %v3253_v43 = vadd.f32 1.0, %v3221_v52  ;;  %7240 = vrsqrt.f32 %v3135_v62  ;;  %6890 = vmatprep.mubr.f32.mxu0 %v3697_v60  ;;  %v3107_v39 = vadd.f32 %v3052_v22, %v9288_v4  ;;  %v3430_v31 = vld [vmem:[%s10076_s3 + $0x8] sm:$0xff] }
 0x2ab   : > { %6828 = vmatprep.subr.mxu1 %v3434_v32  ;;  %v3140_v7 = vadd.f32 1e-12, %v3108_v54  ;;  %v3062_v14 = vpop.permute.xlu1 %3061  ;;  %6959 = vmatpush3.msra.mxu0 %v5320_v46  ;;  %v5315_v61 = vld [vmem:[%s10076_s3 + $0x208] sm:$0xff]  ;;  %v9515_v54 = vld [vmem:[%s10076_s3 + $0x1f8] sm:$0xff] }
 0x2ac   : > { %6829 = vmatpush3.msra.mxu1 %v3434_v32  ;;  %v3318_v56 = vmul.f32 %v3286_v28, %v9142_v11  ;;  %v3285_v44 = vmax.f32 %v3253_v43, 0.0  ;;  %v3139_v29 = vadd.f32 1e-12, %v3107_v39  ;;  %v3112_v18 = vadd.f32 %v3062_v14, %v9294_v42  ;;  %6960 = vmatprep.subr.mxu0 %v5319_v19 }
 0x2ad   : > { %6830 = vmatprep.subr.mxu1 %v3433_v59  ;;  %v7231_v4 = vpop.eup %7230  ;;  %7242 = vrsqrt.f32 %v3140_v7  ;;  %v3060_v38 = vpop.permute.xlu0 %3059  ;;  %6961 = vmatpush3.msra.mxu0 %v5319_v19  ;;  %v9526_v7 = vld [vmem:[%s10076_s3 + $0x378] sm:$0xff] }
 0x2ae   : > { %6831 = vmatpush3.msra.mxu1 %v3433_v59  ;;  %3405 = vst [vmem:[#allocation2 + $0x129] sm:$0xff] %v3318_v56  ;;  %v3317_v11 = vmul.f32 %v3285_v44, %v9148_v9  ;;  %v3226_v42 = vmul.f32 %v7231_v4, %v9372_v21  ;;  %7244 = vrsqrt.f32 %v3139_v29  ;;  %v3144_v3 = vadd.f32 1e-12, %v3112_v18  ;;  %6962 = vmatprep.subr.mxu0 %v5318_v51 }
 0x2af   : > { %6832 = vmatprep.subr.mxu1 %v3432_v24  ;;  %v7233_v20 = vpop.eup %7232  ;;  %v3111_v34 = vadd.f32 %v3060_v38, %v9300_v57  ;;  %v3070_v50 = vpop.permute.xlu1 %3069  ;;  %6963 = vmatpush3.msra.mxu0 %v5318_v51  ;;  %v5316_v57 = vld [vmem:[%s10076_s3 + $0x210] sm:$0xff] }
 0x2b0   : > { %6833 = vmatpush3.msra.mxu1 %v3432_v24  ;;  %3404 = vst [vmem:[#allocation2 + $0x121] sm:$0xff] %v3317_v11  ;;  %v3258_v45 = vadd.f32 1.0, %v3226_v42  ;;  %v3225_v9 = vmul.f32 %v7233_v20, %v9372_v21  ;;  %7246 = vrsqrt.f32 %v3144_v3  ;;  %v3116_v27 = vadd.f32 %v3070_v50, %v9306_v10  ;;  %v3456_v49 = vld [vmem:[#allocation2 + $0xf1] ss:$2 sm:$0xff]  ;;  %v3699_v37 = vld [vmem:[#allocation2 + $0xf2] ss:$2 sm:$0xff]  ;;  %6964 = vmatprep.subr.mxu0 %v5317_v1 }
 0x2b1   : > { %6834 = vmatprep.subr.mxu1 %v3431_v40  ;;  %v7235_v17 = vpop.eup %7234  ;;  %v3143_v35 = vadd.f32 1e-12, %v3111_v34  ;;  %6803 = vmatmul.mubr.f32.gmra.mxu1 %v3456_v49  ;;  %v3068_v6 = vpop.permute.xlu0 %3067  ;;  %v3429_v10 = vld [vmem:[%s10076_s3] sm:$0xff] }
 0x2b2   : > { %6891 = vmatmul.mubr.f32.gmra.mxu0 %v3699_v37  ;;  %v3290_v46 = vmax.f32 %v3258_v45, 0.0  ;;  %v3257_v12 = vadd.f32 1.0, %v3225_v9  ;;  %v3200_v41 = vmul.f32 %v7235_v17, %v9372_v21  ;;  %v3148_v26 = vadd.f32 1e-12, %v3116_v27  ;;  %6835 = vmatpush3.msra.mxu1 %v3431_v40 }
 0x2b3   : > { %6965 = vmatpush3.msra.mxu0 %v5317_v1  ;;  %v7237_v13 = vpop.eup %7236  ;;  %7248 = vrsqrt.f32 %v3143_v35  ;;  %v3115_v63 = vadd.f32 %v3068_v6, %v9312_v47  ;;  %v3078_v32 = vpop.permute.xlu1 %3077  ;;  %6836 = vmatprep.subr.mxu1 %v3430_v31  ;;  %v5314_v47 = vld [vmem:[%s10076_s3 + $0x200] sm:$0xff] }
 0x2b4   : > { %6966 = vmatprep.subr.mxu0 %v5316_v57  ;;  %v3322_v33 = vmul.f32 %v3290_v46, %v9184_v55  ;;  %v3289_v52 = vmax.f32 %v3257_v12, 0.0  ;;  %v3232_v62 = vadd.f32 1.0, %v3200_v41  ;;  %v3199_v48 = vmul.f32 %v7237_v13, %v9372_v21  ;;  %6837 = vmatpush3.msra.mxu1 %v3430_v31  ;;  %v3414_v6 = vld [vmem:[#allocation2] ss:$2 sm:$0xff]  ;;  %v10205_v12 = vld [vmem:[#allocation16_spill] sm:$0xff] }
 0x2b5   : > { %6967 = vmatpush3.msra.mxu0 %v5316_v57  ;;  %v7239_v60 = vpop.eup %7238  ;;  %7250 = vrsqrt.f32 %v3148_v26  ;;  %v3147_v22 = vadd.f32 1e-12, %v3115_v63  ;;  %v3120_v55 = vadd.f32 %v3078_v32, %v9318_v36  ;;  %v3076_v59 = vpop.permute.xlu0 %3075  ;;  %6838 = vmatprep.subr.mxu1 %v3429_v10 }
 0x2b6   : > { %6968 = vmatprep.subr.mxu0 %v5315_v61  ;;  %3409 = vst [vmem:[#allocation2 + $0x159] sm:$0xff] %v3322_v33  ;;  %v3321_v19 = vmul.f32 %v3289_v52, %v9194_v16  ;;  %v3264_v28 = vmax.f32 %v3232_v62, 0.0  ;;  %v3231_v43 = vadd.f32 1.0, %v3199_v48  ;;  %v3204_v39 = vmul.f32 %v7239_v60, %v9372_v21  ;;  %6839 = vmatpush3.msra.mxu1 %v3429_v10 }
 0x2b7   : > { %6969 = vmatpush3.msra.mxu0 %v5315_v61  ;;  %v7241_v14 = vpop.eup %7240  ;;  %7252 = vrsqrt.f32 %v3147_v22  ;;  %v3152_v36 = vadd.f32 1e-12, %v3120_v55  ;;  %v3119_v24 = vadd.f32 %v3076_v59, %v9324_v58  ;;  %v3086_v51 = vpop.permute.xlu1 %3085  ;;  %v3458_v56 = vld [vmem:[#allocation2 + $0x121] ss:$2 sm:$0xff]  ;;  %v3701_v44 = vld [vmem:[#allocation2 + $0x122] ss:$2 sm:$0xff]  ;;  %6896 = vmatprep.subr.mxu1 %v9515_v54 }
 0x2b8   : > { %6970 = vmatprep.subr.mxu0 %v5314_v47  ;;  %3408 = vst [vmem:[#allocation2 + $0x151] sm:$0xff] %v3321_v19  ;;  %v3296_v16 = vmul.f32 %v3264_v28, %v9190_v8  ;;  %v3263_v29 = vmax.f32 %v3231_v43, 0.0  ;;  %v3236_v18 = vadd.f32 1.0, %v3204_v39  ;;  %v3203_v4 = vmul.f32 %v7241_v14, %v9372_v21  ;;  %6805 = vmatprep.mubr.f32.mxu1 %v3458_v56  ;;  %v10208_v22 = vld [vmem:[#allocation12_spill] sm:$0xff]  ;;  %v10209_v28 = vld [vmem:[#allocation18_spill] sm:$0xff] }
 0x2b9   : > { %6893 = vmatprep.mubr.f32.mxu0 %v3701_v44  ;;  %7254 = vrsqrt.f32 %v3152_v36  ;;  %v3151_v38 = vadd.f32 1e-12, %v3119_v24  ;;  %v3124_v40 = vadd.f32 %v3086_v51, %v9330_v0  ;;  %v3084_v58 = vpop.permute.xlu0 %3083  ;;  %6971 = vmatpush3.msra.mxu0 %v5314_v47  ;;  %v3416_v36 = vld [vmem:[#allocation2 + $0x30] ss:$2 sm:$0xff] }
 0x2ba   : > { %v7243_v1 = vpop.eup %7242  ;;  %3383 = vst [vmem:[#allocation2 + $0x21] sm:$0xff] %v3296_v16  ;;  %v3295_v11 = vmul.f32 %v3263_v29, %v9209_v2  ;;  %v3268_v42 = vmax.f32 %v3236_v18, 0.0  ;;  %v3235_v3 = vadd.f32 1.0, %v3203_v4  ;;  %v3123_v8 = vadd.f32 %v3084_v58, %v9336_v30  ;;  %7028 = vmatprep.subr.mxu0 %v9526_v7  ;;  %v5312_v51 = vld [vmem:[%s10076_s3 + $0x1f0] sm:$0xff]  ;;  %v3418_v18 = vld [vmem:[#allocation2 + $0x60] ss:$2 sm:$0xff] }
 0x2bb   : > { %v7245_v20 = vpop.eup %7244  ;;  %v3208_v34 = vmul.f32 %v7243_v1, %v9372_v21  ;;  %7256 = vrsqrt.f32 %v3151_v38  ;;  %v3156_v50 = vadd.f32 1e-12, %v3124_v40  ;;  %v3094_v31 = vpop.permute.xlu1 %3093  ;;  %v10210_v44 = vld [vmem:[#allocation15_spill] sm:$0xff]  ;;  %v5311_v58 = vld [vmem:[%s10076_s3 + $0x1e8] sm:$0xff] }
 0x2bc   : > { %3382 = vst [vmem:[#allocation2 + $0x19] sm:$0xff] %v3295_v11  ;;  %v3300_v0 = vmul.f32 %v3268_v42, %v9230_v25  ;;  %v3267_v45 = vmax.f32 %v3235_v3, 0.0  ;;  %v3207_v9 = vmul.f32 %v7245_v20, %v9372_v21  ;;  %v3155_v27 = vadd.f32 1e-12, %v3123_v8  ;;  %v10211_v11 = vld [vmem:[#allocation7_spill] sm:$0xff] }
 0x2bd   : > { %v7247_v2 = vpop.eup %7246  ;;  %v3240_v49 = vadd.f32 1.0, %v3208_v34  ;;  %7258 = vrsqrt.f32 %v3156_v50  ;;  %v3128_v30 = vadd.f32 %v3094_v31, %v9342_v23  ;;  %v3092_v37 = vpop.permute.xlu0 %3091  ;;  %v10206_v23 = vld [vmem:[#allocation17_spill] sm:$0xff]  ;;  %v3420_v34 = vld [vmem:[#allocation2 + $0x90] ss:$2 sm:$0xff] }
 0x2be   : > { %3387 = vst [vmem:[#allocation2 + $0x51] sm:$0xff] %v3300_v0  ;;  %v3299_v57 = vmul.f32 %v3267_v45, %v9245_v5  ;;  %v3239_v17 = vadd.f32 1.0, %v3207_v9  ;;  %v3212_v35 = vmul.f32 %v7247_v2, %v9372_v21  ;;  %7260 = vrsqrt.f32 %v3155_v27  ;;  %v10207_v5 = vld [vmem:[#allocation29_spill] sm:$0xff]  ;;  %v5360_v0 = vld [vmem:[%s10076_s3 + $0x370] sm:$0xff]  ;;  %v10212_v45 = vld [vmem:[#allocation8_spill] sm:$0xff] }
 0x2bf   : > { %v3272_v46 = vmax.f32 %v3240_v49, 0.0  ;;  %v3160_v25 = vadd.f32 1e-12, %v3128_v30  ;;  %v3127_v41 = vadd.f32 %v3092_v37, %v10205_v12  ;;  %v3098_v26 = vpop.permute.xlu1 %3097  ;;  %v3460_v10 = vld [vmem:[#allocation2 + $0x151] ss:$2 sm:$0xff] }
 0x2c0   : > { %v7249_v61 = vpop.eup %7248  ;;  %3386 = vst [vmem:[#allocation2 + $0x49] sm:$0xff] %v3299_v57  ;;  %v3271_v13 = vmax.f32 %v3239_v17, 0.0  ;;  %v3244_v63 = vadd.f32 1.0, %v3212_v35  ;;  %v3130_v32 = vadd.f32 %v3098_v26, %v10206_v23  ;;  %6806 = vmatmul.mubr.f32.gmra.mxu1 %v3460_v10  ;;  %v3703_v33 = vld [vmem:[#allocation2 + $0x152] ss:$2 sm:$0xff]  ;;  %v5359_v17 = vld [vmem:[%s10076_s3 + $0x368] sm:$0xff] }
 0x2c1   : > { %v3304_v52 = vmul.f32 %v3272_v46, %v10207_v5  ;;  %v3211_v62 = vmul.f32 %v7249_v61, %v9372_v21  ;;  %7262 = vrsqrt.f32 %v3160_v25  ;;  %v3159_v48 = vadd.f32 1e-12, %v3127_v41  ;;  %6894 = vmatmul.mubr.f32.gmra.mxu0 %v3703_v33  ;;  %v3096_v47 = vpop.permute.xlu0 %3095  ;;  %6840 = vmatprep.mubr.f32.mxu1 %v3414_v6  ;;  %v3422_v30 = vld [vmem:[#allocation2 + $0xc0] ss:$2 sm:$0xff]  ;;  %v5309_v57 = vld [vmem:[%s10076_s3 + $0x1d8] sm:$0xff] }
 0x2c2   : > { %v7251_v60 = vpop.eup %7250  ;;  %v3303_v55 = vmul.f32 %v3271_v13, %v10208_v22  ;;  %v3276_v59 = vmax.f32 %v3244_v63, 0.0  ;;  %v3162_v19 = vadd.f32 1e-12, %v3130_v32  ;;  %v3129_v43 = vadd.f32 %v3096_v47, %v10209_v28  ;;  %v10213_v6 = vld [vmem:[#allocation9_spill] sm:$0xff]  ;;  %v10214_v10 = vld [vmem:[#allocation14_spill] sm:$0xff]  ;;  %v5308_v32 = vld [vmem:[%s10076_s3 + $0x1d0] sm:$0xff] }
 0x2c3   : > { %3391 = vst [vmem:[#allocation2 + $0x81] sm:$0xff] %v3304_v52  ;;  %v3243_v39 = vadd.f32 1.0, %v3211_v62  ;;  %v3216_v14 = vmul.f32 %v7251_v60, %v9372_v21  ;;  %7264 = vrsqrt.f32 %v3159_v48  ;;  %v3980_v24 = vld [vmem:[#allocation2 + $0x19] ss:$2 sm:$0xff]  ;;  %v3424_v23 = vld [vmem:[#allocation2 + $0xf0] ss:$2 sm:$0xff] }
 0x2c4   : > { %v7253_v56 = vpop.eup %7252  ;;  %3390 = vst [vmem:[#allocation2 + $0x79] sm:$0xff] %v3303_v55  ;;  %v3308_v16 = vmul.f32 %v3276_v59, %v10210_v44  ;;  %7266 = vrsqrt.f32 %v3162_v19  ;;  %v3161_v29 = vadd.f32 1e-12, %v3129_v43  ;;  %6841 = vmatmul.mubr.f32.vlgmr.msra.gmra.mxu1 %v3416_v36  ;;  %6972 = vmatprep.mubr.f32.mxu0 %v3980_v24  ;;  %v5358_v52 = vld [vmem:[%s10076_s3 + $0x360] sm:$0xff]  ;;  %v10215_v62 = vld [vmem:[#allocation3_spill] sm:$0xff]  ;;  %v5307_v55 = vld [vmem:[%s10076_s3 + $0x1c8] sm:$0xff] }
 0x2c5   : > { %v3275_v4 = vmax.f32 %v3243_v39, 0.0  ;;  %v3248_v38 = vadd.f32 1.0, %v3216_v14  ;;  %v3215_v40 = vmul.f32 %v7253_v56, %v9372_v21  ;;  %6897 = vmatpush3.msra.mxu1 %v9515_v54  ;;  %6843 = vmatprep.mubr.f32.mxu1 %v3418_v18  ;;  %v5310_v54 = vld [vmem:[%s10076_s3 + $0x1e0] sm:$0xff]  ;;  %v5357_v28 = vld [vmem:[%s10076_s3 + $0x358] sm:$0xff]  ;;  %v10216_v39 = vld [vmem:[#allocation11_spill] sm:$0xff] }
 0x2c6   : > { %v7255_v1 = vpop.eup %7254  ;;  %3395 = vst [vmem:[#allocation2 + $0xb1] sm:$0xff] %v3308_v16  ;;  %7268 = vrsqrt.f32 %v3161_v29  ;;  %6898 = vmatprep.subr.mxu1 %v5312_v51  ;;  %v3426_v22 = vld [vmem:[#allocation2 + $0x120] ss:$2 sm:$0xff]  ;;  %v3428_v29 = vld [vmem:[#allocation2 + $0x150] ss:$2 sm:$0xff] }
 0x2c7   : > { %v3307_v42 = vmul.f32 %v3275_v4, %v10211_v11  ;;  %v3280_v3 = vmax.f32 %v3248_v38, 0.0  ;;  %v3247_v8 = vadd.f32 1.0, %v3215_v40  ;;  %v3220_v20 = vmul.f32 %v7255_v1, %v9372_v21  ;;  %6899 = vmatpush3.msra.mxu1 %v5312_v51  ;;  %v3982_v50 = vld [vmem:[#allocation2 + $0x49] ss:$2 sm:$0xff]  ;;  %v5306_v18 = vld [vmem:[%s10076_s3 + $0x1c0] sm:$0xff] }
 0x2c8   : > { %v7257_v31 = vpop.eup %7256  ;;  %6900 = vmatprep.subr.mxu1 %v5311_v58  ;;  %6844 = vmatmul.mubr.f32.gmra.mxu1 %v3420_v34  ;;  %v10217_v56 = vld [vmem:[#allocation10_spill] sm:$0xff]  ;;  %v5305_v34 = vld [vmem:[%s10076_s3 + $0x1b8] sm:$0xff] }
 0x2c9   : > { %3394 = vst [vmem:[#allocation2 + $0xa9] sm:$0xff] %v3307_v42  ;;  %v3312_v9 = vmul.f32 %v3280_v3, %v10212_v45  ;;  %v3279_v27 = vmax.f32 %v3247_v8, 0.0  ;;  %v3252_v2 = vadd.f32 1.0, %v3220_v20  ;;  %v3219_v49 = vmul.f32 %v7257_v31, %v9372_v21  ;;  %6901 = vmatpush3.msra.mxu1 %v5311_v58  ;;  %6973 = vmatmul.mubr.f32.vlgmr.msra.gmra.mxu0 %v3982_v50  ;;  %v5356_v58 = vld [vmem:[%s10076_s3 + $0x350] sm:$0xff]  ;;  %v10218_v42 = vld [vmem:[#allocation13_spill] sm:$0xff]  ;;  %v5355_v50 = vld [vmem:[%s10076_s3 + $0x348] sm:$0xff] }
 0x2ca   : > { %v7259_v37 = vpop.eup %7258  ;;  %7029 = vmatpush3.msra.mxu0 %v9526_v7  ;;  %6846 = vmatprep.mubr.f32.mxu1 %v3422_v30  ;;  %v3834_v20 = vld [vmem:[#allocation2 + $0x18] ss:$2 sm:$0xff] }
 0x2cb   : > { %v7261_v35 = vpop.eup %7260  ;;  %3399 = vst [vmem:[#allocation2 + $0xe1] sm:$0xff] %v3312_v9  ;;  %v3311_v46 = vmul.f32 %v3279_v27, %v10213_v6  ;;  %v3284_v25 = vmax.f32 %v3252_v2, 0.0  ;;  %v3251_v12 = vadd.f32 1.0, %v3219_v49  ;;  %v3224_v41 = vmul.f32 %v7259_v37, %v9372_v21  ;;  %6902 = vmatprep.subr.mxu1 %v5310_v54  ;;  %7030 = vmatprep.subr.mxu0 %v5360_v0  ;;  %v3984_v7 = vld [vmem:[#allocation2 + $0x79] ss:$2 sm:$0xff]  ;;  %v5304_v9 = vld [vmem:[%s10076_s3 + $0x1b0] sm:$0xff] }
 0x2cc   : > { %v3223_v26 = vmul.f32 %v7261_v35, %v9372_v21  ;;  %6903 = vmatpush3.msra.mxu1 %v5310_v54  ;;  %7031 = vmatpush3.msra.mxu0 %v5360_v0  ;;  %v10219_v0 = vld [vmem:[#allocation28_spill] sm:$0xff]  ;;  %v10220_v27 = vld [vmem:[#allocation30_spill] sm:$0xff]  ;;  %v5354_v30 = vld [vmem:[%s10076_s3 + $0x340] sm:$0xff] }
 0x2cd   : > { %3398 = vst [vmem:[#allocation2 + $0xd9] sm:$0xff] %v3311_v46  ;;  %v3316_v61 = vmul.f32 %v3284_v25, %v10214_v10  ;;  %v3283_v13 = vmax.f32 %v3251_v12, 0.0  ;;  %v3256_v63 = vadd.f32 1.0, %v3224_v41  ;;  %6904 = vmatprep.subr.mxu1 %v5309_v57  ;;  %7032 = vmatprep.subr.mxu0 %v5359_v17  ;;  %v5303_v37 = vld [vmem:[%s10076_s3 + $0x1a8] sm:$0xff]  ;;  %v5353_v35 = vld [vmem:[%s10076_s3 + $0x338] sm:$0xff]  ;;  %v5302_v46 = vld [vmem:[%s10076_s3 + $0x1a0] sm:$0xff] }
 0x2ce   : > { %v7263_v33 = vpop.eup %7262  ;;  %v3255_v5 = vadd.f32 1.0, %v3223_v26  ;;  %6847 = vmatmul.mubr.f32.gmra.mxu1 %v3424_v23  ;;  %6975 = vmatprep.mubr.f32.mxu0 %v3984_v7  ;;  %v5352_v25 = vld [vmem:[%s10076_s3 + $0x330] sm:$0xff]  ;;  %v5301_v12 = vld [vmem:[%s10076_s3 + $0x198] sm:$0xff]  ;;  %v5351_v41 = vld [vmem:[%s10076_s3 + $0x328] sm:$0xff] }
 0x2cf   : > { %3403 = vst [vmem:[#allocation2 + $0x111] sm:$0xff] %v3316_v61  ;;  %v3315_v48 = vmul.f32 %v3283_v13, %v10215_v62  ;;  %v3288_v47 = vmax.f32 %v3256_v63, 0.0  ;;  %v3228_v60 = vmul.f32 %v7263_v33, %v9372_v21  ;;  %6905 = vmatpush3.msra.mxu1 %v5309_v57  ;;  %7033 = vmatpush3.msra.mxu0 %v5359_v17  ;;  %v10221_v57 = vld [vmem:[#allocation31_spill] sm:$0xff]  ;;  %v5350_v10 = vld [vmem:[%s10076_s3 + $0x320] sm:$0xff]  ;;  %v5299_v61 = vld [vmem:[%s10076_s3 + $0x188] sm:$0xff] }
 0x2d0   : > { %v7265_v59 = vpop.eup %7264  ;;  %v3287_v19 = vmax.f32 %v3255_v5, 0.0  ;;  %6849 = vmatprep.mubr.f32.mxu1 %v3426_v22  ;;  %6906 = vmatprep.subr.mxu1 %v5308_v32  ;;  %v3986_v51 = vld [vmem:[#allocation2 + $0xa9] ss:$2 sm:$0xff]  ;;  %v5349_v13 = vld [vmem:[%s10076_s3 + $0x318] sm:$0xff]  ;;  %v5298_v23 = vld [vmem:[%s10076_s3 + $0x180] sm:$0xff] }
 0x2d1   : > { %v7267_v43 = vpop.eup %7266  ;;  %3402 = vst [vmem:[#allocation2 + $0x109] sm:$0xff] %v3315_v48  ;;  %v3320_v14 = vmul.f32 %v3288_v47, %v10216_v39  ;;  %v3260_v36 = vadd.f32 1.0, %v3228_v60  ;;  %v3227_v24 = vmul.f32 %v7265_v59, %v9372_v21  ;;  %7034 = vmatprep.subr.mxu0 %v5358_v52  ;;  %6907 = vmatpush3.msra.mxu1 %v5308_v32  ;;  %v5300_v26 = vld [vmem:[%s10076_s3 + $0x190] sm:$0xff]  ;;  %v5345_v5 = vld [vmem:[%s10076_s3 + $0x2f8] sm:$0xff]  ;;  %v5346_v60 = vld [vmem:[%s10076_s3 + $0x300] sm:$0xff] }
 0x2d2   : > { %v3319_v44 = vmul.f32 %v3287_v19, %v10217_v56  ;;  %v3230_v16 = vmul.f32 %v7267_v43, %v9372_v21  ;;  %7035 = vmatpush3.msra.mxu0 %v5358_v52  ;;  %6908 = vmatprep.subr.mxu1 %v5307_v55  ;;  %v5348_v32 = vld [vmem:[%s10076_s3 + $0x310] sm:$0xff]  ;;  %v5347_v52 = vld [vmem:[%s10076_s3 + $0x308] sm:$0xff]  ;;  %v3838_v47 = vld [vmem:[#allocation2 + $0x78] ss:$2 sm:$0xff] }
 0x2d3   : > { %v7269_v4 = vpop.eup %7268  ;;  %3407 = vst [vmem:[#allocation2 + $0x141] sm:$0xff] %v3320_v14  ;;  %v3292_v38 = vmax.f32 %v3260_v36, 0.0  ;;  %v3259_v40 = vadd.f32 1.0, %v3227_v24  ;;  %7036 = vmatprep.subr.mxu0 %v5357_v28  ;;  %6850 = vmatmul.mubr.f32.gmra.mxu1 %v3428_v29  ;;  %v4272_v33 = vld [vmem:[#allocation2 + $0x30] ss:$2 sm:$0xff]  ;;  %v5343_v22 = vld [vmem:[%s10076_s3 + $0x2e8] sm:$0xff] }
 0x2d4   : > { %3406 = vst [vmem:[#allocation2 + $0x139] sm:$0xff] %v3319_v44  ;;  %v3262_v1 = vadd.f32 1.0, %v3230_v16  ;;  %v3229_v11 = vmul.f32 %v7269_v4, %v9372_v21  ;;  %6909 = vmatpush3.msra.mxu1 %v5307_v55  ;;  %6976 = vmatmul.mubr.f32.gmra.mxu0 %v3986_v51  ;;  %v3988_v21 = vld [vmem:[#allocation2 + $0xd9] ss:$2 sm:$0xff]  ;;  %v3836_v62 = vld [vmem:[#allocation2 + $0x48] ss:$2 sm:$0xff] }
 0x2d5   : > { %v3324_v3 = vmul.f32 %v3292_v38, %v10218_v42  ;;  %v3291_v8 = vmax.f32 %v3259_v40, 0.0  ;;  %7037 = vmatpush3.msra.mxu0 %v5357_v28  ;;  %6910 = vmatprep.subr.mxu1 %v5306_v18  ;;  %v5344_v48 = vld [vmem:[%s10076_s3 + $0x2f0] sm:$0xff]  ;;  %v9674_v59 = vld [vmem:[%s10076_s3 + $0x478] sm:$0xff]  ;;  %v4274_v19 = vld [vmem:[#allocation2 + $0x60] ss:$2 sm:$0xff] }
 0x2d6   : > { %v3294_v31 = vmax.f32 %v3262_v1, 0.0  ;;  %v3261_v54 = vadd.f32 1.0, %v3229_v11  ;;  %6928 = vmatprep.mubr.f32.mxu1 %v3834_v20  ;;  %7038 = vmatprep.subr.mxu0 %v5356_v58  ;;  %v3840_v55 = vld [vmem:[#allocation2 + $0xa8] ss:$2 sm:$0xff]  ;;  %v3842_v28 = vld [vmem:[#allocation2 + $0xd8] ss:$2 sm:$0xff] }
 0x2d7   : > { %3411 = vst [vmem:[#allocation2 + $0x171] sm:$0xff] %v3324_v3  ;;  %v3323_v45 = vmul.f32 %v3291_v8, %v10219_v0  ;;  %6911 = vmatpush3.msra.mxu1 %v5306_v18  ;;  %7039 = vmatpush3.msra.mxu0 %v5356_v58  ;;  %v5342_v43 = vld [vmem:[%s10076_s3 + $0x2e0] sm:$0xff]  ;;  %v4276_v39 = vld [vmem:[#allocation2 + $0x90] ss:$2 sm:$0xff]  ;;  %v9693_v51 = vld [vmem:[%s10076_s3 + $0x468] sm:$0xff] }
 0x2d8   : > { %v3326_v2 = vmul.f32 %v3294_v31, %v10220_v27  ;;  %v3293_v49 = vmax.f32 %v3261_v54, 0.0  ;;  %6912 = vmatprep.subr.mxu1 %v5305_v34  ;;  %7040 = vmatprep.subr.mxu0 %v5355_v50  ;;  %v3990_v6 = vld [vmem:[#allocation2 + $0x109] ss:$2 sm:$0xff]  ;;  %v5341_v36 = vld [vmem:[%s10076_s3 + $0x2d8] sm:$0xff]  ;;  %v3844_v24 = vld [vmem:[#allocation2 + $0x108] ss:$2 sm:$0xff] }
 0x2d9   : > { %3410 = vst [vmem:[#allocation2 + $0x169] sm:$0xff] %v3323_v45  ;;  %6913 = vmatpush3.msra.mxu1 %v5305_v34  ;;  %6978 = vmatprep.mubr.f32.mxu0 %v3988_v21  ;;  %v9683_v14 = vld [vmem:[%s10076_s3 + $0x470] sm:$0xff]  ;;  %v4278_v56 = vld [vmem:[#allocation2 + $0xc0] ss:$2 sm:$0xff]  ;;  %v9713_v40 = vld [vmem:[%s10076_s3 + $0x458] sm:$0xff] }
 0x2da   : > { %3413 = vst [vmem:[#allocation2 + $0x189] sm:$0xff] %v3326_v2  ;;  %v3325_v17 = vmul.f32 %v3293_v49, %v10221_v57  ;;  %7041 = vmatpush3.msra.mxu0 %v5355_v50  ;;  %6914 = vmatprep.subr.mxu1 %v5304_v9  ;;  %v5340_v16 = vld [vmem:[%s10076_s3 + $0x2d0] sm:$0xff]  ;;  %v9703_v18 = vld [vmem:[%s10076_s3 + $0x460] sm:$0xff]  ;;  %v5339_v4 = vld [vmem:[%s10076_s3 + $0x2c8] sm:$0xff] }
 0x2db   : > { %7042 = vmatprep.subr.mxu0 %v5354_v30  ;;  %6915 = vmatpush3.msra.mxu1 %v5304_v9  ;;  %v3992_v7 = vld [vmem:[#allocation2 + $0x139] ss:$2 sm:$0xff]  ;;  %v3846_v44 = vld [vmem:[#allocation2 + $0x138] ss:$2 sm:$0xff]  ;;  %v9723_v3 = vld [vmem:[%s10076_s3 + $0x450] sm:$0xff] }
 0x2dc   : > { %3412 = vst [vmem:[#allocation2 + $0x181] sm:$0xff] %v3325_v17  ;;  %7043 = vmatpush3.msra.mxu0 %v5354_v30  ;;  %6916 = vmatprep.subr.mxu1 %v5303_v37  ;;  %v4280_v29 = vld [vmem:[#allocation2 + $0xf0] ss:$2 sm:$0xff]  ;;  %v4282_v58 = vld [vmem:[#allocation2 + $0x120] ss:$2 sm:$0xff] }
 0x2dd   : > { %7044 = vmatprep.subr.mxu0 %v5353_v35  ;;  %6917 = vmatpush3.msra.mxu1 %v5303_v37  ;;  %v5338_v1 = vld [vmem:[%s10076_s3 + $0x2c0] sm:$0xff]  ;;  %v4284_v42 = vld [vmem:[#allocation2 + $0x150] ss:$2 sm:$0xff]  ;;  %v9732_v20 = vld [vmem:[%s10076_s3 + $0x448] sm:$0xff] }
 0x2de   : > { %6979 = vmatmul.mubr.f32.gmra.mxu0 %v3990_v6  ;;  %6918 = vmatprep.subr.mxu1 %v5302_v46  ;;  %v4126_v11 = vld [vmem:[#allocation2 + $0x1a] ss:$2 sm:$0xff]  ;;  %v5336_v50 = vld [vmem:[%s10076_s3 + $0x2b0] sm:$0xff] }
 0x2df   : > { %7045 = vmatpush3.msra.mxu0 %v5353_v35  ;;  %6919 = vmatpush3.msra.mxu1 %v5302_v46  ;;  %v5337_v8 = vld [vmem:[%s10076_s3 + $0x2b8] sm:$0xff]  ;;  %v9743_v31 = vld [vmem:[%s10076_s3 + $0x440] sm:$0xff]  ;;  %v5335_v21 = vld [vmem:[%s10076_s3 + $0x2a8] sm:$0xff] }
 0x2e0   : > { %7046 = vmatprep.subr.mxu0 %v5352_v25  ;;  %6920 = vmatprep.subr.mxu1 %v5301_v12  ;;  %v3994_v63 = vld [vmem:[#allocation2 + $0x169] ss:$2 sm:$0xff]  ;;  %v3848_v38 = vld [vmem:[#allocation2 + $0x168] ss:$2 sm:$0xff]  ;;  %v9752_v0 = vld [vmem:[%s10076_s3 + $0x438] sm:$0xff] }
 0x2e1   : > { %7047 = vmatpush3.msra.mxu0 %v5352_v25  ;;  %6921 = vmatpush3.msra.mxu1 %v5301_v12  ;;  %v4564_v54 = vld [vmem:[#allocation2 + $0x32] ss:$2 sm:$0xff]  ;;  %v9772_v2 = vld [vmem:[%s10076_s3 + $0x428] sm:$0xff] }
 0x2e2   : > { %7048 = vmatprep.subr.mxu0 %v5351_v41  ;;  %6981 = vmatprep.mubr.f32.mxu0 %v3992_v7  ;;  %v5334_v45 = vld [vmem:[%s10076_s3 + $0x2a0] sm:$0xff]  ;;  %v9762_v9 = vld [vmem:[%s10076_s3 + $0x430] sm:$0xff]  ;;  %v5333_v27 = vld [vmem:[%s10076_s3 + $0x298] sm:$0xff] }
 0x2e3   : > { %7049 = vmatpush3.msra.mxu0 %v5351_v41  ;;  %6922 = vmatprep.subr.mxu1 %v5300_v26  ;;  %v4286_v34 = vld [vmem:[#allocation2 + $0x180] ss:$2 sm:$0xff]  ;;  %v5332_v49 = vld [vmem:[%s10076_s3 + $0x290] sm:$0xff]  ;;  %v9792_v57 = vld [vmem:[%s10076_s3 + $0x418] sm:$0xff] }
 0x2e4   : > { %7050 = vmatprep.subr.mxu0 %v5350_v10  ;;  %6923 = vmatpush3.msra.mxu1 %v5300_v26  ;;  %v9782_v30 = vld [vmem:[%s10076_s3 + $0x420] sm:$0xff]  ;;  %v5331_v37 = vld [vmem:[%s10076_s3 + $0x288] sm:$0xff]  ;;  %v9802_v35 = vld [vmem:[%s10076_s3 + $0x410] sm:$0xff] }
 0x2e5   : > { %7051 = vmatpush3.msra.mxu0 %v5350_v10  ;;  %6924 = vmatprep.subr.mxu1 %v5299_v61  ;;  %v5330_v17 = vld [vmem:[%s10076_s3 + $0x280] sm:$0xff]  ;;  %v5377_v6 = vld [vmem:[%s10076_s3 + $0x3f8] sm:$0xff]  ;;  %v9812_v46 = vld [vmem:[%s10076_s3 + $0x408] sm:$0xff] }
 0x2e6   : > { %7052 = vmatprep.subr.mxu0 %v5349_v13  ;;  %6925 = vmatpush3.msra.mxu1 %v5299_v61  ;;  %v4128_v25 = vld [vmem:[#allocation2 + $0x4a] ss:$2 sm:$0xff]  ;;  %v4130_v41 = vld [vmem:[#allocation2 + $0x7a] ss:$2 sm:$0xff] }
 0x2e7   : > { %6982 = vmatmul.mubr.f32.gmra.mxu0 %v3994_v63  ;;  %6926 = vmatprep.subr.mxu1 %v5298_v23  ;;  %v5376_v12 = vld [vmem:[%s10076_s3 + $0x3f0] sm:$0xff]  ;;  %v9823_v7 = vld [vmem:[%s10076_s3 + $0x400] sm:$0xff]  ;;  %v5375_v26 = vld [vmem:[%s10076_s3 + $0x3e8] sm:$0xff] }
 0x2e8   : > { %7053 = vmatpush3.msra.mxu0 %v5349_v13  ;;  %7060 = vmatprep.mubr.f32.mxu0 %v4272_v33  ;;  %v4132_v10 = vld [vmem:[#allocation2 + $0xaa] ss:$2 sm:$0xff]  ;;  %v5374_v13 = vld [vmem:[%s10076_s3 + $0x3e0] sm:$0xff] }
 0x2e9   : > { %7054 = vmatprep.subr.mxu0 %v5348_v32  ;;  %6927 = vmatpush3.msra.mxu1 %v5298_v23  ;;  %v4566_v61 = vld [vmem:[#allocation2 + $0x62] ss:$2 sm:$0xff]  ;;  %v4568_v23 = vld [vmem:[#allocation2 + $0x92] ss:$2 sm:$0xff] }
 0x2ea   : > { %7055 = vmatpush3.msra.mxu0 %v5348_v32  ;;  %6929 = vmatmul.mubr.f32.vlgmr.msra.gmra.mxu1 %v3836_v62  ;;  %v4134_v63 = vld [vmem:[#allocation2 + $0xda] ss:$2 sm:$0xff]  ;;  %v4136_v33 = vld [vmem:[#allocation2 + $0x10a] ss:$2 sm:$0xff] }
 0x2eb   : > { %6984 = vmatprep.subr.mxu1 %v5345_v5  ;;  %7056 = vmatprep.subr.mxu0 %v5347_v52  ;;  %v5373_v32 = vld [vmem:[%s10076_s3 + $0x3d8] sm:$0xff]  ;;  %v5372_v62 = vld [vmem:[%s10076_s3 + $0x3d0] sm:$0xff] }
 0x2ec   : > { %6931 = vmatprep.mubr.f32.mxu1 %v3838_v47  ;;  %6985 = vmatpush3.msra.mxu1 %v5345_v5  ;;  %v4570_v5 = vld [vmem:[#allocation2 + $0xc2] ss:$2 sm:$0xff] }
 0x2ed   : > { %7057 = vmatpush3.msra.mxu0 %v5347_v52  ;;  %6986 = vmatprep.subr.mxu1 %v5344_v48  ;;  %v4138_v52 = vld [vmem:[#allocation2 + $0x13a] ss:$2 sm:$0xff]  ;;  %v4140_v47 = vld [vmem:[#allocation2 + $0x16a] ss:$2 sm:$0xff] }
 0x2ee   : > { %7058 = vmatprep.subr.mxu0 %v5346_v60  ;;  %6987 = vmatpush3.msra.mxu1 %v5344_v48  ;;  %v5371_v48 = vld [vmem:[%s10076_s3 + $0x3c8] sm:$0xff] }
 0x2ef   : > { %7059 = vmatpush3.msra.mxu0 %v5346_v60  ;;  %6932 = vmatmul.mubr.f32.gmra.mxu1 %v3840_v55  ;;  %v5370_v60 = vld [vmem:[%s10076_s3 + $0x3c0] sm:$0xff]  ;;  %v5369_v55 = vld [vmem:[%s10076_s3 + $0x3b8] sm:$0xff] }
 0x2f0   : > { %6988 = vmatprep.subr.mxu1 %v5343_v22  ;;  %7061 = vmatmul.mubr.f32.vlgmr.msra.gmra.mxu0 %v4274_v19  ;;  %v5368_v19 = vld [vmem:[%s10076_s3 + $0x3b0] sm:$0xff] }
 0x2f1   : > { %7116 = vmatprep.subr.mxu0 %v9674_v59  ;;  %6934 = vmatprep.mubr.f32.mxu1 %v3842_v28  ;;  %v5367_v28 = vld [vmem:[%s10076_s3 + $0x3a8] sm:$0xff] }
 0x2f2   : > { %6989 = vmatpush3.msra.mxu1 %v5343_v22  ;;  %7063 = vmatprep.mubr.f32.mxu0 %v4276_v39  ;;  %v4418_v22 = vld [vmem:[#allocation2 + $0x31] ss:$2 sm:$0xff] }
 0x2f3   : > { %7117 = vmatpush3.msra.mxu0 %v9674_v59  ;;  %6990 = vmatprep.subr.mxu1 %v5342_v43  ;;  %v5365_v39 = vld [vmem:[%s10076_s3 + $0x398] sm:$0xff] }
 0x2f4   : > { %7118 = vmatprep.subr.mxu0 %v9683_v14  ;;  %6991 = vmatpush3.msra.mxu1 %v5342_v43  ;;  %v5366_v43 = vld [vmem:[%s10076_s3 + $0x3a0] sm:$0xff] }
 0x2f5   : > { %7119 = vmatpush3.msra.mxu0 %v9683_v14  ;;  %6935 = vmatmul.mubr.f32.gmra.mxu1 %v3844_v24  ;;  %v5363_v24 = vld [vmem:[%s10076_s3 + $0x388] sm:$0xff] }
 0x2f6   : > { %6992 = vmatprep.subr.mxu1 %v5341_v36  ;;  %7064 = vmatmul.mubr.f32.gmra.mxu0 %v4278_v56  ;;  %v5362_v56 = vld [vmem:[%s10076_s3 + $0x380] sm:$0xff] }
 0x2f7   : > { %7120 = vmatprep.subr.mxu0 %v9693_v51  ;;  %6937 = vmatprep.mubr.f32.mxu1 %v3846_v44  ;;  %v4420_v44 = vld [vmem:[#allocation2 + $0x61] ss:$2 sm:$0xff] }
 0x2f8   : > { %6993 = vmatpush3.msra.mxu1 %v5341_v36  ;;  %7066 = vmatprep.mubr.f32.mxu0 %v4280_v29  ;;  %v5364_v36 = vld [vmem:[%s10076_s3 + $0x390] sm:$0xff]  ;;  %v4424_v29 = vld [vmem:[#allocation2 + $0xc1] ss:$2 sm:$0xff] }
 0x2f9   : > { %7121 = vmatpush3.msra.mxu0 %v9693_v51  ;;  %6994 = vmatprep.subr.mxu1 %v5340_v16 }
 0x2fa   : > { %7122 = vmatprep.subr.mxu0 %v9703_v18  ;;  %6995 = vmatpush3.msra.mxu1 %v5340_v16  ;;  %v4422_v16 = vld [vmem:[#allocation2 + $0x91] ss:$2 sm:$0xff] }
 0x2fb   : > { %7123 = vmatpush3.msra.mxu0 %v9703_v18  ;;  %6938 = vmatmul.mubr.f32.gmra.mxu1 %v3848_v38  ;;  %v4428_v38 = vld [vmem:[#allocation2 + $0x121] ss:$2 sm:$0xff] }
 0x2fc   : > { %6996 = vmatprep.subr.mxu1 %v5339_v4  ;;  %7067 = vmatmul.mubr.f32.gmra.mxu0 %v4282_v58  ;;  %v4578_v58 = vld [vmem:[#allocation2 + $0x182] ss:$2 sm:$0xff] }
 0x2fd   : > { %7124 = vmatprep.subr.mxu0 %v9713_v40  ;;  %6997 = vmatpush3.msra.mxu1 %v5339_v4  ;;  %v4426_v4 = vld [vmem:[#allocation2 + $0xf1] ss:$2 sm:$0xff] }
 0x2fe   : > { %7016 = vmatprep.mubr.f32.mxu1 %v4126_v11  ;;  %7069 = vmatprep.mubr.f32.mxu0 %v4284_v42 }
 0x2ff   : > { %7125 = vmatpush3.msra.mxu0 %v9713_v40  ;;  %6998 = vmatprep.subr.mxu1 %v5338_v1 }
 0x300   : > { %7126 = vmatprep.subr.mxu0 %v9723_v3  ;;  %6999 = vmatpush3.msra.mxu1 %v5338_v1 }
 0x301   : > { %7127 = vmatpush3.msra.mxu0 %v9723_v3  ;;  %7000 = vmatprep.subr.mxu1 %v5337_v8 }
 0x302   : > { %7070 = vmatmul.mubr.f32.gmra.mxu0 %v4286_v34  ;;  %7128 = vmatprep.subr.mxu0 %v9732_v20 }
 0x303   : > { %7001 = vmatpush3.msra.mxu1 %v5337_v8  ;;  %7129 = vmatpush3.msra.mxu0 %v9732_v20 }
 0x304   : > { %7148 = vmatprep.mubr.f32.mxu0 %v4564_v54  ;;  %7002 = vmatprep.subr.mxu1 %v5336_v50 }
 0x305   : > { %7130 = vmatprep.subr.mxu0 %v9743_v31  ;;  %7003 = vmatpush3.msra.mxu1 %v5336_v50 }
 0x306   : > { %7131 = vmatpush3.msra.mxu0 %v9743_v31  ;;  %7004 = vmatprep.subr.mxu1 %v5335_v21 }
 0x307   : > { %7132 = vmatprep.subr.mxu0 %v9752_v0  ;;  %7005 = vmatpush3.msra.mxu1 %v5335_v21 }
 0x308   : > { %7133 = vmatpush3.msra.mxu0 %v9752_v0  ;;  %7006 = vmatprep.subr.mxu1 %v5334_v45 }
 0x309   : > { %7134 = vmatprep.subr.mxu0 %v9762_v9  ;;  %7007 = vmatpush3.msra.mxu1 %v5334_v45 }
 0x30a   : > { %7135 = vmatpush3.msra.mxu0 %v9762_v9  ;;  %7008 = vmatprep.subr.mxu1 %v5333_v27 }
 0x30b   : > { %7136 = vmatprep.subr.mxu0 %v9772_v2  ;;  %7009 = vmatpush3.msra.mxu1 %v5333_v27 }
 0x30c   : > { %7137 = vmatpush3.msra.mxu0 %v9772_v2  ;;  %7010 = vmatprep.subr.mxu1 %v5332_v49 }
 0x30d   : > { %7138 = vmatprep.subr.mxu0 %v9782_v30  ;;  %7011 = vmatpush3.msra.mxu1 %v5332_v49 }
 0x30e   : > { %7139 = vmatpush3.msra.mxu0 %v9782_v30  ;;  %7012 = vmatprep.subr.mxu1 %v5331_v37 }
 0x30f   : > { %7140 = vmatprep.subr.mxu0 %v9792_v57  ;;  %7013 = vmatpush3.msra.mxu1 %v5331_v37 }
 0x310   : > { %7141 = vmatpush3.msra.mxu0 %v9792_v57  ;;  %7014 = vmatprep.subr.mxu1 %v5330_v17 }
 0x311   : > { %7142 = vmatprep.subr.mxu0 %v9802_v35  ;;  %7015 = vmatpush3.msra.mxu1 %v5330_v17 }
 0x312   : > { %7143 = vmatpush3.msra.mxu0 %v9802_v35  ;;  %7017 = vmatmul.mubr.f32.vlgmr.msra.gmra.mxu1 %v4128_v25 }
 0x313   : > { %7072 = vmatprep.subr.mxu1 %v5377_v6  ;;  %7144 = vmatprep.subr.mxu0 %v9812_v46 }
 0x314   : > { %7019 = vmatprep.mubr.f32.mxu1 %v4130_v41  ;;  %7073 = vmatpush3.msra.mxu1 %v5377_v6 }
 0x315   : > { %7145 = vmatpush3.msra.mxu0 %v9812_v46  ;;  %7074 = vmatprep.subr.mxu1 %v5376_v12 }
 0x316   : > { %7146 = vmatprep.subr.mxu0 %v9823_v7  ;;  %7075 = vmatpush3.msra.mxu1 %v5376_v12 }
 0x317   : > { %7147 = vmatpush3.msra.mxu0 %v9823_v7  ;;  %7020 = vmatmul.mubr.f32.gmra.mxu1 %v4132_v10 }
 0x318   : > { %7076 = vmatprep.subr.mxu1 %v5375_v26  ;;  %7149 = vmatmul.mubr.f32.vlgmr.msra.gmra.mxu0 %v4566_v61 }
 0x319   : > { %7022 = vmatprep.mubr.f32.mxu1 %v4134_v63  ;;  %7077 = vmatpush3.msra.mxu1 %v5375_v26 }
 0x31a   : > { %7151 = vmatprep.mubr.f32.mxu0 %v4568_v23  ;;  %7078 = vmatprep.subr.mxu1 %v5374_v13 }
 0x31b   : > { %7079 = vmatpush3.msra.mxu1 %v5374_v13 }
 0x31c   : > { %7023 = vmatmul.mubr.f32.gmra.mxu1 %v4136_v33  ;;  %7080 = vmatprep.subr.mxu1 %v5373_v32 }
 0x31d   : > { %7152 = vmatmul.mubr.f32.gmra.mxu0 %v4570_v5  ;;  %7025 = vmatprep.mubr.f32.mxu1 %v4138_v52 }
 0x31e   : > { %7081 = vmatpush3.msra.mxu1 %v5373_v32 }
 0x31f   : > { %7082 = vmatprep.subr.mxu1 %v5372_v62 }
 0x320   : > { %7083 = vmatpush3.msra.mxu1 %v5372_v62 }
 0x321   : > { %7026 = vmatmul.mubr.f32.gmra.mxu1 %v4140_v47  ;;  %7084 = vmatprep.subr.mxu1 %v5371_v48 }
 0x322   : > { %7085 = vmatpush3.msra.mxu1 %v5371_v48  ;;  %7104 = vmatprep.mubr.f32.mxu1 %v4418_v22 }
 0x323   : > { %7086 = vmatprep.subr.mxu1 %v5370_v60 }
 0x324   : > { %7087 = vmatpush3.msra.mxu1 %v5370_v60 }
 0x325   : > { %7088 = vmatprep.subr.mxu1 %v5369_v55 }
 0x326   : > { %7089 = vmatpush3.msra.mxu1 %v5369_v55 }
 0x327   : > { %7090 = vmatprep.subr.mxu1 %v5368_v19 }
 0x328   : > { %7091 = vmatpush3.msra.mxu1 %v5368_v19 }
 0x329   : > { %7092 = vmatprep.subr.mxu1 %v5367_v28 }
 0x32a   : > { %7093 = vmatpush3.msra.mxu1 %v5367_v28 }
 0x32b   : > { %7094 = vmatprep.subr.mxu1 %v5366_v43 }
 0x32c   : > { %7095 = vmatpush3.msra.mxu1 %v5366_v43 }
 0x32d   : > { %7096 = vmatprep.subr.mxu1 %v5365_v39 }
 0x32e   : > { %7097 = vmatpush3.msra.mxu1 %v5365_v39 }
 0x32f   : > { %7098 = vmatprep.subr.mxu1 %v5364_v36 }
 0x330   : > { %7099 = vmatpush3.msra.mxu1 %v5364_v36 }
 0x331   : > { %7100 = vmatprep.subr.mxu1 %v5363_v24 }
 0x332   : > { %7101 = vmatpush3.msra.mxu1 %v5363_v24 }
 0x333   : > { %7102 = vmatprep.subr.mxu1 %v5362_v56 }
 0x334   : > { %7103 = vmatpush3.msra.mxu1 %v5362_v56 }
 0x335   : > { %7105 = vmatmul.mubr.f32.vlgmr.msra.gmra.mxu1 %v4420_v44  ;;  %7160 = vmatprep.subr.mxu1 %v9674_v59 }
 0x336   : > { %7107 = vmatprep.mubr.f32.mxu1 %v4422_v16  ;;  %7176 = vmatpush3.msra.mxu1 %v9674_v59  ;;  %v4430_v59 = vld [vmem:[#allocation2 + $0x151] ss:$2 sm:$0xff] }
 0x337   : > { %7161 = vmatprep.subr.mxu1 %v9683_v14 }
 0x338   : > { %7177 = vmatpush3.msra.mxu1 %v9683_v14  ;;  %v4432_v14 = vld [vmem:[#allocation2 + $0x181] ss:$2 sm:$0xff] }
 0x339   : > { %7108 = vmatmul.mubr.f32.gmra.mxu1 %v4424_v29  ;;  %7162 = vmatprep.subr.mxu1 %v9693_v51 }
 0x33a   : > { %7110 = vmatprep.mubr.f32.mxu1 %v4426_v4  ;;  %7178 = vmatpush3.msra.mxu1 %v9693_v51  ;;  %v4572_v51 = vld [vmem:[#allocation2 + $0xf2] ss:$2 sm:$0xff] }
 0x33b   : > { %7163 = vmatprep.subr.mxu1 %v9703_v18 }
 0x33c   : > { %7179 = vmatpush3.msra.mxu1 %v9703_v18  ;;  %v4574_v18 = vld [vmem:[#allocation2 + $0x122] ss:$2 sm:$0xff] }
 0x33d   : > { %7111 = vmatmul.mubr.f32.gmra.mxu1 %v4428_v38  ;;  %7164 = vmatprep.subr.mxu1 %v9713_v40 }
 0x33e   : > { %7113 = vmatprep.mubr.f32.mxu1 %v4430_v59  ;;  %7180 = vmatpush3.msra.mxu1 %v9713_v40  ;;  %v4576_v40 = vld [vmem:[#allocation2 + $0x152] ss:$2 sm:$0xff] }
 0x33f   : > { %7165 = vmatprep.subr.mxu1 %v9723_v3 }
 0x340   : > { %7181 = vmatpush3.msra.mxu1 %v9723_v3 }
 0x341   : > { %7114 = vmatmul.mubr.f32.gmra.mxu1 %v4432_v14  ;;  %7166 = vmatprep.subr.mxu1 %v9732_v20 }
 0x342   : > { %7182 = vmatpush3.msra.mxu1 %v9732_v20  ;;  %7154 = vmatprep.mubr.f32.mxu1 %v4572_v51 }
 0x343   : > { %7167 = vmatprep.subr.mxu1 %v9743_v31 }
 0x344   : > { %7183 = vmatpush3.msra.mxu1 %v9743_v31 }
 0x345   : > { %7168 = vmatprep.subr.mxu1 %v9752_v0 }
 0x346   : > { %7184 = vmatpush3.msra.mxu1 %v9752_v0 }
 0x347   : > { %7169 = vmatprep.subr.mxu1 %v9762_v9 }
 0x348   : > { %7185 = vmatpush3.msra.mxu1 %v9762_v9 }
 0x349   : > { %7170 = vmatprep.subr.mxu1 %v9772_v2 }
 0x34a   : > { %7186 = vmatpush3.msra.mxu1 %v9772_v2 }
 0x34b   : > { %7171 = vmatprep.subr.mxu1 %v9782_v30 }
 0x34c   : > { %7187 = vmatpush3.msra.mxu1 %v9782_v30 }
 0x34d   : > { %7172 = vmatprep.subr.mxu1 %v9792_v57 }
 0x34e   : > { %7188 = vmatpush3.msra.mxu1 %v9792_v57 }
 0x34f   : > { %7173 = vmatprep.subr.mxu1 %v9802_v35 }
 0x350   : > { %7189 = vmatpush3.msra.mxu1 %v9802_v35 }
 0x351   : > { %7174 = vmatprep.subr.mxu1 %v9812_v46 }
 0x352   : > { %7190 = vmatpush3.msra.mxu1 %v9812_v46 }
 0x353   : > { %7175 = vmatprep.subr.mxu1 %v9823_v7 }
 0x354   : > { %7191 = vmatpush3.msra.mxu1 %v9823_v7  ;;  %v6798_v1 = vpop.f32.mrf.mxu1  ;;  %v6886_v21 = vpop.f32.mrf.mxu0 }
 0x355   : > { %7155 = vmatmul.mubr.f32.vlgmr.msra.gmra.mxu1 %v4574_v18 }
 0x356   : > { %7157 = vmatprep.mubr.f32.mxu1 %v4576_v40  ;;  %v3544_v11 = vpop.f32.mrf.mxu1  ;;  %v3787_v45 = vpop.f32.mrf.mxu0 }
 0x359   : > { %7158 = vmatmul.mubr.f32.gmra.mxu1 %v4578_v58 }
 0x360   : > { %v6801_v42 = vpop.f32.mrf.mxu1 }
 0x361   : > { %v6889_v27 = vpop.f32.mrf.mxu0 }
 0x362   : > { %v3554_v3 = vpop.f32.mrf.mxu1 }
 0x363   : > { %v3797_v49 = vpop.f32.mrf.mxu0 }
 0x371   : > { %v9902_v8 = vpop.f32.mrf.mxu1 }
 0x372   : > { %v9912_v30 = vpop.f32.mrf.mxu0 }
 0x373   : > { %v9904_v20 = vpop.f32.mrf.mxu1 }
 0x374   : > { %v9916_v57 = vpop.f32.mrf.mxu0 }
 0x380   : > { %v9906_v34 = vpop.f32.mrf.mxu1 }
 0x381   : > { %v9920_v35 = vpop.f32.mrf.mxu0 }
 0x382   : > { %v9908_v50 = vpop.f32.mrf.mxu1 }
 0x383   : > { %v9924_v46 = vpop.f32.mrf.mxu0 }
 0x384   : > { %v6842_v31 = vpop.f32.mrf.mxu1 }
 0x385   : > { %v3655_v24 = vadd.f32 %v6842_v31, %v6798_v1 }
 0x386   : > { %v3649_v54 = vpop.f32.mrf.mxu1 }
 0x387   : > { %v3650_v56 = vadd.f32 %v3649_v54, %v3544_v11  ;;  %v3827_v4 = vadd.f32 %v6886_v21, %v3655_v24 }
 0x388   : > { %v6845_v0 = vpop.f32.mrf.mxu1 }
 0x389   : > { %v6974_v12 = vpop.f32.mrf.mxu0  ;;  %v3665_v29 = vadd.f32 %v6845_v0, %v6801_v42  ;;  %v3826_v14 = vadd.f32 %v3787_v45, %v3650_v56 }
 0x38a   : > { %v3659_v9 = vpop.f32.mrf.mxu1 }
 0x38b   : > { %v4078_v7 = vpop.f32.mrf.mxu0  ;;  %v3660_v38 = vadd.f32 %v3659_v9, %v3554_v3  ;;  %v3829_v58 = vadd.f32 %v6889_v27, %v3665_v29  ;;  %v9959_v9 = vld [vmem:[%s10077_s4] sm:$0x3] }
 0x38e   : > { %v9910_v2 = vpop.f32.mrf.mxu1 }
 0x390   : > { %v9914_v37 = vpop.f32.mrf.mxu1 }
 0x393   : > { %v9918_v17 = vpop.f32.mrf.mxu1 }
 0x394   : > { %v6977_v26 = vpop.f32.mrf.mxu0 }
 0x395   : > { %v9922_v6 = vpop.f32.mrf.mxu1 }
 0x396   : > { %v4088_v61 = vpop.f32.mrf.mxu0 }
 0x39e   : > { %v9926_v63 = vpop.f32.mrf.mxu0 }
 0x3a0   : > { %v9930_v32 = vpop.f32.mrf.mxu0 }
 0x3a7   : > { %v9932_v33 = vpop.f32.mrf.mxu0 }
 0x3a9   : > { %v9936_v52 = vpop.f32.mrf.mxu0 }
 0x3aa   : > { %v6930_v25 = vpop.f32.mrf.mxu1  ;;  %10222 = vst [vmem:[#allocation20_spill] sm:$0xff] %v9936_v52 }
 0x3ab   : > { %v3972_v59 = vadd.f32 %v6930_v25, %v3827_v4 }
 0x3ac   : > { %v3932_v41 = vpop.f32.mrf.mxu1 }
 0x3ad   : > { %v3971_v40 = vadd.f32 %v3932_v41, %v3826_v14  ;;  %v4118_v52 = vadd.f32 %v6974_v12, %v3972_v59 }
 0x3af   : > { %v6933_v10 = vpop.f32.mrf.mxu1  ;;  %v4117_v42 = vadd.f32 %v4078_v7, %v3971_v40 }
 0x3b0   : > { %v7062_v48 = vpop.f32.mrf.mxu0  ;;  %v3974_v15 = vadd.f32 %v6933_v10, %v3829_v58 }
 0x3b1   : > { %v3942_v13 = vpop.f32.mrf.mxu1 }
 0x3b2   : > { %v4370_v60 = vpop.f32.mrf.mxu0  ;;  %v4120_v0 = vadd.f32 %v6977_v26, %v3974_v15 }
 0x3b5   : > { %v9928_v23 = vpop.f32.mrf.mxu1 }
 0x3b6   : > { %v7065_v55 = vpop.f32.mrf.mxu0 }
 0x3b7   : > { %v9934_v5 = vpop.f32.mrf.mxu1 }
 0x3b8   : > { %v4380_v28 = vpop.f32.mrf.mxu0 }
 0x3bb   : > { %v9938_v62 = vpop.f32.mrf.mxu1 }
 0x3bc   : > { %v9942_v39 = vpop.f32.mrf.mxu0 }
 0x3bd   : > { %v9940_v47 = vpop.f32.mrf.mxu1  ;;  %10223 = vst [vmem:[#allocation19_spill] sm:$0xff] %v9942_v39  ;;  %v3828_v39 = vadd.f32 %v3797_v49, %v3660_v38 }
 0x3be   : > { %v9944_v44 = vpop.f32.mrf.mxu0 }
 0x3bf   : > { %v3973_v31 = vadd.f32 %v3942_v13, %v3828_v39  ;;  %v10224_v13 = vsub.s32 0, %v10203_v53 }
 0x3c1   : > { %v4119_v25 = vadd.f32 %v4088_v61, %v3973_v31  ;;  %v9964_v7 = vrot.slane %v9959_v9, %v10224_v13 }
 0x3c2   : > { %v9948_v51 = vpop.f32.mrf.mxu0 }
 0x3c4   : > { %v9952_v1 = vpop.f32.mrf.mxu0 }
 0x3d2   : > { %v7018_v22 = vpop.f32.mrf.mxu1 }
 0x3d3   : > { %v4264_v54 = vadd.f32 %v7018_v22, %v4118_v52 }
 0x3d4   : > { %v4224_v19 = vpop.f32.mrf.mxu1 }
 0x3d5   : > { %v4263_v3 = vadd.f32 %v4224_v19, %v4117_v42  ;;  %v4410_v49 = vadd.f32 %v7062_v48, %v4264_v54  ;;  %v3675_v54 = vadd.f32 %v9910_v2, %v9902_v8  ;;  %v3680_v8 = vadd.f32 %v9922_v6, %v9908_v50 }
 0x3d7   : > { %v7021_v43 = vpop.f32.mrf.mxu1  ;;  %v4409_v52 = vadd.f32 %v4370_v60, %v4263_v3  ;;  %v3685_v3 = vadd.f32 %v9918_v17, %v9906_v34 }
 0x3d8   : > { %v7150_v21 = vpop.f32.mrf.mxu0  ;;  %v4266_v27 = vadd.f32 %v7021_v43, %v4120_v0  ;;  %v3831_v0 = vadd.f32 %v9912_v30, %v3675_v54 }
 0x3d9   : > { %v4234_v36 = vpop.f32.mrf.mxu1 }
 0x3da   : > { %v4662_v12 = vpop.f32.mrf.mxu0  ;;  %v4265_v10 = vadd.f32 %v4234_v36, %v4119_v25  ;;  %v4412_v19 = vadd.f32 %v7065_v55, %v4266_v27  ;;  %v3976_v2 = vadd.f32 %v9928_v23, %v3831_v0 }
 0x3dc   : > { %v9946_v16 = vpop.f32.mrf.mxu1  ;;  %v4411_v29 = vadd.f32 %v4380_v28, %v4265_v10  ;;  %v4122_v34 = vadd.f32 %v9926_v63, %v3976_v2 }
 0x3dd   : > { %v7153_v39 = vpop.f32.mrf.mxu0 }
 0x3de   : > { %v9950_v18 = vpop.f32.mrf.mxu1  ;;  %v4268_v17 = vadd.f32 %v9946_v16, %v4122_v34 }
 0x3df   : > { %v4672_v14 = vpop.f32.mrf.mxu0 }
 0x3e1   : > { %v9954_v11 = vpop.f32.mrf.mxu1 }
 0x3e3   : > { %v4254_v45 = vpop.f32.mrf.mxu1 }
 0x3f5   : > { %v7106_v41 = vpop.f32.mrf.mxu1 }
 0x3f6   : > { %v4556_v24 = vadd.f32 %v7106_v41, %v4410_v49  ;;  %v3832_v41 = vadd.f32 %v9924_v46, %v3680_v8 }
 0x3f7   : > { %v4516_v15 = vpop.f32.mrf.mxu1 }
 0x3f8   : > { %v4702_v26 = vadd.f32 %v7150_v21, %v4556_v24  ;;  %v4555_v22 = vadd.f32 %v4516_v15, %v4409_v52  ;;  %v3670_v21 = vadd.f32 %v9914_v37, %v9904_v20  ;;  %v3977_v30 = vadd.f32 %v9940_v47, %v3832_v41 }
 0x3f9   : > { %v7109_v56 = vpop.f32.mrf.mxu1 }
 0x3fa   : > { %v9967_v43 = vadd.f32 %v9964_v7, %v4702_v26  ;;  %v4701_v61 = vadd.f32 %v4662_v12, %v4555_v22  ;;  %v4558_v48 = vadd.f32 %v7109_v56, %v4412_v19  ;;  %v3830_v25 = vadd.f32 %v9916_v57, %v3670_v21 }
 0x3fb   : > { %v4526_v36 = vpop.f32.mrf.mxu1  ;;  %v3833_v12 = vadd.f32 %v9920_v35, %v3685_v3 }
 0x3fc   : > { %v9970_v4 = vadd.f32 %v9964_v7, %v4701_v61  ;;  %v4704_v38 = vadd.f32 %v7153_v39, %v4558_v48  ;;  %v4557_v59 = vadd.f32 %v4526_v36, %v4411_v29  ;;  %v9974_v60 = vmul.f32 %v9967_v43, %v9967_v43 }
 0x3fd   : > { %v7112_v27 = vpop.f32.mrf.mxu1  ;;  %v3975_v49 = vadd.f32 %v9934_v5, %v3830_v25  ;;  %v3978_v37 = vadd.f32 %v9938_v62, %v3833_v12  ;;  %v10225_v5 = vld [vmem:[#allocation20_spill] sm:$0xff]  ;;  %v10226_v62 = vld [vmem:[#allocation19_spill] sm:$0xff] }
 0x3fe   : > { %v9977_v55 = vadd.f32 %v9964_v7, %v4704_v38  ;;  %v4703_v40 = vadd.f32 %v4672_v14, %v4557_v59  ;;  %4732 = vrot.lane.b32.xlu1 %v9974_v60, %s7297_s9  ;;  %v4722_v28 = vmul.f32 %v9970_v4, %v9970_v4  ;;  %v4123_v10 = vadd.f32 %v10225_v5, %v3977_v30 }
 0x3ff   : > { %v4536_v20 = vpop.f32.mrf.mxu1  ;;  %v4121_v50 = vadd.f32 %v9930_v32, %v3975_v49  ;;  %v4124_v23 = vadd.f32 %v9932_v33, %v3978_v37  ;;  %v4414_v24 = vadd.f32 %v10226_v62, %v4268_v17  ;;  %v10227_v37 = vsub.s32 1, %v10203_v53 }
 0x400   : > { %v9984_v58 = vadd.f32 %v9964_v7, %v4703_v40  ;;  %4730 = vrot.lane.b32.xlu0 %v4722_v28, %s7297_s9  ;;  %v9989_v31 = vmul.f32 %v9977_v55, %v9977_v55  ;;  %v4269_v13 = vadd.f32 %v4254_v45, %v4123_v10 }
 0x401   : > { %v7115_v6 = vpop.f32.mrf.mxu1  ;;  %v4267_v57 = vadd.f32 %v9950_v18, %v4121_v50  ;;  %v4270_v35 = vadd.f32 %v9954_v11, %v4124_v23  ;;  %v4560_v63 = vadd.f32 %v7112_v27, %v4414_v24 }
 0x402   : > { %4736 = vrot.lane.b32.xlu1 %v9989_v31, %s7297_s9  ;;  %v4724_v42 = vmul.f32 %v9984_v58, %v9984_v58  ;;  %v4415_v33 = vadd.f32 %v9952_v1, %v4269_v13 }
 0x403   : > { %v4546_v46 = vpop.f32.mrf.mxu1  ;;  %v4413_v47 = vadd.f32 %v9944_v44, %v4267_v57  ;;  %v4416_v32 = vadd.f32 %v9948_v51, %v4270_v35 }
 0x404   : > { %4734 = vrot.lane.b32.xlu0 %v4724_v42, %s7297_s9  ;;  %v4561_v39 = vadd.f32 %v4546_v46, %v4415_v33 }
 0x405   : > { %v4559_v16 = vadd.f32 %v4536_v20, %v4413_v47  ;;  %v4562_v18 = vadd.f32 %v7115_v6, %v4416_v32 }
 0x415   : > { %v7156_v52 = vpop.f32.mrf.mxu1 }
 0x416   : > { %v4706_v15 = vadd.f32 %v7156_v52, %v4560_v63 }
 0x417   : > { %v4682_v26 = vpop.f32.mrf.mxu1 }
 0x418   : > { %v10024_v11 = vadd.f32 %v9964_v7, %v4706_v15  ;;  %v4705_v22 = vadd.f32 %v4682_v26, %v4559_v16 }
 0x419   : > { %v7159_v19 = vpop.f32.mrf.mxu1 }
 0x41a   : > { %v10027_v45 = vadd.f32 %v9964_v7, %v4705_v22  ;;  %v4708_v56 = vadd.f32 %v7159_v19, %v4562_v18  ;;  %v4727_v44 = vmul.f32 %v10024_v11, %v10024_v11 }
 0x41b   : > { %v4692_v61 = vpop.f32.mrf.mxu1 }
 0x41c   : > { %v10032_v51 = vadd.f32 %v9964_v7, %v4708_v56  ;;  %v4707_v48 = vadd.f32 %v4692_v61, %v4561_v39  ;;  %4740 = vrot.lane.b32.xlu1 %v4727_v44, %s7297_s9  ;;  %v4726_v1 = vmul.f32 %v10027_v45, %v10027_v45 }
 0x41e   : > { %v10038_v29 = vadd.f32 %v9964_v7, %v4707_v48  ;;  %4738 = vrot.lane.b32.xlu0 %v4726_v1, %s7297_s9  ;;  %v4729_v36 = vmul.f32 %v10032_v51, %v10032_v51 }
 0x420   : > { %4744 = vrot.lane.b32.xlu1 %v4729_v36, %s7297_s9  ;;  %v4728_v38 = vmul.f32 %v10038_v29, %v10038_v29 }
 0x422   : > { %4742 = vrot.lane.b32.xlu0 %v4728_v38, %s7297_s9 }
 0x470   : > { %v4733_v14 = vpop.permute.xlu1 %4732 }
 0x471   : > { %v4747_v21 = vadd.f32 %v4733_v14, %v9974_v60 }
 0x472   : > { %v4731_v59 = vpop.permute.xlu0 %4730 }
 0x473   : > { %v4746_v54 = vadd.f32 %v4731_v59, %v4722_v28  ;;  %v4755_v27 = vadd.f32 1e-12, %v4747_v21  ;;  %v4773_v28 = vrot.slane %v9959_v9, %v10227_v37 }
 0x474   : > { %v4737_v0 = vpop.permute.xlu1 %4736 }
 0x475   : > { %v4754_v3 = vadd.f32 1e-12, %v4746_v54  ;;  %v4749_v2 = vadd.f32 %v4737_v0, %v9989_v31 }
 0x476   : > { %v4735_v40 = vpop.permute.xlu0 %4734 }
 0x477   : > { %v4748_v7 = vadd.f32 %v4735_v40, %v4724_v42  ;;  %7270 = vrsqrt.f32 %v4754_v3  ;;  %v4757_v25 = vadd.f32 1e-12, %v4749_v2 }
 0x478   : > { %7272 = vrsqrt.f32 %v4755_v27 }
 0x479   : > { %v4756_v8 = vadd.f32 1e-12, %v4748_v7 }
 0x47b   : > { %7274 = vrsqrt.f32 %v4756_v8 }
 0x47c   : > { %7276 = vrsqrt.f32 %v4757_v25 }
 0x484   : > { %v7271_v20 = vpop.eup %7270 }
 0x485   : > { %v7273_v42 = vpop.eup %7272  ;;  %v4774_v50 = vmul.f32 %v7271_v20, %v4773_v28 }
 0x486   : > { %v4775_v57 = vmul.f32 %v7273_v42, %v4773_v28  ;;  %v4821_v42 = vld [vmem:[%s10078_s5] sm:$0x3] }
 0x487   : > { %v4782_v53 = vadd.f32 1.0, %v4774_v50 }
 0x488   : > { %v7275_v30 = vpop.eup %7274  ;;  %v4783_v24 = vadd.f32 1.0, %v4775_v57 }
 0x489   : > { %v4776_v35 = vmul.f32 %v7275_v30, %v4773_v28  ;;  %v7277_v62 = vpop.eup %7276  ;;  %v4790_v63 = vmax.f32 %v4782_v53, 0.0 }
 0x48a   : > { %v4777_v13 = vmul.f32 %v7277_v62, %v4773_v28  ;;  %v4791_v47 = vmax.f32 %v4783_v24, 0.0 }
 0x48b   : > { %v4784_v46 = vadd.f32 1.0, %v4776_v35  ;;  %v4798_v32 = vmul.f32 %v4790_v63, %v9970_v4 }
 0x48c   : > { %v4785_v16 = vadd.f32 1.0, %v4777_v13  ;;  %v4799_v26 = vmul.f32 %v4791_v47, %v9967_v43 }
 0x48d   : > { %v4792_v52 = vmax.f32 %v4784_v46, 0.0 }
 0x48e   : > { %v4741_v49 = vpop.permute.xlu1 %4740  ;;  %v4793_v19 = vmax.f32 %v4785_v16, 0.0  ;;  %v4806_v39 = vadd.f32 %v4799_v26, %v4798_v32 }
 0x48f   : > { %v4751_v12 = vadd.f32 %v4741_v49, %v4727_v44  ;;  %v4800_v18 = vmul.f32 %v4792_v52, %v9984_v58 }
 0x490   : > { %v4739_v60 = vpop.permute.xlu0 %4738  ;;  %v4801_v59 = vmul.f32 %v4793_v19, %v9977_v55 }
 0x491   : > { %v4759_v41 = vadd.f32 1e-12, %v4751_v12  ;;  %v4750_v34 = vadd.f32 %v4739_v60, %v4726_v1  ;;  %v4807_v48 = vadd.f32 %v4806_v39, %v4800_v18 }
 0x492   : > { %v4745_v17 = vpop.permute.xlu1 %4744 }
 0x493   : > { %7278 = vrsqrt.f32 %v4759_v41  ;;  %v4758_v31 = vadd.f32 1e-12, %v4750_v34  ;;  %v4753_v6 = vadd.f32 %v4745_v17, %v4729_v36  ;;  %v4808_v21 = vadd.f32 %v4807_v48, %v4801_v59 }
 0x494   : > { %v4743_v23 = vpop.permute.xlu0 %4742 }
 0x495   : > { %7280 = vrsqrt.f32 %v4758_v31  ;;  %v4761_v5 = vadd.f32 1e-12, %v4753_v6  ;;  %v4752_v10 = vadd.f32 %v4743_v23, %v4728_v38 }
 0x497   : > { %7282 = vrsqrt.f32 %v4761_v5  ;;  %v4760_v9 = vadd.f32 1e-12, %v4752_v10 }
 0x499   : > { %7284 = vrsqrt.f32 %v4760_v9 }
 0x4a0   : > { %v7279_v15 = vpop.eup %7278 }
 0x4a1   : > { %v4779_v33 = vmul.f32 %v7279_v15, %v4773_v28 }
 0x4a2   : > { %v7281_v22 = vpop.eup %7280 }
 0x4a3   : > { %v4787_v56 = vadd.f32 1.0, %v4779_v33  ;;  %v4778_v44 = vmul.f32 %v7281_v22, %v4773_v28 }
 0x4a4   : > { %v7283_v61 = vpop.eup %7282 }
 0x4a5   : > { %v4786_v1 = vadd.f32 1.0, %v4778_v44  ;;  %v4781_v36 = vmul.f32 %v7283_v61, %v4773_v28  ;;  %v4795_v14 = vmax.f32 %v4787_v56, 0.0 }
 0x4a6   : > { %v7285_v38 = vpop.eup %7284 }
 0x4a7   : > { %v4794_v4 = vmax.f32 %v4786_v1, 0.0  ;;  %v4780_v40 = vmul.f32 %v7285_v38, %v4773_v28  ;;  %v4789_v54 = vadd.f32 1.0, %v4781_v36  ;;  %v4803_v0 = vmul.f32 %v4795_v14, %v10024_v11 }
 0x4a9   : > { %v4802_v43 = vmul.f32 %v4794_v4, %v10027_v45  ;;  %v4788_v58 = vadd.f32 1.0, %v4780_v40  ;;  %v4797_v3 = vmax.f32 %v4789_v54, 0.0 }
 0x4ab   : > { %v4796_v7 = vmax.f32 %v4788_v58, 0.0  ;;  %v4809_v27 = vadd.f32 %v4808_v21, %v4802_v43  ;;  %v4805_v25 = vmul.f32 %v4797_v3, %v10032_v51  ;;  %v4827_v51 = vld [vmem:[%s10079_s6] sm:$0x3] }
 0x4ad   : > { %v4804_v8 = vmul.f32 %v4796_v7, %v10038_v29  ;;  %v4810_v2 = vadd.f32 %v4809_v27, %v4803_v0  ;;  %v7298_v29 = vmov 0  }
 0x4ae   : > { %7204 = vset.pattern.permute.xlu1 %v7298_v29  ;;  %7205 = vset.pattern.permute.xlu0 %v7298_v29 }
 0x4af   : > { %v4811_v49 = vadd.f32 %v4810_v2, %v4804_v8 }
 0x4b1   : > { %v4812_v55 = vadd.f32 %v4811_v49, %v4805_v25 }
 0x4b3   : > { %v4813_v12 = vrot.slane %v4812_v55, 4 }
 0x4b5   : > { %v4814_v20 = vadd.f32 %v4813_v12, %v4812_v55 }
 0x4b7   : > { %v4815_v37 = vrot.slane %v4814_v20, 2 }
 0x4b9   : > { %v4816_v28 = vadd.f32 %v4815_v37, %v4814_v20 }
 0x4bb   : > { %v4817_v60 = vrot.slane %v4816_v28, 1 }
 0x4bd   : > { %v4818_v45 = vadd.f32 %v4817_v60, %v4816_v28 }
 0x4bf   : > { %v4820_v41 = vmul.f32 0.015625, %v4818_v45 }
 0x4c1   : > { %v4822_v11 = vmul.f32 %v4821_v42, %v4820_v41 }
 0x4c3   : > { %v4824_v34 = vsel %vm4823_vm0, %v4822_v11, 0.0 }
 0x4c4   : > { %4825 = vadd.xlane.f32.xlu0 %v4824_v34 }
 0x54d   : > { %v4826_v30 = vpop.xlane.xlu0 %4825 }
 0x54e   : > { %v4828_v17 = vadd.f32 %v4827_v51, %v4826_v30 }
 0x550   : > { %v4829_v50 = vmul.f32 %v4828_v17, %v4828_v17 }
 0x552   : > { %v4831_v31 = vrot.slane %v4829_v50, 1 }
 0x554   : > { %v4833_v6 = vadd.f32 %v4831_v31, %v4829_v50 }
 0x556   : > { %7286 = vrsqrt.f32 %v4833_v6  ;;  %vm4836_vm1 = vcmp.eq.f32.partialorder %v4833_v6, inf  ;;  %v4839_v35 = vand.u32 2147483648, %v4833_v6  ;;  %vm4838_vm2 = vcmp.eq.f32.partialorder %v4833_v6, 0.0 }
 0x563   : > { %v7287_v57 = vpop.eup %7286 }
 0x564   : > { %v4835_v23 = vmul.f32 %v7287_v57, %v4833_v6 }
 0x566   : > { %v4837_v5 = vsel %vm4836_vm1, %v4833_v6, %v4835_v23 }
 0x567   : > { %v4840_v10 = vsel %vm4838_vm2, %v4839_v35, %v4837_v5 }
 0x568   : > { %4843 = vperm.xlu1 %7204, %v4840_v10  }
 0x5e3   : > { %v4844_v62 = vpop.permute.xlu1 %4843 }
 0x5e4   : > { %4846 = vst [vmem:[%s274_s8] sm:$0x1] %v4844_v62 }
 0x5e5 PF: > { %s17_s24 = sadd.s32 1, %s7294_s24  }
 0x5e6   : > { %p14_p4 = scmp.ge.s32.totalorder %s17_s24, 4  }
 0x5e8   :  { %16 = sbr.rel (!%p14_p4) target bundleno = 1 (0x1), region = 167 }

</bundles_post_ra>
